<compile_context>
chip_gen: v7x
topology: tpu7x:2x2x1
jax: 0.10.0
libtpu: 0.0.40
codegen_flags: <defaults>
</compile_context>

<pallas_src>
import functools
import math

import numpy as np
import jax
import jax.numpy as jnp
from jax.experimental import pallas as pl
from jax.experimental.pallas import tpu as pltpu

NUM_KP = 21        # number of keypoints (reference default)
CROP = 32          # scaled-down crop_size (reference default: 256)
FILTER_SIZE = 21   # dilation window in single_obj_scoremap (reference value)
LANE_BLOCK = 2048  # pixel (lane) tile for the conv matmuls


def _round_up(x, m):
    return (x + m - 1) // m * m


# ---------------------------------------------------------------------------
# Kernel 1: matmul + bias + optional ReLU (bf16 inputs, f32 accumulation)
# Used in two forms:
#   - lane-dense conv form: (Cout, K) @ (K, Q_block), bias (Cout, 1)
#   - small row-form FC:    (M, K) @ (K, N),          bias (1, N)
# ---------------------------------------------------------------------------
def _mm_bias_act_kernel(a_ref, b_ref, bias_ref, o_ref, *, act):
    r = jnp.dot(a_ref[...], b_ref[...], preferred_element_type=jnp.float32)
    r = r + bias_ref[...]
    if act == "relu":
        r = jnp.maximum(r, 0.0)
    o_ref[...] = r.astype(o_ref.dtype)


def matmul_wt(wt, patches, bias, act=None, out_dtype=jnp.bfloat16,
              block_q=LANE_BLOCK):
    """Lane-dense conv matmul: (Cout, K) @ (K, Q) + bias (+ ReLU).

    The pixel axis Q sits on the lanes (unmasked stores); it is padded to a
    multiple of the 128-aligned tile `bq` and blocked with grid = Qp // bq."""
    Cout, K = wt.shape
    K2, Q = patches.shape
    assert K == K2
    bq = min(block_q, _round_up(Q, 128))
    Qp = _round_up(Q, bq)
    if Qp != Q:
        patches = jnp.pad(patches, ((0, 0), (0, Qp - Q)))

    out = pl.pallas_call(
        functools.partial(_mm_bias_act_kernel, act=act),
        out_shape=jax.ShapeDtypeStruct((Cout, Qp), out_dtype),
        grid=(Qp // bq,),
        in_specs=[
            pl.BlockSpec((Cout, K), lambda q: (0, 0)),
            pl.BlockSpec((K, bq), lambda q: (0, q)),
            pl.BlockSpec((Cout, 1), lambda q: (0, 0)),
        ],
        out_specs=pl.BlockSpec((Cout, bq), lambda q: (0, q)),
        compiler_params=pltpu.CompilerParams(
            dimension_semantics=("parallel",)),
    )(wt.astype(jnp.bfloat16), patches.astype(jnp.bfloat16),
      bias.reshape(Cout, 1).astype(jnp.float32))
    return out[:, :Q] if Qp != Q else out


def matmul_fc(a, w, bias, act=None):
    """Small row-form FC: (M, K) @ (K, N) + bias (+ ReLU); M padded to 8 rows."""
    M, K = a.shape
    N = w.shape[1]
    Mp = _round_up(M, 8)
    if Mp != M:
        a = jnp.pad(a, ((0, Mp - M), (0, 0)))
    out = pl.pallas_call(
        functools.partial(_mm_bias_act_kernel, act=act),
        out_shape=jax.ShapeDtypeStruct((Mp, N), jnp.float32),
    )(a.astype(jnp.bfloat16), w.astype(jnp.bfloat16),
      bias.reshape(1, N).astype(jnp.float32))
    return out[:M]


# ---------------------------------------------------------------------------
# Kernel 2: fused separable bilinear resize, whole (B*C) stack in one grid step
# ---------------------------------------------------------------------------
def _resize_kernel(x_ref, rh_ref, rwt_ref, o_ref):
    x = x_ref[...].astype(jnp.bfloat16)                           # (N,H,W)
    y = jnp.einsum('nhw,nwj->nhj', x, rwt_ref[...],
                   preferred_element_type=jnp.float32)            # W-pass
    o_ref[...] = jnp.einsum('nih,nhj->nij', rh_ref[...],
                            y.astype(jnp.bfloat16),
                            preferred_element_type=jnp.float32)   # H-pass


def _resize_matrix(out_size, in_size):
    """Bilinear (align_corners=False, like F.interpolate) resize matrix (numpy const)."""
    o = np.arange(out_size, dtype=np.float32)
    src = (o + 0.5) * (in_size / out_size) - 0.5
    src = np.clip(src, 0.0, in_size - 1.0)
    lo = np.floor(src).astype(np.int32)
    hi = np.minimum(lo + 1, in_size - 1)
    w_hi = src - lo.astype(np.float32)
    w_lo = 1.0 - w_hi
    R = np.zeros((out_size, in_size), np.float32)
    np.add.at(R, (np.arange(out_size), lo), w_lo)
    np.add.at(R, (np.arange(out_size), hi), w_hi)
    return R


def bilinear_resize_nchw(x, out_h, out_w):
    B, C, H, W = x.shape
    N = B * C
    rh = jnp.asarray(_resize_matrix(out_h, H), jnp.bfloat16)       # (out_h, H)
    rwt = jnp.asarray(_resize_matrix(out_w, W).T, jnp.bfloat16)    # (W, out_w)
    # TODO(synk): the per-plane broadcast duplicates the (tiny) resize matrices and the
    # output stays (N, out_h, out_w); at reference scale grid over N and flatten the
    # stored last dim to out_h*out_w for fully lane-dense stores.
    rh_b = jnp.broadcast_to(rh, (N, out_h, H))
    rwt_b = jnp.broadcast_to(rwt, (N, W, out_w))
    out = pl.pallas_call(
        _resize_kernel,
        out_shape=jax.ShapeDtypeStruct((N, out_h, out_w), jnp.float32),
    )(x.reshape(N, H, W), rh_b, rwt_b)
    return out.reshape(B, C, out_h, out_w)


# ---------------------------------------------------------------------------
# Kernel 3: fused single_obj_scoremap (softmax + round + in-kernel seed +
#           iterative batched bf16 binary dilation), whole batch in one step
# ---------------------------------------------------------------------------
def _single_obj_kernel(s0_ref, s1_ref, bh_ref, bw_ref, mask_ref, *, num_passes):
    s0 = s0_ref[...]                                  # (B,H,W)
    s1 = s1_ref[...]
    fg = 1.0 / (1.0 + jnp.exp(s0 - s1))               # 2-channel softmax, fg prob
    det = jnp.where(fg >= 0.5, 1.0, 0.0).astype(jnp.bfloat16)       # round(fg)
    mx = jnp.max(jnp.max(fg, axis=2, keepdims=True), axis=1, keepdims=True)
    obj = jnp.where(fg >= mx, 1.0, 0.0).astype(jnp.bfloat16)        # seed at the max
    bh = bh_ref[...]                                  # (B,H,H) bf16 band matrix
    bw = bw_ref[...]                                  # (B,W,W) bf16 band matrix
    for _ in range(num_passes):
        # separable 21x21 morphological dilation as two batched band-matrix matmuls
        t = jnp.einsum('bik,bkw->biw', bh, obj, preferred_element_type=jnp.float32)
        dil = jnp.einsum('biw,bwj->bij', t.astype(jnp.bfloat16), bw,
                         preferred_element_type=jnp.float32)
        obj = det * jnp.where(dil > 0.0, 1.0, 0.0).astype(jnp.bfloat16)
    mask_ref[...] = obj.astype(jnp.float32)


def single_obj_scoremap(scoremap, filter_size=FILTER_SIZE):
    """(B,2,H,W) hand scoremap -> (B,H,W) mask of the highest-scoring object."""
    B, C, H, W = scoremap.shape
    assert C == 2
    half = filter_size // 2
    band_h = np.abs(np.arange(H)[:, None] - np.arange(H)[None, :]) <= half
    band_w = np.abs(np.arange(W)[:, None] - np.arange(W)[None, :]) <= half
    bh = jnp.broadcast_to(jnp.asarray(band_h, jnp.bfloat16), (B, H, H))
    bw = jnp.broadcast_to(jnp.asarray(band_w, jnp.bfloat16), (B, W, W))
    num_passes = max(H, W) // half                    # same pass count as the reference
    return pl.pallas_call(
        functools.partial(_single_obj_kernel, num_passes=num_passes),
        out_shape=jax.ShapeDtypeStruct((B, H, W), jnp.float32),
    )(scoremap[:, 0].astype(jnp.float32), scoremap[:, 1].astype(jnp.float32),
      bh, bw)


# ---------------------------------------------------------------------------
# NN building blocks (heavy math goes through the Pallas kernels above).
# Activations live in channel-first (C, B, H, W) layout, bf16.
# ---------------------------------------------------------------------------
def _im2col_cf(x, kh, kw, stride, pad):
    """x: (C,B,H,W) -> patches (kh*kw*C, B*Ho*Wo); feature order (ki, kj, c)."""
    # TODO(synk): at reference scale (crop=256) fuse this into the conv kernel
    # (halo block DMA + 9 shifted in-VMEM matmuls) to avoid the ~9x activation
    # HBM traffic of wrapper-side im2col.
    C, B, H, W = x.shape
    if pad > 0:
        x = jnp.pad(x, ((0, 0), (0, 0), (pad, pad), (pad, pad)))
    Hp, Wp = H + 2 * pad, W + 2 * pad
    Ho = (Hp - kh) // stride + 1
    Wo = (Wp - kw) // stride + 1
    if kh == 1 and kw == 1 and stride == 1:
        return x.reshape(C, B * H * W), Ho, Wo
    rows = []
    for i in range(kh):
        for j in range(kw):
            rows.append(
                x[:, :, i:i + stride * Ho:stride, j:j + stride * Wo:stride]
                .reshape(C, B * Ho * Wo))
    return jnp.concatenate(rows, axis=0), Ho, Wo


def conv2d_cf(x, wt, b, kh, kw, stride=1, padding=None, act=None,
              out_dtype=jnp.bfloat16):
    """x: (Cin,B,H,W); wt: (Cout, kh*kw*Cin) bf16; returns (Cout,B,Ho,Wo)."""
    if padding is None:
        padding = kh // 2
    patches, Ho, Wo = _im2col_cf(x, kh, kw, stride, padding)
    out = matmul_wt(wt, patches, b, act=act, out_dtype=out_dtype)
    return out.reshape(wt.shape[0], x.shape[1], Ho, Wo)


def maxpool2_cf(x):
    # TODO(synk): fuse into the preceding conv epilogue to drop one activation round-trip.
    C, B, H, W = x.shape
    return x.reshape(C, B, H // 2, 2, W // 2, 2).max(axis=(3, 5))


# ---------------------------------------------------------------------------
# Sub-networks (scaled-down, structurally faithful)
# ---------------------------------------------------------------------------
def handsegnet(x_cf, p):
    _, B, H, W = x_cf.shape
    h = conv2d_cf(x_cf, p['hs_conv1_wt'], p['hs_conv1_b'], 3, 3, act='relu')
    h = maxpool2_cf(h)
    h = conv2d_cf(h, p['hs_conv2_wt'], p['hs_conv2_b'], 3, 3, act='relu')
    h = maxpool2_cf(h)
    h = conv2d_cf(h, p['hs_conv3_wt'], p['hs_conv3_b'], 1, 1)      # (2,B,H/4,W/4)
    h = jnp.transpose(h, (1, 0, 2, 3))                             # (B,2,H/4,W/4)
    return bilinear_resize_nchw(h, H, W)                           # (B,2,H,W) f32


def posenet(x_cf, p):
    h = conv2d_cf(x_cf, p['pn_conv1_wt'], p['pn_conv1_b'], 3, 3, act='relu')
    h = maxpool2_cf(h)
    h = conv2d_cf(h, p['pn_conv2_wt'], p['pn_conv2_b'], 3, 3, act='relu')
    h = maxpool2_cf(h)
    return conv2d_cf(h, p['pn_conv3_wt'], p['pn_conv3_b'], 3, 3)   # (21,B,cs/4,cs/4)


def pose_head(kp_cf, hand_sides, p):
    """Packed PosePrior + ViewPoint: one 64-channel conv, block-diagonal FCs."""
    f = conv2d_cf(kp_cf, p['head_conv_wt'], p['head_conv_b'], 3, 3,
                  stride=2, act='relu')                            # (64,B,cs/8,cs/8)
    B = f.shape[1]
    pp_flat = jnp.transpose(f[:32], (1, 0, 2, 3)).reshape(B, -1)
    vp_flat = jnp.transpose(f[32:], (1, 0, 2, 3)).reshape(B, -1)
    hs = hand_sides.astype(jnp.bfloat16)
    packed = jnp.concatenate([pp_flat, hs, vp_flat, hs], axis=1)
    h = matmul_fc(packed, p['head_fc1_w'], p['head_fc1_b'], act='relu')
    h = matmul_fc(h, p['head_fc2_w'], p['head_fc2_b'])
    coord_can = h[:, :NUM_KP * 3].reshape(B, NUM_KP, 3)
    rot_params = h[:, NUM_KP * 3:NUM_KP * 3 + 3]
    return coord_can, rot_params


# ---------------------------------------------------------------------------
# Helper ops from the reference implementation (small, data-dependent -> XLA)
# ---------------------------------------------------------------------------
def calc_center_bb(mask):
    B, H, W = mask.shape
    m = mask > 0.5
    has = jnp.any(m, axis=(1, 2))
    row_any = jnp.any(m, axis=2)
    col_any = jnp.any(m, axis=1)
    yi = jnp.arange(H, dtype=jnp.float32)
    xi = jnp.arange(W, dtype=jnp.float32)
    y_min = jnp.min(jnp.where(row_any, yi[None, :], float(H)), axis=1)
    y_max = jnp.max(jnp.where(row_any, yi[None, :], -1.0), axis=1)
    x_min = jnp.min(jnp.where(col_any, xi[None, :], float(W)), axis=1)
    x_max = jnp.max(jnp.where(col_any, xi[None, :], -1.0), axis=1)
    y_min = jnp.where(has, y_min, 0.0); y_max = jnp.where(has, y_max, H - 1.0)
    x_min = jnp.where(has, x_min, 0.0); x_max = jnp.where(has, x_max, W - 1.0)
    centers = jnp.stack([0.5 * (y_min + y_max), 0.5 * (x_min + x_max)], axis=1)
    bbs = jnp.stack([y_min, x_min, y_max, x_max], axis=1)
    crop_size_best = jnp.maximum(jnp.maximum(y_max - y_min, x_max - x_min), 2.0)
    return centers, bbs, crop_size_best


def crop_image_from_xy(images, centers, crop_size, scales):
    """Per-batch crop of size crop_size/scale around center, bilinearly resized."""
    # TODO(synk): data-dependent crop uses a JAX gather; a Pallas DMA-gather is not
    # warranted at this size.
    B, H, W, C = images.shape

    def one(img, center, sc):
        size_src = crop_size / sc
        step = size_src / crop_size
        o = jnp.arange(crop_size, dtype=jnp.float32)
        src_y = jnp.clip(center[0] - size_src / 2.0 + (o + 0.5) * step - 0.5, 0.0, H - 1.0)
        src_x = jnp.clip(center[1] - size_src / 2.0 + (o + 0.5) * step - 0.5, 0.0, W - 1.0)
        y0 = jnp.floor(src_y).astype(jnp.int32)
        x0 = jnp.floor(src_x).astype(jnp.int32)
        y1 = jnp.minimum(y0 + 1, H - 1)
        x1 = jnp.minimum(x0 + 1, W - 1)
        wy = (src_y - y0.astype(jnp.float32))[:, None, None]
        wx = (src_x - x0.astype(jnp.float32))[None, :, None]
        g = lambda yi, xi: img[yi][:, xi]
        top = (1 - wx) * g(y0, x0) + wx * g(y0, x1)
        bot = (1 - wx) * g(y1, x0) + wx * g(y1, x1)
        return (1 - wy) * top + wy * bot

    return jax.vmap(one)(images, centers, scales)


def get_rotation_matrix(rot_params):
    ux, uy, uz = rot_params[:, 0], rot_params[:, 1], rot_params[:, 2]
    theta = jnp.sqrt(ux * ux + uy * uy + uz * uz + 1e-8)
    st, ct = jnp.sin(theta), jnp.cos(theta)
    one_ct = 1.0 - ct
    nf = 1.0 / theta
    ux, uy, uz = ux * nf, uy * nf, uz * nf
    r0 = jnp.stack([ct + ux * ux * one_ct, ux * uy * one_ct - uz * st, ux * uz * one_ct + uy * st], -1)
    r1 = jnp.stack([uy * ux * one_ct + uz * st, ct + uy * uy * one_ct, uy * uz * one_ct - ux * st], -1)
    r2 = jnp.stack([uz * ux * one_ct - uy * st, uz * uy * one_ct + ux * st, ct + uz * uz * one_ct], -1)
    return jnp.stack([r0, r1, r2], axis=1)                      # (B,3,3)


def flip_hand(coords, cond_right):
    mirrored = jnp.concatenate([coords[..., :2], -coords[..., 2:]], axis=-1)
    return jnp.where(cond_right, mirrored, coords)


# ---------------------------------------------------------------------------
# Full forward (deploy=False path of ColorHandPose3D.forward)
# ---------------------------------------------------------------------------
def colorhandpose3d_forward(x, hand_sides, params, crop_size=CROP):
    x2 = x[-1]                                                  # (B,3,H,W) NCHW input
    B, _, H, W = x2.shape
    x_cf = jnp.transpose(x2, (1, 0, 2, 3))                      # channel-first for convs

    hand_scoremap = handsegnet(x_cf, params)                    # (B,2,H,W) f32
    hand_mask = single_obj_scoremap(hand_scoremap)              # (B,H,W)

    centers, _, crops = calc_center_bb(hand_mask)
    crops = crops * 1.25
    scale_crop = jnp.clip(crop_size / crops, 0.25, 5.0)
    x2_nhwc = jnp.transpose(x2, (0, 2, 3, 1))
    image_crop = crop_image_from_xy(x2_nhwc, centers, crop_size, scale_crop)  # (B,cs,cs,3)

    kp_cf = posenet(jnp.transpose(image_crop, (3, 0, 1, 2)), params)          # (21,B,cs/4,cs/4)
    coord_can, rot_params = pose_head(kp_cf, hand_sides, params)
    rot_matrix = get_rotation_matrix(rot_params)                # (B,3,3)

    cond_right = jnp.argmax(hand_sides, axis=1) == 1
    cond_right_all = jnp.broadcast_to(cond_right[:, None, None], (B, NUM_KP, 3))
    coords_xyz_can_flip = flip_hand(coord_can, cond_right_all)
    coords_xyz_rel_normed = jnp.einsum('bkj,bjm->bkm', coords_xyz_can_flip, rot_matrix)
    coords_xyz_rel_normed = flip_hand(coords_xyz_rel_normed, cond_right_all)

    keypoints_scoremap_up = bilinear_resize_nchw(
        jnp.transpose(kp_cf, (1, 0, 2, 3)), crop_size, crop_size)             # (B,21,cs,cs)

    return (coords_xyz_rel_normed,
            keypoints_scoremap_up,                              # (B,21,cs,cs) NCHW
            jnp.transpose(image_crop, (0, 3, 1, 2)),            # (B,3,cs,cs) NCHW
            centers,
            scale_crop,
            hand_mask[:, None])                                 # (B,1,H,W)


# ---------------------------------------------------------------------------
# Deterministic parameter init + one-time weight preparation (no checkpoint)
# ---------------------------------------------------------------------------
def init_params(key):
    ks = jax.random.split(key, 12)

    def conv(k, kh, kw, cin, cout):
        w = jax.random.normal(k, (kh, kw, cin, cout), jnp.float32) / math.sqrt(kh * kw * cin)
        return w, jnp.zeros((cout,), jnp.float32)

    def fc(k, din, dout):
        w = jax.random.normal(k, (din, dout), jnp.float32) / math.sqrt(din)
        return w, jnp.zeros((dout,), jnp.float32)

    p = {}
    p['hs_conv1_w'], p['hs_conv1_b'] = conv(ks[0], 3, 3, 3, 8)
    p['hs_conv2_w'], p['hs_conv2_b'] = conv(ks[1], 3, 3, 8, 16)
    p['hs_conv3_w'], p['hs_conv3_b'] = conv(ks[2], 1, 1, 16, 2)
    p['pn_conv1_w'], p['pn_conv1_b'] = conv(ks[3], 3, 3, 3, 16)
    p['pn_conv2_w'], p['pn_conv2_b'] = conv(ks[4], 3, 3, 16, 32)
    p['pn_conv3_w'], p['pn_conv3_b'] = conv(ks[5], 3, 3, 32, NUM_KP)
    flat_dim = (CROP // 8) * (CROP // 8) * 32 + 2
    p['pp_conv_w'], p['pp_conv_b'] = conv(ks[6], 3, 3, NUM_KP, 32)
    p['pp_fc1_w'], p['pp_fc1_b'] = fc(ks[7], flat_dim, 64)
    p['pp_fc2_w'], p['pp_fc2_b'] = fc(ks[8], 64, NUM_KP * 3)
    p['vp_conv_w'], p['vp_conv_b'] = conv(ks[9], 3, 3, NUM_KP, 32)
    p['vp_fc1_w'], p['vp_fc1_b'] = fc(ks[10], flat_dim, 64)
    p['vp_fc2_w'], p['vp_fc2_b'] = fc(ks[11], 64, 3)
    return p


def prepare_params(raw):
    """One-time prep: conv kernels reshaped to the TRANSPOSED (Cout, K) matmul form and
    cast to bf16; PosePrior+ViewPoint packed into one conv + block-diagonal FCs."""
    def matT(w):
        kh, kw, cin, cout = w.shape
        return w.reshape(kh * kw * cin, cout).T.astype(jnp.bfloat16)

    p = {}
    for name in ('hs_conv1', 'hs_conv2', 'hs_conv3',
                 'pn_conv1', 'pn_conv2', 'pn_conv3'):
        p[name + '_wt'] = matT(raw[name + '_w'])
        p[name + '_b'] = raw[name + '_b']

    # packed head conv: 21 -> (32 PosePrior | 32 ViewPoint)
    w = jnp.concatenate([raw['pp_conv_w'], raw['vp_conv_w']], axis=3)
    p['head_conv_wt'] = matT(w)
    p['head_conv_b'] = jnp.concatenate([raw['pp_conv_b'], raw['vp_conv_b']])

    d1 = raw['pp_fc1_w'].shape[0]                      # flat_dim (features + hand_side)
    fc1 = jnp.zeros((2 * d1, 128), jnp.float32)
    fc1 = fc1.at[:d1, :64].set(raw['pp_fc1_w']).at[d1:, 64:].set(raw['vp_fc1_w'])
    p['head_fc1_w'] = fc1.astype(jnp.bfloat16)
    p['head_fc1_b'] = jnp.concatenate([raw['pp_fc1_b'], raw['vp_fc1_b']])

    fc2 = jnp.zeros((128, NUM_KP * 3 + 3), jnp.float32)
    fc2 = fc2.at[:64, :NUM_KP * 3].set(raw['pp_fc2_w']).at[64:, NUM_KP * 3:].set(raw['vp_fc2_w'])
    p['head_fc2_w'] = fc2.astype(jnp.bfloat16)
    p['head_fc2_b'] = jnp.concatenate([raw['pp_fc2_b'], raw['vp_fc2_b']])
    return p


if __name__ == "__main__":
    key = jax.random.PRNGKey(0)
    kx1, kx2, kp = jax.random.split(key, 3)
    B, C, H, W = 2, 3, 32, 32
    x1 = jax.random.uniform(kx1, (B, C, H, W), jnp.float32)
    x2 = jax.random.uniform(kx2, (B, C, H, W), jnp.float32)
    x = (x1, x2)                                               # forward uses x[-1]
    hand_sides = jnp.array([[1.0, 0.0], [0.0, 1.0]], jnp.float32)
    params = prepare_params(init_params(kp))                   # weight prep once, off the hot path

    fwd = jax.jit(colorhandpose3d_forward)
    outs = jax.block_until_ready(fwd(x, hand_sides, params))
    coords, kp_sm, image_crop, centers, scale_crop, hand_mask = outs

    assert coords.shape == (B, NUM_KP, 3)
    assert kp_sm.shape == (B, NUM_KP, CROP, CROP)
    assert image_crop.shape == (B, 3, CROP, CROP)
    assert centers.shape == (B, 2)
    assert scale_crop.shape == (B,)
    assert hand_mask.shape == (B, 1, H, W)
    assert all(bool(jnp.all(jnp.isfinite(o))) for o in
               (coords, kp_sm, image_crop, centers, scale_crop, hand_mask))
    print("KERNEL_OK")
</pallas_src>

<mosaic_0001>
module attributes {stable_mosaic.version = 11 : i64} {
  func.func @_mm_bias_act_kernel(%arg0: i32, %arg1: memref<8x27xbf16, #tpu.memory_space<vmem>>, %arg2: memref<27x2048xbf16, #tpu.memory_space<vmem>>, %arg3: memref<8x1xf32, #tpu.memory_space<vmem>>, %arg4: memref<8x2048xbf16, #tpu.memory_space<vmem>>) attributes {dimension_semantics = [#tpu.dimension_semantics<parallel>], iteration_bounds = array<i64: 1>, scalar_prefetch = 0 : i64, scratch_operands = 0 : i64, tpu.core_type = #tpu.core_type<tc>, window_params = [{pipeline_mode = #tpu.pipeline_mode<synchronous>, transform_indices = @transform_0, window_bounds = array<i64: 8, 27>}, {transform_indices = @transform_1, window_bounds = array<i64: 27, 2048>}, {pipeline_mode = #tpu.pipeline_mode<synchronous>, transform_indices = @transform_2, window_bounds = array<i64: 8, 1>}, {transform_indices = @transform_3, window_bounds = array<i64: 8, 2048>}]} {
    %c0 = arith.constant 0 : index
    %c0_0 = arith.constant 0 : index
    %0 = vector.load %arg1[%c0, %c0_0] : memref<8x27xbf16, #tpu.memory_space<vmem>>, vector<8x27xbf16>
    %c0_1 = arith.constant 0 : index
    %c0_2 = arith.constant 0 : index
    %1 = vector.load %arg2[%c0_1, %c0_2] : memref<27x2048xbf16, #tpu.memory_space<vmem>>, vector<27x2048xbf16>
    %cst = arith.constant dense<0.000000e+00> : vector<8x2048xf32>
    %2 = tpu.matmul %0, %1, %cst {dimension_numbers = #tpu.dot_dimension_numbers<[1], [0], [0], [1], [0, 0, 1, 1], [], []>} : vector<8x27xbf16>, vector<27x2048xbf16>, vector<8x2048xf32> -> vector<8x2048xf32>
    %c0_3 = arith.constant 0 : index
    %c0_4 = arith.constant 0 : index
    %3 = vector.load %arg3[%c0_3, %c0_4] : memref<8x1xf32, #tpu.memory_space<vmem>>, vector<8x1xf32>
    %4 = vector.broadcast %3 : vector<8x1xf32> to vector<8x2048xf32>
    %5 = arith.addf %2, %4 : vector<8x2048xf32>
    %cst_5 = arith.constant 0.000000e+00 : f32
    %6 = vector.broadcast %cst_5 : f32 to vector<8x2048xf32>
    %7 = arith.maximumf %5, %6 : vector<8x2048xf32>
    %8 = arith.truncf %7 : vector<8x2048xf32> to vector<8x2048xbf16>
    %c0_6 = arith.constant 0 : index
    %c0_7 = arith.constant 0 : index
    %9 = vector.load %arg4[%c0_6, %c0_7] : memref<8x2048xbf16, #tpu.memory_space<vmem>>, vector<8x2048xbf16>
    tpu.vector_store %arg4[%c0_6, %c0_7], %8 {strides = array<i32>} : memref<8x2048xbf16, #tpu.memory_space<vmem>>, vector<8x2048xbf16>,
    return
  }
  func.func @transform_0(%arg0: i32) -> (i32, i32) {
    %c0_i32 = arith.constant 0 : i32
    %c0_i32_0 = arith.constant 0 : i32
    %c0_i32_1 = arith.constant 0 : i32
    return %c0_i32, %c0_i32_0 : i32, i32
  }
  func.func @transform_1(%arg0: i32) -> (i32, i32) {
    %c0_i32 = arith.constant 0 : i32
    %c0_i32_0 = arith.constant 0 : i32
    return %c0_i32, %arg0 : i32, i32
  }
  func.func @transform_2(%arg0: i32) -> (i32, i32) {
    %c0_i32 = arith.constant 0 : i32
    %c0_i32_0 = arith.constant 0 : i32
    %c0_i32_1 = arith.constant 0 : i32
    return %c0_i32, %c0_i32_0 : i32, i32
  }
  func.func @transform_3(%arg0: i32) -> (i32, i32) {
    %c0_i32 = arith.constant 0 : i32
    %c0_i32_0 = arith.constant 0 : i32
    return %c0_i32, %arg0 : i32, i32
  }
}

module attributes {stable_mosaic.version = 11 : i64} {
  func.func @_mm_bias_act_kernel(%arg0: i32, %arg1: memref<16x72xbf16, #tpu.memory_space<vmem>>, %arg2: memref<72x512xbf16, #tpu.memory_space<vmem>>, %arg3: memref<16x1xf32, #tpu.memory_space<vmem>>, %arg4: memref<16x512xbf16, #tpu.memory_space<vmem>>) attributes {dimension_semantics = [#tpu.dimension_semantics<parallel>], iteration_bounds = array<i64: 1>, scalar_prefetch = 0 : i64, scratch_operands = 0 : i64, tpu.core_type = #tpu.core_type<tc>, window_params = [{pipeline_mode = #tpu.pipeline_mode<synchronous>, transform_indices = @transform_0, window_bounds = array<i64: 16, 72>}, {transform_indices = @transform_1, window_bounds = array<i64: 72, 512>}, {pipeline_mode = #tpu.pipeline_mode<synchronous>, transform_indices = @transform_2, window_bounds = array<i64: 16, 1>}, {transform_indices = @transform_3, window_bounds = array<i64: 16, 512>}]} {
    %c0 = arith.constant 0 : index
    %c0_0 = arith.constant 0 : index
    %0 = vector.load %arg1[%c0, %c0_0] : memref<16x72xbf16, #tpu.memory_space<vmem>>, vector<16x72xbf16>
    %c0_1 = arith.constant 0 : index
    %c0_2 = arith.constant 0 : index
    %1 = vector.load %arg2[%c0_1, %c0_2] : memref<72x512xbf16, #tpu.memory_space<vmem>>, vector<72x512xbf16>
    %cst = arith.constant dense<0.000000e+00> : vector<16x512xf32>
    %2 = tpu.matmul %0, %1, %cst {dimension_numbers = #tpu.dot_dimension_numbers<[1], [0], [0], [1], [0, 0, 1, 1], [], []>} : vector<16x72xbf16>, vector<72x512xbf16>, vector<16x512xf32> -> vector<16x512xf32>
    %c0_3 = arith.constant 0 : index
    %c0_4 = arith.constant 0 : index
    %3 = vector.load %arg3[%c0_3, %c0_4] : memref<16x1xf32, #tpu.memory_space<vmem>>, vector<16x1xf32>
    %4 = vector.broadcast %3 : vector<16x1xf32> to vector<16x512xf32>
    %5 = arith.addf %2, %4 : vector<16x512xf32>
    %cst_5 = arith.constant 0.000000e+00 : f32
    %6 = vector.broadcast %cst_5 : f32 to vector<16x512xf32>
    %7 = arith.maximumf %5, %6 : vector<16x512xf32>
    %8 = arith.truncf %7 : vector<16x512xf32> to vector<16x512xbf16>
    %c0_6 = arith.constant 0 : index
    %c0_7 = arith.constant 0 : index
    %9 = vector.load %arg4[%c0_6, %c0_7] : memref<16x512xbf16, #tpu.memory_space<vmem>>, vector<16x512xbf16>
    tpu.vector_store %arg4[%c0_6, %c0_7], %8 {strides = array<i32>} : memref<16x512xbf16, #tpu.memory_space<vmem>>, vector<16x512xbf16>,
    return
  }
  func.func @transform_0(%arg0: i32) -> (i32, i32) {
    %c0_i32 = arith.constant 0 : i32
    %c0_i32_0 = arith.constant 0 : i32
    %c0_i32_1 = arith.constant 0 : i32
    return %c0_i32, %c0_i32_0 : i32, i32
  }
  func.func @transform_1(%arg0: i32) -> (i32, i32) {
    %c0_i32 = arith.constant 0 : i32
    %c0_i32_0 = arith.constant 0 : i32
    return %c0_i32, %arg0 : i32, i32
  }
  func.func @transform_2(%arg0: i32) -> (i32, i32) {
    %c0_i32 = arith.constant 0 : i32
    %c0_i32_0 = arith.constant 0 : i32
    %c0_i32_1 = arith.constant 0 : i32
    return %c0_i32, %c0_i32_0 : i32, i32
  }
  func.func @transform_3(%arg0: i32) -> (i32, i32) {
    %c0_i32 = arith.constant 0 : i32
    %c0_i32_0 = arith.constant 0 : i32
    return %c0_i32, %arg0 : i32, i32
  }
}

module attributes {stable_mosaic.version = 11 : i64} {
  func.func @_mm_bias_act_kernel(%arg0: i32, %arg1: memref<2x16xbf16, #tpu.memory_space<vmem>>, %arg2: memref<16x128xbf16, #tpu.memory_space<vmem>>, %arg3: memref<2x1xf32, #tpu.memory_space<vmem>>, %arg4: memref<2x128xbf16, #tpu.memory_space<vmem>>) attributes {dimension_semantics = [#tpu.dimension_semantics<parallel>], iteration_bounds = array<i64: 1>, scalar_prefetch = 0 : i64, scratch_operands = 0 : i64, tpu.core_type = #tpu.core_type<tc>, window_params = [{pipeline_mode = #tpu.pipeline_mode<synchronous>, transform_indices = @transform_0, window_bounds = array<i64: 2, 16>}, {transform_indices = @transform_1, window_bounds = array<i64: 16, 128>}, {pipeline_mode = #tpu.pipeline_mode<synchronous>, transform_indices = @transform_2, window_bounds = array<i64: 2, 1>}, {transform_indices = @transform_3, window_bounds = array<i64: 2, 128>}]} {
    %c0 = arith.constant 0 : index
    %c0_0 = arith.constant 0 : index
    %0 = vector.load %arg1[%c0, %c0_0] : memref<2x16xbf16, #tpu.memory_space<vmem>>, vector<2x16xbf16>
    %c0_1 = arith.constant 0 : index
    %c0_2 = arith.constant 0 : index
    %1 = vector.load %arg2[%c0_1, %c0_2] : memref<16x128xbf16, #tpu.memory_space<vmem>>, vector<16x128xbf16>
    %cst = arith.constant dense<0.000000e+00> : vector<2x128xf32>
    %2 = tpu.matmul %0, %1, %cst {dimension_numbers = #tpu.dot_dimension_numbers<[1], [0], [0], [1], [0, 0, 1, 1], [], []>} : vector<2x16xbf16>, vector<16x128xbf16>, vector<2x128xf32> -> vector<2x128xf32>
    %c0_3 = arith.constant 0 : index
    %c0_4 = arith.constant 0 : index
    %3 = vector.load %arg3[%c0_3, %c0_4] : memref<2x1xf32, #tpu.memory_space<vmem>>, vector<2x1xf32>
    %4 = vector.broadcast %3 : vector<2x1xf32> to vector<2x128xf32>
    %5 = arith.addf %2, %4 : vector<2x128xf32>
    %6 = arith.truncf %5 : vector<2x128xf32> to vector<2x128xbf16>
    %c0_5 = arith.constant 0 : index
    %c0_6 = arith.constant 0 : index
    %7 = vector.load %arg4[%c0_5, %c0_6] : memref<2x128xbf16, #tpu.memory_space<vmem>>, vector<2x128xbf16>
    tpu.vector_store %arg4[%c0_5, %c0_6], %6 {strides = array<i32>} : memref<2x128xbf16, #tpu.memory_space<vmem>>, vector<2x128xbf16>,
    return
  }
  func.func @transform_0(%arg0: i32) -> (i32, i32) {
    %c0_i32 = arith.constant 0 : i32
    %c0_i32_0 = arith.constant 0 : i32
    %c0_i32_1 = arith.constant 0 : i32
    return %c0_i32, %c0_i32_0 : i32, i32
  }
  func.func @transform_1(%arg0: i32) -> (i32, i32) {
    %c0_i32 = arith.constant 0 : i32
    %c0_i32_0 = arith.constant 0 : i32
    return %c0_i32, %arg0 : i32, i32
  }
  func.func @transform_2(%arg0: i32) -> (i32, i32) {
    %c0_i32 = arith.constant 0 : i32
    %c0_i32_0 = arith.constant 0 : i32
    %c0_i32_1 = arith.constant 0 : i32
    return %c0_i32, %c0_i32_0 : i32, i32
  }
  func.func @transform_3(%arg0: i32) -> (i32, i32) {
    %c0_i32 = arith.constant 0 : i32
    %c0_i32_0 = arith.constant 0 : i32
    return %c0_i32, %arg0 : i32, i32
  }
}

module attributes {stable_mosaic.version = 11 : i64} {
  func.func @_resize_kernel(%arg0: memref<4x8x8xbf16, #tpu.memory_space<vmem>>, %arg1: memref<4x32x8xbf16, #tpu.memory_space<vmem>>, %arg2: memref<4x8x32xbf16, #tpu.memory_space<vmem>>, %arg3: memref<4x32x32xf32, #tpu.memory_space<vmem>>) attributes {dimension_semantics = [], scalar_prefetch = 0 : i64, scratch_operands = 0 : i64, tpu.core_type = #tpu.core_type<tc>} {
    %c0 = arith.constant 0 : index
    %c0_0 = arith.constant 0 : index
    %c0_1 = arith.constant 0 : index
    %0 = vector.load %arg0[%c0, %c0_0, %c0_1] : memref<4x8x8xbf16, #tpu.memory_space<vmem>>, vector<4x8x8xbf16>
    %c0_2 = arith.constant 0 : index
    %c0_3 = arith.constant 0 : index
    %c0_4 = arith.constant 0 : index
    %1 = vector.load %arg2[%c0_2, %c0_3, %c0_4] : memref<4x8x32xbf16, #tpu.memory_space<vmem>>, vector<4x8x32xbf16>
    "tpu.trace_start"() <{level = 10 : i32, message = "nhw,nwj->nhj"}> : () -> ()
    %cst = arith.constant dense<0.000000e+00> : vector<4x8x32xf32>
    %2 = tpu.matmul %0, %1, %cst {dimension_numbers = #tpu.dot_dimension_numbers<[2], [1], [1], [2], [0, 0, 0, 1, 1, 2], [0], [0]>} : vector<4x8x8xbf16>, vector<4x8x32xbf16>, vector<4x8x32xf32> -> vector<4x8x32xf32>
    "tpu.trace_stop"() : () -> ()
    %c0_5 = arith.constant 0 : index
    %c0_6 = arith.constant 0 : index
    %c0_7 = arith.constant 0 : index
    %3 = vector.load %arg1[%c0_5, %c0_6, %c0_7] : memref<4x32x8xbf16, #tpu.memory_space<vmem>>, vector<4x32x8xbf16>
    %4 = arith.truncf %2 : vector<4x8x32xf32> to vector<4x8x32xbf16>
    "tpu.trace_start"() <{level = 10 : i32, message = "nih,nhj->nij"}> : () -> ()
    %cst_8 = arith.constant dense<0.000000e+00> : vector<4x32x32xf32>
    %5 = tpu.matmul %3, %4, %cst_8 {dimension_numbers = #tpu.dot_dimension_numbers<[2], [1], [1], [2], [0, 0, 0, 1, 1, 2], [0], [0]>} : vector<4x32x8xbf16>, vector<4x8x32xbf16>, vector<4x32x32xf32> -> vector<4x32x32xf32>
    "tpu.trace_stop"() : () -> ()
    %c0_9 = arith.constant 0 : index
    %c0_10 = arith.constant 0 : index
    %c0_11 = arith.constant 0 : index
    %6 = vector.load %arg3[%c0_9, %c0_10, %c0_11] : memref<4x32x32xf32, #tpu.memory_space<vmem>>, vector<4x32x32xf32>
    tpu.vector_store %arg3[%c0_9, %c0_10, %c0_11], %5 {strides = array<i32>} : memref<4x32x32xf32, #tpu.memory_space<vmem>>, vector<4x32x32xf32>,
    return
  }
}

module attributes {stable_mosaic.version = 11 : i64} {
  func.func @_single_obj_kernel(%arg0: memref<2x32x32xf32, #tpu.memory_space<vmem>>, %arg1: memref<2x32x32xf32, #tpu.memory_space<vmem>>, %arg2: memref<2x32x32xbf16, #tpu.memory_space<vmem>>, %arg3: memref<2x32x32xbf16, #tpu.memory_space<vmem>>, %arg4: memref<2x32x32xf32, #tpu.memory_space<vmem>>) attributes {dimension_semantics = [], scalar_prefetch = 0 : i64, scratch_operands = 0 : i64, tpu.core_type = #tpu.core_type<tc>} {
    %c0 = arith.constant 0 : index
    %c0_0 = arith.constant 0 : index
    %c0_1 = arith.constant 0 : index
    %0 = vector.load %arg0[%c0, %c0_0, %c0_1] : memref<2x32x32xf32, #tpu.memory_space<vmem>>, vector<2x32x32xf32>
    %c0_2 = arith.constant 0 : index
    %c0_3 = arith.constant 0 : index
    %c0_4 = arith.constant 0 : index
    %1 = vector.load %arg1[%c0_2, %c0_3, %c0_4] : memref<2x32x32xf32, #tpu.memory_space<vmem>>, vector<2x32x32xf32>
    %2 = arith.subf %0, %1 : vector<2x32x32xf32>
    %3 = math.exp %2 : vector<2x32x32xf32>
    %cst = arith.constant 1.000000e+00 : f32
    %4 = vector.broadcast %cst : f32 to vector<2x32x32xf32>
    %5 = arith.addf %4, %3 : vector<2x32x32xf32>
    %cst_5 = arith.constant 1.000000e+00 : f32
    %6 = vector.broadcast %cst_5 : f32 to vector<2x32x32xf32>
    %7 = arith.divf %6, %5 : vector<2x32x32xf32>
    %cst_6 = arith.constant 5.000000e-01 : f32
    %8 = vector.broadcast %cst_6 : f32 to vector<2x32x32xf32>
    %9 = arith.cmpf oge, %7, %8 : vector<2x32x32xf32>
    %cst_7 = arith.constant 1.000000e+00 : f32
    %cst_8 = arith.constant 0.000000e+00 : f32
    %10 = vector.broadcast %cst_7 : f32 to vector<2x32x32xf32>
    %11 = vector.broadcast %cst_8 : f32 to vector<2x32x32xf32>
    %12 = arith.select %9, %10, %11 : vector<2x32x32xi1>, vector<2x32x32xf32>
    %13 = arith.truncf %12 : vector<2x32x32xf32> to vector<2x32x32xbf16>
    %cst_9 = arith.constant dense<0xFF800000> : vector<2x32xf32>
    %14 = vector.multi_reduction <maximumf>, %7, %cst_9 [2] : vector<2x32x32xf32> to vector<2x32xf32>
    %15 = vector.shape_cast %14 : vector<2x32xf32> to vector<2x32x1xf32>
    %cst_10 = arith.constant dense<0xFF800000> : vector<2x1xf32>
    %16 = vector.multi_reduction <maximumf>, %15, %cst_10 [1] : vector<2x32x1xf32> to vector<2x1xf32>
    %17 = vector.shape_cast %16 : vector<2x1xf32> to vector<2x1x1xf32>
    %18 = vector.broadcast %17 : vector<2x1x1xf32> to vector<2x32x32xf32>
    %19 = arith.cmpf oge, %7, %18 : vector<2x32x32xf32>
    %cst_11 = arith.constant 1.000000e+00 : f32
    %cst_12 = arith.constant 0.000000e+00 : f32
    %20 = vector.broadcast %cst_11 : f32 to vector<2x32x32xf32>
    %21 = vector.broadcast %cst_12 : f32 to vector<2x32x32xf32>
    %22 = arith.select %19, %20, %21 : vector<2x32x32xi1>, vector<2x32x32xf32>
    %23 = arith.truncf %22 : vector<2x32x32xf32> to vector<2x32x32xbf16>
    %c0_13 = arith.constant 0 : index
    %c0_14 = arith.constant 0 : index
    %c0_15 = arith.constant 0 : index
    %24 = vector.load %arg2[%c0_13, %c0_14, %c0_15] : memref<2x32x32xbf16, #tpu.memory_space<vmem>>, vector<2x32x32xbf16>
    %c0_16 = arith.constant 0 : index
    %c0_17 = arith.constant 0 : index
    %c0_18 = arith.constant 0 : index
    %25 = vector.load %arg3[%c0_16, %c0_17, %c0_18] : memref<2x32x32xbf16, #tpu.memory_space<vmem>>, vector<2x32x32xbf16>
    "tpu.trace_start"() <{level = 10 : i32, message = "bik,bkw->biw"}> : () -> ()
    %cst_19 = arith.constant dense<0.000000e+00> : vector<2x32x32xf32>
    %26 = tpu.matmul %24, %23, %cst_19 {dimension_numbers = #tpu.dot_dimension_numbers<[2], [1], [1], [2], [0, 0, 0, 1, 1, 2], [0], [0]>} : vector<2x32x32xbf16>, vector<2x32x32xbf16>, vector<2x32x32xf32> -> vector<2x32x32xf32>
    "tpu.trace_stop"() : () -> ()
    %27 = arith.truncf %26 : vector<2x32x32xf32> to vector<2x32x32xbf16>
    "tpu.trace_start"() <{level = 10 : i32, message = "biw,bwj->bij"}> : () -> ()
    %cst_20 = arith.constant dense<0.000000e+00> : vector<2x32x32xf32>
    %28 = tpu.matmul %27, %25, %cst_20 {dimension_numbers = #tpu.dot_dimension_numbers<[2], [1], [1], [2], [0, 0, 0, 1, 1, 2], [0], [0]>} : vector<2x32x32xbf16>, vector<2x32x32xbf16>, vector<2x32x32xf32> -> vector<2x32x32xf32>
    %cst_21 = arith.constant 0.000000e+00 : f32
    "tpu.trace_stop"() : () -> ()
    %29 = vector.broadcast %cst_21 : f32 to vector<2x32x32xf32>
    %30 = arith.cmpf ogt, %28, %29 : vector<2x32x32xf32>
    %cst_22 = arith.constant 1.000000e+00 : f32
    %cst_23 = arith.constant 0.000000e+00 : f32
    %31 = vector.broadcast %cst_22 : f32 to vector<2x32x32xf32>
    %32 = vector.broadcast %cst_23 : f32 to vector<2x32x32xf32>
    %33 = arith.select %30, %31, %32 : vector<2x32x32xi1>, vector<2x32x32xf32>
    %34 = arith.truncf %33 : vector<2x32x32xf32> to vector<2x32x32xbf16>
    %35 = arith.mulf %13, %34 : vector<2x32x32xbf16>
    "tpu.trace_start"() <{level = 10 : i32, message = "bik,bkw->biw"}> : () -> ()
    %cst_24 = arith.constant dense<0.000000e+00> : vector<2x32x32xf32>
    %36 = tpu.matmul %24, %35, %cst_24 {dimension_numbers = #tpu.dot_dimension_numbers<[2], [1], [1], [2], [0, 0, 0, 1, 1, 2], [0], [0]>} : vector<2x32x32xbf16>, vector<2x32x32xbf16>, vector<2x32x32xf32> -> vector<2x32x32xf32>
    "tpu.trace_stop"() : () -> ()
    %37 = arith.truncf %36 : vector<2x32x32xf32> to vector<2x32x32xbf16>
    "tpu.trace_start"() <{level = 10 : i32, message = "biw,bwj->bij"}> : () -> ()
    %cst_25 = arith.constant dense<0.000000e+00> : vector<2x32x32xf32>
    %38 = tpu.matmul %37, %25, %cst_25 {dimension_numbers = #tpu.dot_dimension_numbers<[2], [1], [1], [2], [0, 0, 0, 1, 1, 2], [0], [0]>} : vector<2x32x32xbf16>, vector<2x32x32xbf16>, vector<2x32x32xf32> -> vector<2x32x32xf32>
    %cst_26 = arith.constant 0.000000e+00 : f32
    "tpu.trace_stop"() : () -> ()
    %39 = vector.broadcast %cst_26 : f32 to vector<2x32x32xf32>
    %40 = arith.cmpf ogt, %38, %39 : vector<2x32x32xf32>
    %cst_27 = arith.constant 1.000000e+00 : f32
    %cst_28 = arith.constant 0.000000e+00 : f32
    %41 = vector.broadcast %cst_27 : f32 to vector<2x32x32xf32>
    %42 = vector.broadcast %cst_28 : f32 to vector<2x32x32xf32>
    %43 = arith.select %40, %41, %42 : vector<2x32x32xi1>, vector<2x32x32xf32>
    %44 = arith.truncf %43 : vector<2x32x32xf32> to vector<2x32x32xbf16>
    %45 = arith.mulf %13, %44 : vector<2x32x32xbf16>
    "tpu.trace_start"() <{level = 10 : i32, message = "bik,bkw->biw"}> : () -> ()
    %cst_29 = arith.constant dense<0.000000e+00> : vector<2x32x32xf32>
    %46 = tpu.matmul %24, %45, %cst_29 {dimension_numbers = #tpu.dot_dimension_numbers<[2], [1], [1], [2], [0, 0, 0, 1, 1, 2], [0], [0]>} : vector<2x32x32xbf16>, vector<2x32x32xbf16>, vector<2x32x32xf32> -> vector<2x32x32xf32>
    "tpu.trace_stop"() : () -> ()
    %47 = arith.truncf %46 : vector<2x32x32xf32> to vector<2x32x32xbf16>
    "tpu.trace_start"() <{level = 10 : i32, message = "biw,bwj->bij"}> : () -> ()
    %cst_30 = arith.constant dense<0.000000e+00> : vector<2x32x32xf32>
    %48 = tpu.matmul %47, %25, %cst_30 {dimension_numbers = #tpu.dot_dimension_numbers<[2], [1], [1], [2], [0, 0, 0, 1, 1, 2], [0], [0]>} : vector<2x32x32xbf16>, vector<2x32x32xbf16>, vector<2x32x32xf32> -> vector<2x32x32xf32>
    %cst_31 = arith.constant 0.000000e+00 : f32
    "tpu.trace_stop"() : () -> ()
    %49 = vector.broadcast %cst_31 : f32 to vector<2x32x32xf32>
    %50 = arith.cmpf ogt, %48, %49 : vector<2x32x32xf32>
    %cst_32 = arith.constant 1.000000e+00 : f32
    %cst_33 = arith.constant 0.000000e+00 : f32
    %51 = vector.broadcast %cst_32 : f32 to vector<2x32x32xf32>
    %52 = vector.broadcast %cst_33 : f32 to vector<2x32x32xf32>
    %53 = arith.select %50, %51, %52 : vector<2x32x32xi1>, vector<2x32x32xf32>
    %54 = arith.truncf %53 : vector<2x32x32xf32> to vector<2x32x32xbf16>
    %55 = arith.mulf %13, %54 : vector<2x32x32xbf16>
    %56 = arith.extf %55 : vector<2x32x32xbf16> to vector<2x32x32xf32>
    %c0_34 = arith.constant 0 : index
    %c0_35 = arith.constant 0 : index
    %c0_36 = arith.constant 0 : index
    %57 = vector.load %arg4[%c0_34, %c0_35, %c0_36] : memref<2x32x32xf32, #tpu.memory_space<vmem>>, vector<2x32x32xf32>
    tpu.vector_store %arg4[%c0_34, %c0_35, %c0_36], %56 {strides = array<i32>} : memref<2x32x32xf32, #tpu.memory_space<vmem>>, vector<2x32x32xf32>,
    return
  }
}

module attributes {stable_mosaic.version = 11 : i64} {
  func.func @_mm_bias_act_kernel(%arg0: i32, %arg1: memref<16x27xbf16, #tpu.memory_space<vmem>>, %arg2: memref<27x2048xbf16, #tpu.memory_space<vmem>>, %arg3: memref<16x1xf32, #tpu.memory_space<vmem>>, %arg4: memref<16x2048xbf16, #tpu.memory_space<vmem>>) attributes {dimension_semantics = [#tpu.dimension_semantics<parallel>], iteration_bounds = array<i64: 1>, scalar_prefetch = 0 : i64, scratch_operands = 0 : i64, tpu.core_type = #tpu.core_type<tc>, window_params = [{pipeline_mode = #tpu.pipeline_mode<synchronous>, transform_indices = @transform_0, window_bounds = array<i64: 16, 27>}, {transform_indices = @transform_1, window_bounds = array<i64: 27, 2048>}, {pipeline_mode = #tpu.pipeline_mode<synchronous>, transform_indices = @transform_2, window_bounds = array<i64: 16, 1>}, {transform_indices = @transform_3, window_bounds = array<i64: 16, 2048>}]} {
    %c0 = arith.constant 0 : index
    %c0_0 = arith.constant 0 : index
    %0 = vector.load %arg1[%c0, %c0_0] : memref<16x27xbf16, #tpu.memory_space<vmem>>, vector<16x27xbf16>
    %c0_1 = arith.constant 0 : index
    %c0_2 = arith.constant 0 : index
    %1 = vector.load %arg2[%c0_1, %c0_2] : memref<27x2048xbf16, #tpu.memory_space<vmem>>, vector<27x2048xbf16>
    %cst = arith.constant dense<0.000000e+00> : vector<16x2048xf32>
    %2 = tpu.matmul %0, %1, %cst {dimension_numbers = #tpu.dot_dimension_numbers<[1], [0], [0], [1], [0, 0, 1, 1], [], []>} : vector<16x27xbf16>, vector<27x2048xbf16>, vector<16x2048xf32> -> vector<16x2048xf32>
    %c0_3 = arith.constant 0 : index
    %c0_4 = arith.constant 0 : index
    %3 = vector.load %arg3[%c0_3, %c0_4] : memref<16x1xf32, #tpu.memory_space<vmem>>, vector<16x1xf32>
    %4 = vector.broadcast %3 : vector<16x1xf32> to vector<16x2048xf32>
    %5 = arith.addf %2, %4 : vector<16x2048xf32>
    %cst_5 = arith.constant 0.000000e+00 : f32
    %6 = vector.broadcast %cst_5 : f32 to vector<16x2048xf32>
    %7 = arith.maximumf %5, %6 : vector<16x2048xf32>
    %8 = arith.truncf %7 : vector<16x2048xf32> to vector<16x2048xbf16>
    %c0_6 = arith.constant 0 : index
    %c0_7 = arith.constant 0 : index
    %9 = vector.load %arg4[%c0_6, %c0_7] : memref<16x2048xbf16, #tpu.memory_space<vmem>>, vector<16x2048xbf16>
    tpu.vector_store %arg4[%c0_6, %c0_7], %8 {strides = array<i32>} : memref<16x2048xbf16, #tpu.memory_space<vmem>>, vector<16x2048xbf16>,
    return
  }
  func.func @transform_0(%arg0: i32) -> (i32, i32) {
    %c0_i32 = arith.constant 0 : i32
    %c0_i32_0 = arith.constant 0 : i32
    %c0_i32_1 = arith.constant 0 : i32
    return %c0_i32, %c0_i32_0 : i32, i32
  }
  func.func @transform_1(%arg0: i32) -> (i32, i32) {
    %c0_i32 = arith.constant 0 : i32
    %c0_i32_0 = arith.constant 0 : i32
    return %c0_i32, %arg0 : i32, i32
  }
  func.func @transform_2(%arg0: i32) -> (i32, i32) {
    %c0_i32 = arith.constant 0 : i32
    %c0_i32_0 = arith.constant 0 : i32
    %c0_i32_1 = arith.constant 0 : i32
    return %c0_i32, %c0_i32_0 : i32, i32
  }
  func.func @transform_3(%arg0: i32) -> (i32, i32) {
    %c0_i32 = arith.constant 0 : i32
    %c0_i32_0 = arith.constant 0 : i32
    return %c0_i32, %arg0 : i32, i32
  }
}

module attributes {stable_mosaic.version = 11 : i64} {
  func.func @_mm_bias_act_kernel(%arg0: i32, %arg1: memref<32x144xbf16, #tpu.memory_space<vmem>>, %arg2: memref<144x512xbf16, #tpu.memory_space<vmem>>, %arg3: memref<32x1xf32, #tpu.memory_space<vmem>>, %arg4: memref<32x512xbf16, #tpu.memory_space<vmem>>) attributes {dimension_semantics = [#tpu.dimension_semantics<parallel>], iteration_bounds = array<i64: 1>, scalar_prefetch = 0 : i64, scratch_operands = 0 : i64, tpu.core_type = #tpu.core_type<tc>, window_params = [{pipeline_mode = #tpu.pipeline_mode<synchronous>, transform_indices = @transform_0, window_bounds = array<i64: 32, 144>}, {transform_indices = @transform_1, window_bounds = array<i64: 144, 512>}, {pipeline_mode = #tpu.pipeline_mode<synchronous>, transform_indices = @transform_2, window_bounds = array<i64: 32, 1>}, {transform_indices = @transform_3, window_bounds = array<i64: 32, 512>}]} {
    %c0 = arith.constant 0 : index
    %c0_0 = arith.constant 0 : index
    %0 = vector.load %arg1[%c0, %c0_0] : memref<32x144xbf16, #tpu.memory_space<vmem>>, vector<32x144xbf16>
    %c0_1 = arith.constant 0 : index
    %c0_2 = arith.constant 0 : index
    %1 = vector.load %arg2[%c0_1, %c0_2] : memref<144x512xbf16, #tpu.memory_space<vmem>>, vector<144x512xbf16>
    %cst = arith.constant dense<0.000000e+00> : vector<32x512xf32>
    %2 = tpu.matmul %0, %1, %cst {dimension_numbers = #tpu.dot_dimension_numbers<[1], [0], [0], [1], [0, 0, 1, 1], [], []>} : vector<32x144xbf16>, vector<144x512xbf16>, vector<32x512xf32> -> vector<32x512xf32>
    %c0_3 = arith.constant 0 : index
    %c0_4 = arith.constant 0 : index
    %3 = vector.load %arg3[%c0_3, %c0_4] : memref<32x1xf32, #tpu.memory_space<vmem>>, vector<32x1xf32>
    %4 = vector.broadcast %3 : vector<32x1xf32> to vector<32x512xf32>
    %5 = arith.addf %2, %4 : vector<32x512xf32>
    %cst_5 = arith.constant 0.000000e+00 : f32
    %6 = vector.broadcast %cst_5 : f32 to vector<32x512xf32>
    %7 = arith.maximumf %5, %6 : vector<32x512xf32>
    %8 = arith.truncf %7 : vector<32x512xf32> to vector<32x512xbf16>
    %c0_6 = arith.constant 0 : index
    %c0_7 = arith.constant 0 : index
    %9 = vector.load %arg4[%c0_6, %c0_7] : memref<32x512xbf16, #tpu.memory_space<vmem>>, vector<32x512xbf16>
    tpu.vector_store %arg4[%c0_6, %c0_7], %8 {strides = array<i32>} : memref<32x512xbf16, #tpu.memory_space<vmem>>, vector<32x512xbf16>,
    return
  }
  func.func @transform_0(%arg0: i32) -> (i32, i32) {
    %c0_i32 = arith.constant 0 : i32
    %c0_i32_0 = arith.constant 0 : i32
    %c0_i32_1 = arith.constant 0 : i32
    return %c0_i32, %c0_i32_0 : i32, i32
  }
  func.func @transform_1(%arg0: i32) -> (i32, i32) {
    %c0_i32 = arith.constant 0 : i32
    %c0_i32_0 = arith.constant 0 : i32
    return %c0_i32, %arg0 : i32, i32
  }
  func.func @transform_2(%arg0: i32) -> (i32, i32) {
    %c0_i32 = arith.constant 0 : i32
    %c0_i32_0 = arith.constant 0 : i32
    %c0_i32_1 = arith.constant 0 : i32
    return %c0_i32, %c0_i32_0 : i32, i32
  }
  func.func @transform_3(%arg0: i32) -> (i32, i32) {
    %c0_i32 = arith.constant 0 : i32
    %c0_i32_0 = arith.constant 0 : i32
    return %c0_i32, %arg0 : i32, i32
  }
}

module attributes {stable_mosaic.version = 11 : i64} {
  func.func @_mm_bias_act_kernel(%arg0: i32, %arg1: memref<21x288xbf16, #tpu.memory_space<vmem>>, %arg2: memref<288x128xbf16, #tpu.memory_space<vmem>>, %arg3: memref<21x1xf32, #tpu.memory_space<vmem>>, %arg4: memref<21x128xbf16, #tpu.memory_space<vmem>>) attributes {dimension_semantics = [#tpu.dimension_semantics<parallel>], iteration_bounds = array<i64: 1>, scalar_prefetch = 0 : i64, scratch_operands = 0 : i64, tpu.core_type = #tpu.core_type<tc>, window_params = [{pipeline_mode = #tpu.pipeline_mode<synchronous>, transform_indices = @transform_0, window_bounds = array<i64: 21, 288>}, {transform_indices = @transform_1, window_bounds = array<i64: 288, 128>}, {pipeline_mode = #tpu.pipeline_mode<synchronous>, transform_indices = @transform_2, window_bounds = array<i64: 21, 1>}, {transform_indices = @transform_3, window_bounds = array<i64: 21, 128>}]} {
    %c0 = arith.constant 0 : index
    %c0_0 = arith.constant 0 : index
    %0 = vector.load %arg1[%c0, %c0_0] : memref<21x288xbf16, #tpu.memory_space<vmem>>, vector<21x288xbf16>
    %c0_1 = arith.constant 0 : index
    %c0_2 = arith.constant 0 : index
    %1 = vector.load %arg2[%c0_1, %c0_2] : memref<288x128xbf16, #tpu.memory_space<vmem>>, vector<288x128xbf16>
    %cst = arith.constant dense<0.000000e+00> : vector<21x128xf32>
    %2 = tpu.matmul %0, %1, %cst {dimension_numbers = #tpu.dot_dimension_numbers<[1], [0], [0], [1], [0, 0, 1, 1], [], []>} : vector<21x288xbf16>, vector<288x128xbf16>, vector<21x128xf32> -> vector<21x128xf32>
    %c0_3 = arith.constant 0 : index
    %c0_4 = arith.constant 0 : index
    %3 = vector.load %arg3[%c0_3, %c0_4] : memref<21x1xf32, #tpu.memory_space<vmem>>, vector<21x1xf32>
    %4 = vector.broadcast %3 : vector<21x1xf32> to vector<21x128xf32>
    %5 = arith.addf %2, %4 : vector<21x128xf32>
    %6 = arith.truncf %5 : vector<21x128xf32> to vector<21x128xbf16>
    %c0_5 = arith.constant 0 : index
    %c0_6 = arith.constant 0 : index
    %7 = vector.load %arg4[%c0_5, %c0_6] : memref<21x128xbf16, #tpu.memory_space<vmem>>, vector<21x128xbf16>
    tpu.vector_store %arg4[%c0_5, %c0_6], %6 {strides = array<i32>} : memref<21x128xbf16, #tpu.memory_space<vmem>>, vector<21x128xbf16>,
    return
  }
  func.func @transform_0(%arg0: i32) -> (i32, i32) {
    %c0_i32 = arith.constant 0 : i32
    %c0_i32_0 = arith.constant 0 : i32
    %c0_i32_1 = arith.constant 0 : i32
    return %c0_i32, %c0_i32_0 : i32, i32
  }
  func.func @transform_1(%arg0: i32) -> (i32, i32) {
    %c0_i32 = arith.constant 0 : i32
    %c0_i32_0 = arith.constant 0 : i32
    return %c0_i32, %arg0 : i32, i32
  }
  func.func @transform_2(%arg0: i32) -> (i32, i32) {
    %c0_i32 = arith.constant 0 : i32
    %c0_i32_0 = arith.constant 0 : i32
    %c0_i32_1 = arith.constant 0 : i32
    return %c0_i32, %c0_i32_0 : i32, i32
  }
  func.func @transform_3(%arg0: i32) -> (i32, i32) {
    %c0_i32 = arith.constant 0 : i32
    %c0_i32_0 = arith.constant 0 : i32
    return %c0_i32, %arg0 : i32, i32
  }
}

module attributes {stable_mosaic.version = 11 : i64} {
  func.func @_mm_bias_act_kernel(%arg0: i32, %arg1: memref<64x189xbf16, #tpu.memory_space<vmem>>, %arg2: memref<189x128xbf16, #tpu.memory_space<vmem>>, %arg3: memref<64x1xf32, #tpu.memory_space<vmem>>, %arg4: memref<64x128xbf16, #tpu.memory_space<vmem>>) attributes {dimension_semantics = [#tpu.dimension_semantics<parallel>], iteration_bounds = array<i64: 1>, scalar_prefetch = 0 : i64, scratch_operands = 0 : i64, tpu.core_type = #tpu.core_type<tc>, window_params = [{pipeline_mode = #tpu.pipeline_mode<synchronous>, transform_indices = @transform_0, window_bounds = array<i64: 64, 189>}, {transform_indices = @transform_1, window_bounds = array<i64: 189, 128>}, {pipeline_mode = #tpu.pipeline_mode<synchronous>, transform_indices = @transform_2, window_bounds = array<i64: 64, 1>}, {transform_indices = @transform_3, window_bounds = array<i64: 64, 128>}]} {
    %c0 = arith.constant 0 : index
    %c0_0 = arith.constant 0 : index
    %0 = vector.load %arg1[%c0, %c0_0] : memref<64x189xbf16, #tpu.memory_space<vmem>>, vector<64x189xbf16>
    %c0_1 = arith.constant 0 : index
    %c0_2 = arith.constant 0 : index
    %1 = vector.load %arg2[%c0_1, %c0_2] : memref<189x128xbf16, #tpu.memory_space<vmem>>, vector<189x128xbf16>
    %cst = arith.constant dense<0.000000e+00> : vector<64x128xf32>
    %2 = tpu.matmul %0, %1, %cst {dimension_numbers = #tpu.dot_dimension_numbers<[1], [0], [0], [1], [0, 0, 1, 1], [], []>} : vector<64x189xbf16>, vector<189x128xbf16>, vector<64x128xf32> -> vector<64x128xf32>
    %c0_3 = arith.constant 0 : index
    %c0_4 = arith.constant 0 : index
    %3 = vector.load %arg3[%c0_3, %c0_4] : memref<64x1xf32, #tpu.memory_space<vmem>>, vector<64x1xf32>
    %4 = vector.broadcast %3 : vector<64x1xf32> to vector<64x128xf32>
    %5 = arith.addf %2, %4 : vector<64x128xf32>
    %cst_5 = arith.constant 0.000000e+00 : f32
    %6 = vector.broadcast %cst_5 : f32 to vector<64x128xf32>
    %7 = arith.maximumf %5, %6 : vector<64x128xf32>
    %8 = arith.truncf %7 : vector<64x128xf32> to vector<64x128xbf16>
    %c0_6 = arith.constant 0 : index
    %c0_7 = arith.constant 0 : index
    %9 = vector.load %arg4[%c0_6, %c0_7] : memref<64x128xbf16, #tpu.memory_space<vmem>>, vector<64x128xbf16>
    tpu.vector_store %arg4[%c0_6, %c0_7], %8 {strides = array<i32>} : memref<64x128xbf16, #tpu.memory_space<vmem>>, vector<64x128xbf16>,
    return
  }
  func.func @transform_0(%arg0: i32) -> (i32, i32) {
    %c0_i32 = arith.constant 0 : i32
    %c0_i32_0 = arith.constant 0 : i32
    %c0_i32_1 = arith.constant 0 : i32
    return %c0_i32, %c0_i32_0 : i32, i32
  }
  func.func @transform_1(%arg0: i32) -> (i32, i32) {
    %c0_i32 = arith.constant 0 : i32
    %c0_i32_0 = arith.constant 0 : i32
    return %c0_i32, %arg0 : i32, i32
  }
  func.func @transform_2(%arg0: i32) -> (i32, i32) {
    %c0_i32 = arith.constant 0 : i32
    %c0_i32_0 = arith.constant 0 : i32
    %c0_i32_1 = arith.constant 0 : i32
    return %c0_i32, %c0_i32_0 : i32, i32
  }
  func.func @transform_3(%arg0: i32) -> (i32, i32) {
    %c0_i32 = arith.constant 0 : i32
    %c0_i32_0 = arith.constant 0 : i32
    return %c0_i32, %arg0 : i32, i32
  }
}

module attributes {stable_mosaic.version = 11 : i64} {
  func.func @_mm_bias_act_kernel(%arg0: memref<8x1028xbf16, #tpu.memory_space<vmem>>, %arg1: memref<1028x128xbf16, #tpu.memory_space<vmem>>, %arg2: memref<1x128xf32, #tpu.memory_space<vmem>>, %arg3: memref<8x128xf32, #tpu.memory_space<vmem>>) attributes {dimension_semantics = [], scalar_prefetch = 0 : i64, scratch_operands = 0 : i64, tpu.core_type = #tpu.core_type<tc>} {
    %c0 = arith.constant 0 : index
    %c0_0 = arith.constant 0 : index
    %0 = vector.load %arg0[%c0, %c0_0] : memref<8x1028xbf16, #tpu.memory_space<vmem>>, vector<8x1028xbf16>
    %c0_1 = arith.constant 0 : index
    %c0_2 = arith.constant 0 : index
    %1 = vector.load %arg1[%c0_1, %c0_2] : memref<1028x128xbf16, #tpu.memory_space<vmem>>, vector<1028x128xbf16>
    %cst = arith.constant dense<0.000000e+00> : vector<8x128xf32>
    %2 = tpu.matmul %0, %1, %cst {dimension_numbers = #tpu.dot_dimension_numbers<[1], [0], [0], [1], [0, 0, 1, 1], [], []>} : vector<8x1028xbf16>, vector<1028x128xbf16>, vector<8x128xf32> -> vector<8x128xf32>
    %c0_3 = arith.constant 0 : index
    %c0_4 = arith.constant 0 : index
    %3 = vector.load %arg2[%c0_3, %c0_4] : memref<1x128xf32, #tpu.memory_space<vmem>>, vector<1x128xf32>
    %4 = vector.broadcast %3 : vector<1x128xf32> to vector<8x128xf32>
    %5 = arith.addf %2, %4 : vector<8x128xf32>
    %cst_5 = arith.constant 0.000000e+00 : f32
    %6 = vector.broadcast %cst_5 : f32 to vector<8x128xf32>
    %7 = arith.maximumf %5, %6 : vector<8x128xf32>
    %c0_6 = arith.constant 0 : index
    %c0_7 = arith.constant 0 : index
    %8 = vector.load %arg3[%c0_6, %c0_7] : memref<8x128xf32, #tpu.memory_space<vmem>>, vector<8x128xf32>
    tpu.vector_store %arg3[%c0_6, %c0_7], %7 {strides = array<i32>} : memref<8x128xf32, #tpu.memory_space<vmem>>, vector<8x128xf32>,
    return
  }
}

module attributes {stable_mosaic.version = 11 : i64} {
  func.func @_mm_bias_act_kernel(%arg0: memref<8x128xbf16, #tpu.memory_space<vmem>>, %arg1: memref<128x66xbf16, #tpu.memory_space<vmem>>, %arg2: memref<1x66xf32, #tpu.memory_space<vmem>>, %arg3: memref<8x66xf32, #tpu.memory_space<vmem>>) attributes {dimension_semantics = [], scalar_prefetch = 0 : i64, scratch_operands = 0 : i64, tpu.core_type = #tpu.core_type<tc>} {
    %c0 = arith.constant 0 : index
    %c0_0 = arith.constant 0 : index
    %0 = vector.load %arg0[%c0, %c0_0] : memref<8x128xbf16, #tpu.memory_space<vmem>>, vector<8x128xbf16>
    %c0_1 = arith.constant 0 : index
    %c0_2 = arith.constant 0 : index
    %1 = vector.load %arg1[%c0_1, %c0_2] : memref<128x66xbf16, #tpu.memory_space<vmem>>, vector<128x66xbf16>
    %cst = arith.constant dense<0.000000e+00> : vector<8x66xf32>
    %2 = tpu.matmul %0, %1, %cst {dimension_numbers = #tpu.dot_dimension_numbers<[1], [0], [0], [1], [0, 0, 1, 1], [], []>} : vector<8x128xbf16>, vector<128x66xbf16>, vector<8x66xf32> -> vector<8x66xf32>
    %c0_3 = arith.constant 0 : index
    %c0_4 = arith.constant 0 : index
    %3 = vector.load %arg2[%c0_3, %c0_4] : memref<1x66xf32, #tpu.memory_space<vmem>>, vector<1x66xf32>
    %4 = vector.broadcast %3 : vector<1x66xf32> to vector<8x66xf32>
    %5 = arith.addf %2, %4 : vector<8x66xf32>
    %c0_5 = arith.constant 0 : index
    %c0_6 = arith.constant 0 : index
    %6 = vector.load %arg3[%c0_5, %c0_6] : memref<8x66xf32, #tpu.memory_space<vmem>>, vector<8x66xf32>
    tpu.vector_store %arg3[%c0_5, %c0_6], %5 {strides = array<i32>} : memref<8x66xf32, #tpu.memory_space<vmem>>, vector<8x66xf32>,
    return
  }
}

module attributes {stable_mosaic.version = 11 : i64} {
  func.func @_resize_kernel(%arg0: memref<42x8x8xbf16, #tpu.memory_space<vmem>>, %arg1: memref<42x32x8xbf16, #tpu.memory_space<vmem>>, %arg2: memref<42x8x32xbf16, #tpu.memory_space<vmem>>, %arg3: memref<42x32x32xf32, #tpu.memory_space<vmem>>) attributes {dimension_semantics = [], scalar_prefetch = 0 : i64, scratch_operands = 0 : i64, tpu.core_type = #tpu.core_type<tc>} {
    %c0 = arith.constant 0 : index
    %c0_0 = arith.constant 0 : index
    %c0_1 = arith.constant 0 : index
    %0 = vector.load %arg0[%c0, %c0_0, %c0_1] : memref<42x8x8xbf16, #tpu.memory_space<vmem>>, vector<42x8x8xbf16>
    %c0_2 = arith.constant 0 : index
    %c0_3 = arith.constant 0 : index
    %c0_4 = arith.constant 0 : index
    %1 = vector.load %arg2[%c0_2, %c0_3, %c0_4] : memref<42x8x32xbf16, #tpu.memory_space<vmem>>, vector<42x8x32xbf16>
    "tpu.trace_start"() <{level = 10 : i32, message = "nhw,nwj->nhj"}> : () -> ()
    %cst = arith.constant dense<0.000000e+00> : vector<42x8x32xf32>
    %2 = tpu.matmul %0, %1, %cst {dimension_numbers = #tpu.dot_dimension_numbers<[2], [1], [1], [2], [0, 0, 0, 1, 1, 2], [0], [0]>} : vector<42x8x8xbf16>, vector<42x8x32xbf16>, vector<42x8x32xf32> -> vector<42x8x32xf32>
    "tpu.trace_stop"() : () -> ()
    %c0_5 = arith.constant 0 : index
    %c0_6 = arith.constant 0 : index
    %c0_7 = arith.constant 0 : index
    %3 = vector.load %arg1[%c0_5, %c0_6, %c0_7] : memref<42x32x8xbf16, #tpu.memory_space<vmem>>, vector<42x32x8xbf16>
    %4 = arith.truncf %2 : vector<42x8x32xf32> to vector<42x8x32xbf16>
    "tpu.trace_start"() <{level = 10 : i32, message = "nih,nhj->nij"}> : () -> ()
    %cst_8 = arith.constant dense<0.000000e+00> : vector<42x32x32xf32>
    %5 = tpu.matmul %3, %4, %cst_8 {dimension_numbers = #tpu.dot_dimension_numbers<[2], [1], [1], [2], [0, 0, 0, 1, 1, 2], [0], [0]>} : vector<42x32x8xbf16>, vector<42x8x32xbf16>, vector<42x32x32xf32> -> vector<42x32x32xf32>
    "tpu.trace_stop"() : () -> ()
    %c0_9 = arith.constant 0 : index
    %c0_10 = arith.constant 0 : index
    %c0_11 = arith.constant 0 : index
    %6 = vector.load %arg3[%c0_9, %c0_10, %c0_11] : memref<42x32x32xf32, #tpu.memory_space<vmem>>, vector<42x32x32xf32>
    tpu.vector_store %arg3[%c0_9, %c0_10, %c0_11], %5 {strides = array<i32>} : memref<42x32x32xf32, #tpu.memory_space<vmem>>, vector<42x32x32xf32>,
    return
  }
}

</mosaic_0001>

<bundles_post_ra>
// kernel: colorhandpose3d_forward.12
= control target key start
LH: loop header
LB: loop body
LE: loop exit
PB: predicated region body
PF: predicated region fallthrough
CT: control target
= control target key end

     0   :  { %vm202_vm0 = vcmask 1044480   ;;  %vm203_vm1 = vcmask 1045504   ;;  %v733_v3 = vmov 65535   ;;  %v734_v5 = vmov 0   ;;  %s944_s1 = inlined_call_operand.vmem [shape: bf16[27,2048], index: 1, kind: input, shape index: {}]   ;;  %s945_s0 = inlined_call_operand.vmem [shape: bf16[8,27], index: 0, kind: input, shape index: {}]   ;;  %s946_s2 = inlined_call_operand.vmem [shape: f32[8,1], index: 2, kind: input, shape index: {}]   ;;  %s947_s3 = inlined_call_operand.vmem [shape: bf16[8,2048], index: 3, kind: output, shape index: {}]  }
   0x1   :  { %v16_v0 = vld [vmem:[%s944_s1] sm:$0xff]  ;;  %v17_v2 = vld [vmem:[%s944_s1 + $0x8] sm:$0xff]  ;;  %v204_v4 = vsel %vm202_vm0, 4294967295, %v733_v3  ;;  %286 = vmatprep.mubr.bf16.mxu0 %v734_v5  ;;  %327 = vmatprep.mubr.bf16.mxu1 %v734_v5  ;;  %v18_v20 = vld [vmem:[%s944_s1 + $0x10] sm:$0xff]  ;;  %vm198_vm2 = vcmask 220160  }
   0x2   :  { %v24_v1 = vld [vmem:[%s944_s1 + $0x40] sm:$0xff]  ;;  %v25_v7 = vld [vmem:[%s944_s1 + $0x48] sm:$0xff]  ;;  %v775_v11 = vsel %vm203_vm1, %v204_v4, 0  ;;  %732 = vset.pattern.permute.xlu0 %v734_v5  ;;  %v26_v21 = vld [vmem:[%s944_s1 + $0x50] sm:$0xff] }
   0x3   :  { %v675_v6 = vcombine.high %v16_v0, %v24_v1  ;;  %v674_v8 = vcombine.low %v16_v0, %v24_v1  ;;  %v32_v9 = vld [vmem:[%s944_s1 + $0x80] sm:$0xff]  ;;  %v677_v12 = vcombine.high %v17_v2, %v25_v7  ;;  %v676_v13 = vcombine.low %v17_v2, %v25_v7  ;;  %v33_v15 = vld [vmem:[%s944_s1 + $0x88] sm:$0xff]  ;;  %v19_v22 = vld [vmem:[%s944_s1 + $0x18] sm:$0xff] }
   0x4   :  { %v40_v10 = vld [vmem:[%s944_s1 + $0xc0] sm:$0x33]  ;;  %v41_v16 = vld [vmem:[%s944_s1 + $0xc8] sm:$0x33]  ;;  %v27_v25 = vld [vmem:[%s944_s1 + $0x58] sm:$0xff]  ;;  %v679_v30 = vcombine.high %v18_v20, %v26_v21  ;;  %v678_v37 = vcombine.low %v18_v20, %v26_v21 }
   0x5   :  { %v691_v14 = vcombine.high %v32_v9, %v40_v10  ;;  %v690_v17 = vcombine.low %v32_v9, %v40_v10  ;;  %254 = vmatprep.subr.bf16.mxu0 %v675_v6  ;;  %v693_v18 = vcombine.high %v33_v15, %v41_v16  ;;  %v692_v19 = vcombine.low %v33_v15, %v41_v16  ;;  %v34_v26 = vld [vmem:[%s944_s1 + $0x90] sm:$0xff]  ;;  %v35_v31 = vld [vmem:[%s944_s1 + $0x98] sm:$0xff]  ;;  %v815_v36 = vld [vmem:[%s945_s0] sm:$0xf] }
   0x6   :  { %295 = vmatprep.subr.bf16.mxu1 %v677_v12  ;;  %255 = vmatpush1.bf16.msra.mxu0 %v674_v8  ;;  %v42_v27 = vld [vmem:[%s944_s1 + $0xd0] sm:$0x33]  ;;  %v43_v32 = vld [vmem:[%s944_s1 + $0xd8] sm:$0x33]  ;;  %v681_v33 = vcombine.high %v19_v22, %v27_v25  ;;  %v680_v39 = vcombine.low %v19_v22, %v27_v25  ;;  %v20_v42 = vld [vmem:[%s944_s1 + $0x20] sm:$0xff] }
   0x7   :  { %v210_v23 = vand.u32 %v691_v14, %v775_v11  ;;  %v207_v24 = vand.u32 %v690_v17, %v775_v11  ;;  %296 = vmatpush1.bf16.msra.mxu1 %v676_v13  ;;  %v216_v28 = vand.u32 %v693_v18, %v775_v11  ;;  %v213_v29 = vand.u32 %v692_v19, %v775_v11  ;;  %v28_v43 = vld [vmem:[%s944_s1 + $0x60] sm:$0xff]  ;;  %v21_v45 = vld [vmem:[%s944_s1 + $0x28] sm:$0xff]  ;;  %v22_v63 = vld [vmem:[%s944_s1 + $0x30] sm:$0xff] }
   0x8   :  { %v695_v34 = vcombine.high %v34_v26, %v42_v27  ;;  %v697_v35 = vcombine.high %v35_v31, %v43_v32  ;;  %v694_v38 = vcombine.low %v34_v26, %v42_v27  ;;  %v696_v41 = vcombine.low %v35_v31, %v43_v32  ;;  %v36_v46 = vld [vmem:[%s944_s1 + $0xa0] sm:$0xff]  ;;  %v29_v48 = vld [vmem:[%s944_s1 + $0x68] sm:$0xff]  ;;  %v30_v0 = vld [vmem:[%s944_s1 + $0x70] sm:$0xff] }
   0x9   :  { %256 = vmatprep.subr.bf16.mxu0 %v210_v23  ;;  %297 = vmatprep.subr.bf16.mxu1 %v216_v28  ;;  %v44_v47 = vld [vmem:[%s944_s1 + $0xe0] sm:$0x33]  ;;  %v37_v49 = vld [vmem:[%s944_s1 + $0xa8] sm:$0xff]  ;;  %v683_v54 = vcombine.high %v20_v42, %v28_v43  ;;  %v685_v56 = vcombine.high %v21_v45, %v29_v48  ;;  %v682_v58 = vcombine.low %v20_v42, %v28_v43  ;;  %v23_v2 = vld [vmem:[%s944_s1 + $0x38] sm:$0xff] }
   0xa   :  { %257 = vmatpush1.bf16.msra.mxu0 %v207_v24  ;;  %v222_v40 = vand.u32 %v695_v34, %v775_v11  ;;  %v228_v44 = vand.u32 %v697_v35, %v775_v11  ;;  %v45_v50 = vld [vmem:[%s944_s1 + $0xe8] sm:$0x33]  ;;  %v219_v51 = vand.u32 %v694_v38, %v775_v11  ;;  %v48_v52 = vld [vmem:[%s946_s2] sm:$0xff]  ;;  %v225_v53 = vand.u32 %v696_v41, %v775_v11  ;;  %v38_v3 = vld [vmem:[%s944_s1 + $0xb0] sm:$0xff] }
   0xb   :  { %298 = vmatpush1.bf16.msra.mxu1 %v213_v29  ;;  %336 = vmatprep.subr.bf16.mxu0 %v679_v30  ;;  %v699_v55 = vcombine.high %v36_v46, %v44_v47  ;;  %v701_v57 = vcombine.high %v37_v49, %v45_v50  ;;  %v698_v59 = vcombine.low %v36_v46, %v44_v47  ;;  %v46_v4 = vld [vmem:[%s944_s1 + $0xf0] sm:$0x33]  ;;  %v31_v6 = vld [vmem:[%s944_s1 + $0x78] sm:$0xff] }
   0xc   :  { %377 = vmatprep.subr.bf16.mxu1 %v681_v33  ;;  %51 = vperm.xlu0 %732, %v48_v52   ;;  %v684_v60 = vcombine.low %v21_v45, %v29_v48  ;;  %v700_v62 = vcombine.low %v37_v49, %v45_v50  ;;  %v39_v7 = vld [vmem:[%s944_s1 + $0xb8] sm:$0xff]  ;;  %v687_v12 = vcombine.high %v22_v63, %v30_v0 }
   0xd   :  { %706 = vmatmul.mubr.msk.bf16.vlgmr.msra.gmra.mrb[0].mxu0 %vm198_vm2, %v815_v36  ;;  %v234_v61 = vand.u32 %v699_v55, %v775_v11  ;;  %v240_v1 = vand.u32 %v701_v57, %v775_v11  ;;  %v47_v8 = vld [vmem:[%s944_s1 + $0xf8] sm:$0x33]  ;;  %v231_v9 = vand.u32 %v698_v59, %v775_v11  ;;  %v703_v13 = vcombine.high %v38_v3, %v46_v4 }
   0xe   :  { %707 = vmatmul.mubr.msk.bf16.vlgmr.msra.gmra.mrb[0].mxu1 %vm198_vm2, %v815_v36  ;;  %337 = vmatpush1.bf16.msra.mxu0 %v678_v37  ;;  %v237_v10 = vand.u32 %v700_v62, %v775_v11  ;;  %v689_v14 = vcombine.high %v23_v2, %v31_v6  ;;  %v705_v15 = vcombine.high %v39_v7, %v47_v8 }
   0xf   :  { %378 = vmatpush1.bf16.msra.mxu1 %v680_v39  ;;  %338 = vmatprep.subr.bf16.mxu0 %v222_v40  ;;  %v686_v16 = vcombine.low %v22_v63, %v30_v0  ;;  %v702_v17 = vcombine.low %v38_v3, %v46_v4  ;;  %v688_v18 = vcombine.low %v23_v2, %v31_v6 }
  0x10   :  { %379 = vmatprep.subr.bf16.mxu1 %v228_v44  ;;  %368 = vmatprep.mubr.bf16.mxu0 %v734_v5  ;;  %v246_v19 = vand.u32 %v703_v13, %v775_v11  ;;  %v704_v20 = vcombine.low %v39_v7, %v47_v8  ;;  %v252_v21 = vand.u32 %v705_v15, %v775_v11 }
  0x11   :  { %409 = vmatprep.mubr.bf16.mxu1 %v734_v5  ;;  %v243_v22 = vand.u32 %v702_v17, %v775_v11 }
  0x12   :  { %339 = vmatpush1.bf16.msra.mxu0 %v219_v51  ;;  %v249_v23 = vand.u32 %v704_v20, %v775_v11 }
  0x13   :  { %380 = vmatpush1.bf16.msra.mxu1 %v225_v53  ;;  %418 = vmatprep.subr.bf16.mxu0 %v683_v54 }
  0x14   :  { %459 = vmatprep.subr.bf16.mxu1 %v685_v56 }
  0x15   :  { %708 = vmatmul.mubr.msk.bf16.vlgmr.msra.gmra.mrb[4].mxu0 %vm198_vm2, %v815_v36 }
  0x16   :  { %709 = vmatmul.mubr.msk.bf16.vlgmr.msra.gmra.mrb[4].mxu1 %vm198_vm2, %v815_v36  ;;  %419 = vmatpush1.bf16.msra.mxu0 %v682_v58 }
  0x17   :  { %460 = vmatpush1.bf16.msra.mxu1 %v684_v60  ;;  %420 = vmatprep.subr.bf16.mxu0 %v234_v61 }
  0x18   :  { %461 = vmatprep.subr.bf16.mxu1 %v240_v1  ;;  %450 = vmatprep.mubr.bf16.mxu0 %v734_v5 }
  0x19   :  { %491 = vmatprep.mubr.bf16.mxu1 %v734_v5 }
  0x1a   :  { %421 = vmatpush1.bf16.msra.mxu0 %v231_v9 }
  0x1b   :  { %462 = vmatpush1.bf16.msra.mxu1 %v237_v10  ;;  %500 = vmatprep.subr.bf16.mxu0 %v687_v12 }
  0x1c   :  { %541 = vmatprep.subr.bf16.mxu1 %v689_v14 }
  0x1d   :  { %710 = vmatmul.mubr.msk.bf16.vlgmr.msra.gmra.mrb[8].mxu0 %vm198_vm2, %v815_v36 }
  0x1e   :  { %711 = vmatmul.mubr.msk.bf16.vlgmr.msra.gmra.mrb[8].mxu1 %vm198_vm2, %v815_v36  ;;  %501 = vmatpush1.bf16.msra.mxu0 %v686_v16 }
  0x1f   :  { %542 = vmatpush1.bf16.msra.mxu1 %v688_v18  ;;  %502 = vmatprep.subr.bf16.mxu0 %v246_v19 }
  0x20   :  { %543 = vmatprep.subr.bf16.mxu1 %v252_v21  ;;  %532 = vmatprep.mubr.bf16.mxu0 %v734_v5 }
  0x21   :  { %573 = vmatprep.mubr.bf16.mxu1 %v734_v5 }
  0x22   :  { %503 = vmatpush1.bf16.msra.mxu0 %v243_v22 }
  0x23   :  { %544 = vmatpush1.bf16.msra.mxu1 %v249_v23 }
  0x25   :  { %712 = vmatmul.mubr.msk.bf16.vlgmr.msra.gmra.mrb[12].mxu0 %vm198_vm2, %v815_v36 }
  0x26   :  { %713 = vmatmul.mubr.msk.bf16.vlgmr.msra.gmra.mrb[12].mxu1 %vm198_vm2, %v815_v36 }
  0x8b   :  { %v902_v24 = vpop.permute.xlu0 %51 }
  0xe0   :  { %v288_v25 = vpop.f32.mrb[0].mxu0 }
  0xe1   :  { %v329_v26 = vpop.f32.mrb[0].mxu1  ;;  %v289_v27 = vadd.f32 %v288_v25, %v902_v24  ;;  %v290_v11 = vpop.f32.mrb[1].mxu0 }
  0xe2   :  { %v291_v28 = vadd.f32 %v290_v11, %v902_v24  ;;  %v330_v29 = vadd.f32 %v329_v26, %v902_v24  ;;  %v331_v5 = vpop.f32.mrb[1].mxu1  ;;  %v292_v30 = vpop.f32.mrb[2].mxu0 }
  0xe3   :  { %v582_v31 = vmax.f32 %v289_v27, 0.0  ;;  %v332_v32 = vadd.f32 %v331_v5, %v902_v24  ;;  %v333_v33 = vpop.f32.mrb[2].mxu1  ;;  %v293_v34 = vpop.f32.mrb[3].mxu0 }
  0xe4   :  { %v583_v35 = vmax.f32 %v291_v28, 0.0  ;;  %v584_v36 = vmax.f32 %v330_v29, 0.0  ;;  %v334_v37 = vpop.f32.mrb[3].mxu1 }
  0xe5   :  { %v585_v38 = vmax.f32 %v332_v32, 0.0 }
  0xe6   :  { %v722_v39 = vpack.c.bf16 %v583_v35, %v582_v31 }
  0xe7   :  { %v723_v40 = vpack.c.bf16 %v585_v38, %v584_v36 }
  0xe8   :  { %662 = vst [vmem:[%s947_s3] sm:$0xff] %v722_v39  ;;  %v370_v41 = vpop.f32.mrb[4].mxu0 }
  0xe9   :  { %663 = vst [vmem:[%s947_s3 + $0x8] sm:$0xff] %v723_v40  ;;  %v371_v42 = vadd.f32 %v370_v41, %v902_v24  ;;  %v411_v43 = vpop.f32.mrb[4].mxu1  ;;  %v372_v44 = vpop.f32.mrb[5].mxu0 }
  0xea   :  { %v412_v45 = vadd.f32 %v411_v43, %v902_v24  ;;  %v373_v46 = vadd.f32 %v372_v44, %v902_v24  ;;  %v413_v47 = vpop.f32.mrb[5].mxu1  ;;  %v374_v48 = vpop.f32.mrb[6].mxu0 }
  0xeb   :  { %v586_v49 = vmax.f32 %v371_v42, 0.0  ;;  %v414_v50 = vadd.f32 %v413_v47, %v902_v24  ;;  %v415_v51 = vpop.f32.mrb[6].mxu1  ;;  %v375_v52 = vpop.f32.mrb[7].mxu0 }
  0xec   :  { %v588_v53 = vmax.f32 %v412_v45, 0.0  ;;  %v587_v54 = vmax.f32 %v373_v46, 0.0  ;;  %v416_v55 = vpop.f32.mrb[7].mxu1 }
  0xed   :  { %v589_v56 = vmax.f32 %v414_v50, 0.0 }
  0xee   :  { %v724_v57 = vpack.c.bf16 %v587_v54, %v586_v49 }
  0xef   :  { %v725_v58 = vpack.c.bf16 %v589_v56, %v588_v53 }
  0xf0   :  { %664 = vst [vmem:[%s947_s3 + $0x10] sm:$0xff] %v724_v57  ;;  %v452_v59 = vpop.f32.mrb[8].mxu0 }
  0xf1   :  { %665 = vst [vmem:[%s947_s3 + $0x18] sm:$0xff] %v725_v58  ;;  %v453_v60 = vadd.f32 %v452_v59, %v902_v24  ;;  %v493_v61 = vpop.f32.mrb[8].mxu1  ;;  %v454_v62 = vpop.f32.mrb[9].mxu0 }
  0xf2   :  { %v494_v63 = vadd.f32 %v493_v61, %v902_v24  ;;  %v455_v0 = vadd.f32 %v454_v62, %v902_v24  ;;  %v495_v1 = vpop.f32.mrb[9].mxu1  ;;  %v456_v2 = vpop.f32.mrb[10].mxu0 }
  0xf3   :  { %v590_v3 = vmax.f32 %v453_v60, 0.0  ;;  %v496_v4 = vadd.f32 %v495_v1, %v902_v24  ;;  %v497_v6 = vpop.f32.mrb[10].mxu1  ;;  %v457_v7 = vpop.f32.mrb[11].mxu0 }
  0xf4   :  { %v592_v8 = vmax.f32 %v494_v63, 0.0  ;;  %v591_v9 = vmax.f32 %v455_v0, 0.0  ;;  %v498_v10 = vpop.f32.mrb[11].mxu1 }
  0xf5   :  { %v593_v12 = vmax.f32 %v496_v4, 0.0 }
  0xf6   :  { %v726_v13 = vpack.c.bf16 %v591_v9, %v590_v3 }
  0xf7   :  { %v727_v14 = vpack.c.bf16 %v593_v12, %v592_v8 }
  0xf8   :  { %666 = vst [vmem:[%s947_s3 + $0x20] sm:$0xff] %v726_v13  ;;  %v534_v15 = vpop.f32.mrb[12].mxu0 }
  0xf9   :  { %667 = vst [vmem:[%s947_s3 + $0x28] sm:$0xff] %v727_v14  ;;  %v535_v16 = vadd.f32 %v534_v15, %v902_v24  ;;  %v575_v17 = vpop.f32.mrb[12].mxu1  ;;  %v536_v18 = vpop.f32.mrb[13].mxu0 }
  0xfa   :  { %v576_v19 = vadd.f32 %v575_v17, %v902_v24  ;;  %v537_v20 = vadd.f32 %v536_v18, %v902_v24  ;;  %v577_v21 = vpop.f32.mrb[13].mxu1  ;;  %v538_v22 = vpop.f32.mrb[14].mxu0 }
  0xfb   :  { %v594_v23 = vmax.f32 %v535_v16, 0.0  ;;  %v578_v25 = vadd.f32 %v577_v21, %v902_v24  ;;  %v579_v26 = vpop.f32.mrb[14].mxu1  ;;  %v539_v27 = vpop.f32.mrb[15].mxu0 }
  0xfc   :  { %v596_v11 = vmax.f32 %v576_v19, 0.0  ;;  %v595_v28 = vmax.f32 %v537_v20, 0.0  ;;  %v580_v29 = vpop.f32.mrb[15].mxu1 }
  0xfd   :  { %v597_v5 = vmax.f32 %v578_v25, 0.0 }
  0xfe   :  { %v728_v30 = vpack.c.bf16 %v595_v28, %v594_v23 }
  0xff   :  { %v729_v31 = vpack.c.bf16 %v597_v5, %v596_v11 }
 0x100   :  { %668 = vst [vmem:[%s947_s3 + $0x30] sm:$0xff] %v728_v30 }
 0x101   :  { %669 = vst [vmem:[%s947_s3 + $0x38] sm:$0xff] %v729_v31 }

// kernel: colorhandpose3d_forward.13
= control target key start
LH: loop header
LB: loop body
LE: loop exit
PB: predicated region body
PF: predicated region fallthrough
CT: control target
= control target key end

     0   :  { %v349_v1 = vmov 0   ;;  %vm146_vm0 = vcmask 1043456   ;;  %vm142_vm1 = vcmask 588800   ;;  %s445_s1 = inlined_call_operand.vmem [shape: bf16[72,512], index: 1, kind: input, shape index: {}]   ;;  %s446_s2 = inlined_call_operand.vmem [shape: f32[16,1], index: 2, kind: input, shape index: {}]   ;;  %s447_s0 = inlined_call_operand.vmem [shape: bf16[16,72], index: 0, kind: input, shape index: {}]   ;;  %s448_s3 = inlined_call_operand.vmem [shape: bf16[16,512], index: 3, kind: output, shape index: {}]  }
   0x1   :  { %v320_v0 = vld [vmem:[%s445_s1 + $0x4] ss:$16 sps:$4 sm:$0xff]   ;;  %191 = vmatprep.mubr.bf16.mxu0 %v349_v1  ;;  %234 = vmatprep.mubr.bf16.mxu1 %v349_v1  ;;  %v322_v2 = vld [vmem:[%s445_s1 + $0xc] ss:$16 sps:$4 sm:$0xff]   ;;  %v324_v3 = vld [vmem:[%s445_s1] ss:$16 sps:$4 sm:$0xff]  }
   0x2   :  { %319 = vset.pattern.permute.xlu0 %v349_v1  ;;  %159 = vmatprep.subr.bf16.mxu0 %v320_v0  ;;  %v325_v4 = vld [vmem:[%s445_s1 + $0x8] ss:$16 sps:$4 sm:$0xff]   ;;  %v326_v5 = vld [vmem:[%s445_s1 + $0x24] ss:$16 sps:$4 sm:$0xff]   ;;  %v328_v6 = vld [vmem:[%s445_s1 + $0x2c] ss:$16 sps:$4 sm:$0xff]  }
   0x3   :  { %202 = vmatprep.subr.bf16.mxu1 %v322_v2  ;;  %160 = vmatpush1.bf16.msra.mxu0 %v324_v3  ;;  %v330_v7 = vld [vmem:[%s445_s1 + $0x20] ss:$16 sps:$4 sm:$0xff]   ;;  %v331_v8 = vld [vmem:[%s445_s1 + $0x28] ss:$16 sps:$4 sm:$0xff]   ;;  %v332_v9 = vld [vmem:[%s445_s1 + $0x44] ss:$16 sps:$4 sm:$0xff]  }
   0x4   :  { %203 = vmatpush1.bf16.msra.mxu1 %v325_v4  ;;  %161 = vmatprep.subr.bf16.mxu0 %v326_v5  ;;  %v334_v10 = vld [vmem:[%s445_s1 + $0x4c] ss:$16 sps:$4 sm:$0xff]   ;;  %v336_v11 = vld [vmem:[%s445_s1 + $0x40] ss:$16 sps:$4 sm:$0xff]   ;;  %v337_v12 = vld [vmem:[%s445_s1 + $0x48] ss:$16 sps:$4 sm:$0xff]  }
   0x5   :  { %204 = vmatprep.subr.bf16.mxu1 %v328_v6  ;;  %v338_v13 = vld [vmem:[%s445_s1 + $0x64] ss:$16 sps:$4 sm:$0xff]   ;;  %v340_v14 = vld [vmem:[%s445_s1 + $0x6c] ss:$16 sps:$4 sm:$0xff]   ;;  %v342_v17 = vld [vmem:[%s445_s1 + $0x60] ss:$16 sps:$4 sm:$0xff]  }
   0x6   :  { %v33_v15 = vld [vmem:[%s445_s1 + $0x80] sm:$0xff]  ;;  %v34_v16 = vld [vmem:[%s445_s1 + $0x88] sm:$0xff] }
   0x7   :  { %162 = vmatpush1.bf16.msra.mxu0 %v330_v7  ;;  %v343_v18 = vld [vmem:[%s445_s1 + $0x68] ss:$16 sps:$4 sm:$0xff]   ;;  %v303_v19 = vcombine.high %v33_v15, %v33_v15  ;;  %v35_v20 = vld [vmem:[%s446_s2] sm:$0xff]  ;;  %v305_v21 = vcombine.high %v34_v16, %v34_v16  ;;  %v302_v22 = vcombine.low %v33_v15, %v33_v15  ;;  %v304_v23 = vcombine.low %v34_v16, %v34_v16 }
   0x8   :  { %205 = vmatpush1.bf16.msra.mxu1 %v331_v8  ;;  %163 = vmatprep.subr.bf16.mxu0 %v332_v9  ;;  %v36_v24 = vld [vmem:[%s446_s2 + $0x8] sm:$0xff]  ;;  %v348_v27 = vld [vmem:[%s447_s0] sm:$0xff]  }
   0x9   :  { %206 = vmatprep.subr.bf16.mxu1 %v334_v10  ;;  %39 = vperm.xlu0 %319, %v35_v20   ;;  %v148_v25 = vsel %vm146_vm0, %v302_v22, 0  ;;  %v154_v26 = vsel %vm146_vm0, %v304_v23, 0 }
   0xb   :  { %164 = vmatpush1.bf16.msra.mxu0 %v336_v11 }
   0xc   :  { %207 = vmatpush1.bf16.msra.mxu1 %v337_v12  ;;  %165 = vmatprep.subr.bf16.mxu0 %v338_v13 }
   0xd   :  { %208 = vmatprep.subr.bf16.mxu1 %v340_v14  ;;  %44 = vperm.xlu0 %319, %v36_v24  }
   0xf   :  { %166 = vmatpush1.bf16.msra.mxu0 %v342_v17 }
  0x10   :  { %209 = vmatpush1.bf16.msra.mxu1 %v343_v18  ;;  %306 = vmatprep.subr.msk.bf16.mxu0 %vm146_vm0, %v303_v19 }
  0x11   :  { %308 = vmatprep.subr.msk.bf16.mxu1 %vm146_vm0, %v305_v21 }
  0x13   :  { %168 = vmatpush1.bf16.msra.mxu0 %v148_v25 }
  0x14   :  { %211 = vmatpush1.bf16.msra.mxu1 %v154_v26 }
  0x16   :  { %307 = vmatmul.mubr.msk.bf16.vlgmr.msra.gmra.mrb[0].mxu0 %vm142_vm1, %v348_v27 }
  0x17   :  { %309 = vmatmul.mubr.msk.bf16.vlgmr.msra.gmra.mrb[0].mxu1 %vm142_vm1, %v348_v27 }
  0x88   :  { %v40_v28 = vpop.permute.xlu0 %39 }
  0x8c   :  { %v45_v29 = vpop.permute.xlu0 %44 }
  0xe9   :  { %v193_v30 = vpop.f32.mrb[0].mxu0 }
  0xea   :  { %v236_v31 = vpop.f32.mrb[0].mxu1  ;;  %v194_v32 = vadd.f32 %v193_v30, %v40_v28  ;;  %v195_v34 = vpop.f32.mrb[1].mxu0 }
  0xeb   :  { %v237_v33 = vadd.f32 %v236_v31, %v40_v28  ;;  %v238_v35 = vpop.f32.mrb[1].mxu1  ;;  %v196_v36 = vadd.f32 %v195_v34, %v40_v28  ;;  %v197_v38 = vpop.f32.mrb[2].mxu0 }
  0xec   :  { %v239_v37 = vadd.f32 %v238_v35, %v40_v28  ;;  %v240_v39 = vpop.f32.mrb[2].mxu1  ;;  %v245_v40 = vmax.f32 %v194_v32, 0.0  ;;  %v198_v42 = vadd.f32 %v197_v38, %v45_v29  ;;  %v199_v44 = vpop.f32.mrb[3].mxu0 }
  0xed   :  { %v247_v41 = vmax.f32 %v237_v33, 0.0  ;;  %v241_v43 = vadd.f32 %v240_v39, %v45_v29  ;;  %v242_v45 = vpop.f32.mrb[3].mxu1  ;;  %v246_v46 = vmax.f32 %v196_v36, 0.0  ;;  %v200_v48 = vadd.f32 %v199_v44, %v45_v29 }
  0xee   :  { %v248_v47 = vmax.f32 %v239_v37, 0.0  ;;  %v243_v49 = vadd.f32 %v242_v45, %v45_v29  ;;  %v249_v50 = vmax.f32 %v198_v42, 0.0 }
  0xef   :  { %v251_v51 = vmax.f32 %v241_v43, 0.0  ;;  %v314_v52 = vpack.c.bf16 %v246_v46, %v245_v40  ;;  %v250_v54 = vmax.f32 %v200_v48, 0.0 }
  0xf0   :  { %v315_v53 = vpack.c.bf16 %v248_v47, %v247_v41  ;;  %v252_v55 = vmax.f32 %v243_v49, 0.0 }
  0xf1   :  { %277 = vst [vmem:[%s448_s3] sm:$0xff] %v314_v52  ;;  %v316_v56 = vpack.c.bf16 %v250_v54, %v249_v50 }
  0xf2   :  { %278 = vst [vmem:[%s448_s3 + $0x8] sm:$0xff] %v315_v53  ;;  %v317_v57 = vpack.c.bf16 %v252_v55, %v251_v51 }
  0xf3   :  { %279 = vst [vmem:[%s448_s3 + $0x10] sm:$0xff] %v316_v56 }
  0xf4   :  { %280 = vst [vmem:[%s448_s3 + $0x18] sm:$0xff] %v317_v57 }

// kernel: colorhandpose3d_forward.14
= control target key start
LH: loop header
LB: loop body
LE: loop exit
PB: predicated region body
PF: predicated region fallthrough
CT: control target
= control target key end

     0   :  { %v95_v0 = vmov 0.0   ;;  %vm96_vm0 = vmmov 0   ;;  %v97_v2 = vmov 0   ;;  %vm30_vm1 = vcmask 130048   ;;  %s130_s1 = inlined_call_operand.vmem [shape: bf16[16,128], index: 1, kind: input, shape index: {}]   ;;  %s131_s0 = inlined_call_operand.vmem [shape: bf16[2,16], index: 0, kind: input, shape index: {}]   ;;  %s132_s2 = inlined_call_operand.vmem [shape: f32[2,1], index: 2, kind: input, shape index: {}]   ;;  %s133_s3 = inlined_call_operand.vmem [shape: bf16[2,128], index: 3, kind: output, shape index: {}]  }
   0x1   :  { %84 = vmatprep.subr.bf16.mxu0 %v95_v0  ;;  %v94_v1 = vld [vmem:[%s130_s1] sm:$0xff]   ;;  %86 = vmatprep.mubr.msk.bf16.mxu0 %vm96_vm0, %v95_v0 }
   0x2   :  { %93 = vset.pattern.permute.xlu0 %v97_v2  ;;  %v18_v3 = vld [vmem:[%s132_s2] sm:$0x3]  ;;  %85 = vmatpush3.bf16.msra.mxu0 %v94_v1 }
   0x3   :  { %v15_v4 = vld [vmem:[%s131_s0] sm:$0x1]  ;;  %21 = vperm.xlu0 %93, %v18_v3  }
   0x5   :  { %87 = vmatmul.mubr.msk.bf16.vlgmr.msra.gmra.mrb[0].mxu0 %vm30_vm1, %v15_v4 }
  0x82   :  { %v22_v5 = vpop.permute.xlu0 %21 }
  0xd8   :  { %v68_v6 = vpop.f32.mrb[0].mxu0 }
  0xd9   :  { %v69_v7 = vadd.f32 %v68_v6, %v22_v5  ;;  %v88_v8 = vpop.f32.mrb[1].mxu0 }
  0xda   :  { %v71_v9 = vpop.f32.mrb[2].mxu0 }
  0xdb   :  { %v74_v10 = vpack.c.bf16 %v69_v7, %v69_v7  ;;  %v89_v11 = vpop.f32.mrb[3].mxu0 }
  0xdd   :  { %75 = vst [vmem:[%s133_s3] sm:$0x1] %v74_v10 }

// kernel: colorhandpose3d_forward.15
= control target key start
LH: loop header
LB: loop body
LE: loop exit
PB: predicated region body
PF: predicated region fallthrough
CT: control target
= control target key end

     0   :  { %vm27_vm0 = vcmask 1043456   ;;  %v624_v0 = vmov 0.0   ;;  %vm625_vm1 = vmmov 0   ;;  %vm23_vm2 = vcmask 64512   ;;  %s786_s2 = inlined_call_operand.vmem [shape: bf16[4,8,32], index: 2, kind: input, shape index: {}]   ;;  %s787_s0 = inlined_call_operand.vmem [shape: bf16[4,8,8], index: 0, kind: input, shape index: {}]   ;;  %s788_s1 = inlined_call_operand.vmem [shape: bf16[4,32,8], index: 1, kind: input, shape index: {}]   ;;  %s789_s3 = inlined_call_operand.vmem [shape: f32[4,32,32], index: 3, kind: output, shape index: {}]  }
   0x1   :  { %562 = vmatprep.subr.bf16.mxu0 %v624_v0  ;;  %568 = vmatprep.subr.bf16.mxu1 %v624_v0  ;;  %v19_v1 = vld [vmem:[%s786_s2] sm:$0xf]  ;;  %v20_v2 = vld [vmem:[%s786_s2 + $0x4] sm:$0xf]  ;;  %v21_v5 = vld [vmem:[%s786_s2 + $0x8] sm:$0xf] }
   0x2   :  { %v29_v3 = vsel %vm27_vm0, %v19_v1, 0  ;;  %v75_v4 = vsel %vm27_vm0, %v20_v2, 0  ;;  %564 = vmatprep.mubr.msk.bf16.mxu0 %vm625_vm1, %v624_v0  ;;  %570 = vmatprep.mubr.msk.bf16.mxu1 %vm625_vm1, %v624_v0  ;;  %v15_v6 = vld [vmem:[%s787_s0] sm:$0xf]  ;;  %v16_v7 = vld [vmem:[%s787_s0 + $0x4] sm:$0xf] }
   0x3   :  { %563 = vmatpush3.bf16.msra.mxu0 %v29_v3  ;;  %569 = vmatpush3.bf16.msra.mxu1 %v75_v4  ;;  %v22_v8 = vld [vmem:[%s786_s2 + $0xc] sm:$0xf]  ;;  %v121_v9 = vsel %vm27_vm0, %v21_v5, 0  ;;  %v17_v11 = vld [vmem:[%s787_s0 + $0x8] sm:$0xf]  ;;  %v616_v13 = vld [vmem:[%s788_s1] sm:$0xff]  }
   0x4   :  { %574 = vmatprep.subr.bf16.mxu0 %v624_v0  ;;  %580 = vmatprep.subr.bf16.mxu1 %v624_v0  ;;  %v167_v10 = vsel %vm27_vm0, %v22_v8, 0  ;;  %v18_v12 = vld [vmem:[%s787_s0 + $0xc] sm:$0xf]  ;;  %v617_v14 = vld [vmem:[%s788_s1 + $0x10] sm:$0xff]   ;;  %v619_v28 = vld [vmem:[%s788_s1 + $0x18] sm:$0xff]   ;;  %vm501_vm3 = vcmask 261120  }
   0x5   :  { %v618_v27 = vld [vmem:[%s788_s1 + $0x8] sm:$0xff]   ;;  %v620_v29 = vld [vmem:[%s788_s1 + $0x20] sm:$0xff]   ;;  %v621_v30 = vld [vmem:[%s788_s1 + $0x30] sm:$0xff]  }
   0x6   :  { %565 = vmatmul.mubr.msk.bf16.vlgmr.msra.gmra.mrb[0].mxu0 %vm23_vm2, %v15_v6  ;;  %571 = vmatmul.mubr.msk.bf16.vlgmr.msra.gmra.mrb[0].mxu1 %vm23_vm2, %v16_v7  ;;  %v622_v43 = vld [vmem:[%s788_s1 + $0x28] sm:$0xff]   ;;  %v623_v44 = vld [vmem:[%s788_s1 + $0x38] sm:$0xff]  }
   0x7   :  { %575 = vmatpush3.bf16.msra.mxu0 %v121_v9  ;;  %581 = vmatpush3.bf16.msra.mxu1 %v167_v10 }
   0x8   :  { %576 = vmatprep.mubr.msk.bf16.mxu0 %vm625_vm1, %v624_v0  ;;  %582 = vmatprep.mubr.msk.bf16.mxu1 %vm625_vm1, %v624_v0 }
   0xe   :  { %577 = vmatmul.mubr.msk.bf16.vlgmr.msra.gmra.mrb[4].mxu0 %vm23_vm2, %v17_v11  ;;  %583 = vmatmul.mubr.msk.bf16.vlgmr.msra.gmra.mrb[4].mxu1 %vm23_vm2, %v18_v12 }
   0xf   :  { %588 = vmatprep.mubr.msk.bf16.mxu0 %vm23_vm2, %v616_v13  ;;  %594 = vmatprep.mubr.msk.bf16.mxu1 %vm23_vm2, %v617_v14 }
  0xd9   :  { %v65_v15 = vpop.f32.mrb[0].mxu0  ;;  %v111_v16 = vpop.f32.mrb[0].mxu1 }
  0xda   :  { %v225_v17 = vpack.c.bf16 %v65_v15, %v65_v15  ;;  %v226_v18 = vpack.c.bf16 %v111_v16, %v111_v16  ;;  %v566_v19 = vpop.f32.mrb[1].mxu0  ;;  %v572_v20 = vpop.f32.mrb[1].mxu1 }
  0xdb   :  { %v68_v21 = vpop.f32.mrb[2].mxu0  ;;  %v114_v22 = vpop.f32.mrb[2].mxu1 }
  0xdc   :  { %v246_v23 = vsel %vm27_vm0, %v225_v17, 0  ;;  %v314_v24 = vsel %vm27_vm0, %v226_v18, 0  ;;  %v567_v25 = vpop.f32.mrb[3].mxu0  ;;  %v573_v26 = vpop.f32.mrb[3].mxu1  ;;  %610 = vmatprep.subr.msk.bf16.mxu0 %vm27_vm0, %v225_v17  ;;  %611 = vmatprep.subr.msk.bf16.mxu1 %vm27_vm0, %v226_v18 }
  0xdd   :  { %587 = vmatpush3.bf16.msra.mxu0 %v246_v23  ;;  %593 = vmatpush3.bf16.msra.mxu1 %v314_v24 }
  0xe0   :  { %589 = vmatmul.mubr.msk.bf16.vlgmr.msra.gmra.mrb[8].mxu0 %vm23_vm2, %v618_v27  ;;  %595 = vmatmul.mubr.msk.bf16.vlgmr.msra.gmra.mrb[8].mxu1 %vm23_vm2, %v619_v28 }
  0xe1   :  { %v157_v31 = vpop.f32.mrb[4].mxu0  ;;  %v203_v32 = vpop.f32.mrb[4].mxu1  ;;  %600 = vmatprep.mubr.msk.bf16.mxu0 %vm23_vm2, %v620_v29  ;;  %606 = vmatprep.mubr.msk.bf16.mxu1 %vm23_vm2, %v621_v30 }
  0xe2   :  { %v227_v33 = vpack.c.bf16 %v157_v31, %v157_v31  ;;  %v228_v34 = vpack.c.bf16 %v203_v32, %v203_v32  ;;  %v578_v35 = vpop.f32.mrb[5].mxu0  ;;  %v584_v36 = vpop.f32.mrb[5].mxu1 }
  0xe3   :  { %v160_v37 = vpop.f32.mrb[6].mxu0  ;;  %v206_v38 = vpop.f32.mrb[6].mxu1 }
  0xe4   :  { %v382_v39 = vsel %vm27_vm0, %v227_v33, 0  ;;  %v450_v40 = vsel %vm27_vm0, %v228_v34, 0  ;;  %v579_v41 = vpop.f32.mrb[7].mxu0  ;;  %v585_v42 = vpop.f32.mrb[7].mxu1  ;;  %612 = vmatprep.subr.msk.bf16.mxu0 %vm27_vm0, %v227_v33  ;;  %613 = vmatprep.subr.msk.bf16.mxu1 %vm27_vm0, %v228_v34 }
  0xe5   :  { %599 = vmatpush3.bf16.msra.mxu0 %v382_v39  ;;  %605 = vmatpush3.bf16.msra.mxu1 %v450_v40 }
  0xe8   :  { %601 = vmatmul.mubr.msk.bf16.vlgmr.msra.gmra.mrb[12].mxu0 %vm23_vm2, %v622_v43  ;;  %607 = vmatmul.mubr.msk.bf16.vlgmr.msra.gmra.mrb[12].mxu1 %vm23_vm2, %v623_v44 }
 0x1b3   :  { %v590_v45 = vpop.f32.mrb[8].mxu0  ;;  %v596_v46 = vpop.f32.mrb[8].mxu1 }
 0x1b4   :  { %504 = vst.msk [vmem:[%s789_s3 + $0x10] sm:$0xff] %vm501_vm3, %v590_v45  ;;  %508 = vst.msk [vmem:[%s789_s3 + $0x30] sm:$0xff] %vm501_vm3, %v596_v46  ;;  %v282_v47 = vpop.f32.mrb[9].mxu0  ;;  %v350_v48 = vpop.f32.mrb[9].mxu1 }
 0x1b5   :  { %502 = vst.msk [vmem:[%s789_s3] sm:$0xff] %vm501_vm3, %v282_v47  ;;  %506 = vst.msk [vmem:[%s789_s3 + $0x20] sm:$0xff] %vm501_vm3, %v350_v48  ;;  %v591_v49 = vpop.f32.mrb[10].mxu0  ;;  %v597_v50 = vpop.f32.mrb[10].mxu1 }
 0x1b6   :  { %505 = vst.msk [vmem:[%s789_s3 + $0x18] sm:$0xff] %vm501_vm3, %v591_v49  ;;  %509 = vst.msk [vmem:[%s789_s3 + $0x38] sm:$0xff] %vm501_vm3, %v597_v50  ;;  %v285_v51 = vpop.f32.mrb[11].mxu0  ;;  %v353_v52 = vpop.f32.mrb[11].mxu1 }
 0x1b7   :  { %503 = vst.msk [vmem:[%s789_s3 + $0x8] sm:$0xff] %vm501_vm3, %v285_v51  ;;  %507 = vst.msk [vmem:[%s789_s3 + $0x28] sm:$0xff] %vm501_vm3, %v353_v52 }
 0x1bb   :  { %v602_v53 = vpop.f32.mrb[12].mxu0  ;;  %v608_v54 = vpop.f32.mrb[12].mxu1 }
 0x1bc   :  { %512 = vst.msk [vmem:[%s789_s3 + $0x50] sm:$0xff] %vm501_vm3, %v602_v53  ;;  %516 = vst.msk [vmem:[%s789_s3 + $0x70] sm:$0xff] %vm501_vm3, %v608_v54  ;;  %v418_v55 = vpop.f32.mrb[13].mxu0  ;;  %v486_v56 = vpop.f32.mrb[13].mxu1 }
 0x1bd   :  { %510 = vst.msk [vmem:[%s789_s3 + $0x40] sm:$0xff] %vm501_vm3, %v418_v55  ;;  %514 = vst.msk [vmem:[%s789_s3 + $0x60] sm:$0xff] %vm501_vm3, %v486_v56  ;;  %v603_v57 = vpop.f32.mrb[14].mxu0  ;;  %v609_v58 = vpop.f32.mrb[14].mxu1 }
 0x1be   :  { %513 = vst.msk [vmem:[%s789_s3 + $0x58] sm:$0xff] %vm501_vm3, %v603_v57  ;;  %517 = vst.msk [vmem:[%s789_s3 + $0x78] sm:$0xff] %vm501_vm3, %v609_v58  ;;  %v421_v59 = vpop.f32.mrb[15].mxu0  ;;  %v489_v60 = vpop.f32.mrb[15].mxu1 }
 0x1bf   :  { %511 = vst.msk [vmem:[%s789_s3 + $0x48] sm:$0xff] %vm501_vm3, %v421_v59  ;;  %515 = vst.msk [vmem:[%s789_s3 + $0x68] sm:$0xff] %vm501_vm3, %v489_v60 }

// kernel: colorhandpose3d_forward.16
= control target key start
LH: loop header
LB: loop body
LE: loop exit
PB: predicated region body
PF: predicated region fallthrough
CT: control target
= control target key end

     0   :  { %vm102_vm0 = vcmask 261120   ;;  %s1498_s0 = inlined_call_operand.vmem [shape: f32[2,32,32], index: 0, kind: input, shape index: {}]   ;;  %s1499_s1 = inlined_call_operand.vmem [shape: f32[2,32,32], index: 1, kind: input, shape index: {}]   ;;  %s1500_s2 = inlined_call_operand.vmem [shape: bf16[2,32,32], index: 2, kind: input, shape index: {}, may-alias: {2,3}]   ;;  %s1501_s3 = inlined_call_operand.vmem [shape: bf16[2,32,32], index: 3, kind: input, shape index: {}, may-alias: {2,3}]   ;;  %s1502_s4 = inlined_call_operand.vmem [shape: f32[2,32,32], index: 4, kind: output, shape index: {}]  }
   0x1   :  { %v20_v0 = vld [vmem:[%s1498_s0 + $0x10] sm:$0xff]  ;;  %v18_v2 = vld [vmem:[%s1498_s0] sm:$0xff]  ;;  %v21_v5 = vld [vmem:[%s1498_s0 + $0x18] sm:$0xff] }
   0x2   :  { %v28_v1 = vld [vmem:[%s1499_s1 + $0x10] sm:$0xff]  ;;  %v26_v4 = vld [vmem:[%s1499_s1] sm:$0xff]  ;;  %v29_v6 = vld [vmem:[%s1499_s1 + $0x18] sm:$0xff] }
   0x3   :  { %v36_v3 = vsub.f32 %v20_v0, %v28_v1  ;;  %v34_v7 = vsub.f32 %v18_v2, %v26_v4  ;;  %v37_v8 = vsub.f32 %v21_v5, %v29_v6  ;;  %v19_v9 = vld [vmem:[%s1498_s0 + $0x8] sm:$0xff]  ;;  %v22_v15 = vld [vmem:[%s1498_s0 + $0x20] sm:$0xff]  ;;  %v25_v21 = vld [vmem:[%s1498_s0 + $0x38] sm:$0xff] }
   0x4   :  { %v27_v10 = vld [vmem:[%s1499_s1 + $0x8] sm:$0xff]  ;;  %v30_v16 = vld [vmem:[%s1499_s1 + $0x20] sm:$0xff]  ;;  %v33_v22 = vld [vmem:[%s1499_s1 + $0x38] sm:$0xff] }
   0x5   :  { %v23_v11 = vld [vmem:[%s1498_s0 + $0x28] sm:$0xff]  ;;  %v46_v12 = vmul.f32 1.442695, %v36_v3  ;;  %v35_v13 = vsub.f32 %v19_v9, %v27_v10  ;;  %v42_v17 = vmul.f32 1.442695, %v34_v7  ;;  %v38_v20 = vsub.f32 %v22_v15, %v30_v16  ;;  %v24_v25 = vld [vmem:[%s1498_s0 + $0x30] sm:$0xff] }
   0x6   :  { %v31_v14 = vld [vmem:[%s1499_s1 + $0x28] sm:$0xff]  ;;  %v48_v18 = vmul.f32 1.442695, %v37_v8  ;;  %v41_v24 = vsub.f32 %v25_v21, %v33_v22  ;;  %v32_v26 = vld [vmem:[%s1499_s1 + $0x30] sm:$0xff]  ;;  %v1301_v0 = vld [vmem:[%s1500_s2] sm:$0xff]  }
   0x7   :  { %v39_v19 = vsub.f32 %v23_v11, %v31_v14  ;;  %1159 = vpow2.f32 %v46_v12  ;;  %v44_v23 = vmul.f32 1.442695, %v35_v13  ;;  %v50_v28 = vmul.f32 1.442695, %v38_v20  ;;  %1057 = vmatprep.mubr.msk.bf16.mxu0 %vm102_vm0, %v1301_v0  ;;  %v1308_v1 = vld [vmem:[%s1500_s2 + $0x10] sm:$0xff]  }
   0x8   :  { %1161 = vpow2.f32 %v42_v17  ;;  %v40_v29 = vsub.f32 %v24_v25, %v32_v26  ;;  %v56_v30 = vmul.f32 1.442695, %v41_v24  ;;  %1065 = vmatprep.mubr.msk.bf16.mxu1 %vm102_vm0, %v1308_v1  ;;  %v1191_v26 = vmov 1.0|1.0  }
   0x9   :  { %v52_v27 = vmul.f32 1.442695, %v39_v19  ;;  %1163 = vpow2.f32 %v48_v18 }
   0xa   :  { %1165 = vpow2.f32 %v44_v23  ;;  %v54_v31 = vmul.f32 1.442695, %v40_v29 }
   0xb   :  { %1167 = vpow2.f32 %v52_v27 }
   0xc   :  { %1169 = vpow2.f32 %v50_v28  ;;  %v1319_v28 = vld [vmem:[%s1501_s3] sm:$0xff]  }
   0xd   :  { %1171 = vpow2.f32 %v56_v30  ;;  %v1324_v30 = vld [vmem:[%s1500_s2 + $0x8] sm:$0xff]  }
   0xe   :  { %1173 = vpow2.f32 %v54_v31  ;;  %v1337_v31 = vld [vmem:[%s1500_s2 + $0x18] sm:$0xff]  }
  0x11   :  { %v1160_v32 = vpop.eup %1159 }
  0x12   :  { %v1162_v33 = vpop.eup %1161  ;;  %v60_v34 = vadd.f32 1.0, %v1160_v32  ;;  %v1344_v32 = vld [vmem:[%s1501_s3 + $0x8] sm:$0xff]  }
  0x13   :  { %v1164_v35 = vpop.eup %1163  ;;  %v58_v36 = vadd.f32 1.0, %v1162_v33  ;;  %v1351_v33 = vld [vmem:[%s1501_s3 + $0x10] sm:$0xff]  }
  0x14   :  { %v1166_v37 = vpop.eup %1165  ;;  %1175 = vrcp.f32 %v60_v34  ;;  %v61_v38 = vadd.f32 1.0, %v1164_v35  ;;  %v1358_v34 = vld [vmem:[%s1501_s3 + $0x18] sm:$0xff]  }
  0x15   :  { %v1168_v39 = vpop.eup %1167  ;;  %1177 = vrcp.f32 %v58_v36  ;;  %v59_v40 = vadd.f32 1.0, %v1166_v37 }
  0x16   :  { %v1170_v41 = vpop.eup %1169  ;;  %1179 = vrcp.f32 %v61_v38  ;;  %v63_v42 = vadd.f32 1.0, %v1168_v39 }
  0x17   :  { %v1172_v43 = vpop.eup %1171  ;;  %1181 = vrcp.f32 %v59_v40  ;;  %v62_v44 = vadd.f32 1.0, %v1170_v41 }
  0x18   :  { %v1174_v45 = vpop.eup %1173  ;;  %1183 = vrcp.f32 %v63_v42  ;;  %v65_v46 = vadd.f32 1.0, %v1172_v43 }
  0x19   :  { %1185 = vrcp.f32 %v62_v44  ;;  %v64_v47 = vadd.f32 1.0, %v1174_v45 }
  0x1a   :  { %1187 = vrcp.f32 %v65_v46 }
  0x1b   :  { %1189 = vrcp.f32 %v64_v47 }
  0x1e   :  { %v1266_v48 = vpop.eup %1175 }
  0x1f   :  { %v1268_v49 = vpop.eup %1177  ;;  %v109_v50 = vsel %vm102_vm0, %v1266_v48, -inf  ;;  %vm84_vm15 = vcmp.ge.f32.partialorder %v1266_v48, 0.5 }
  0x20   :  { %v1272_v51 = vpop.eup %1179  ;;  %110 = vmax.xlane.f32.xlu1 %v109_v50  ;;  %v103_v52 = vsel %vm102_vm0, %v1268_v49, -inf  ;;  %vm82_vm13 = vcmp.ge.f32.partialorder %v1268_v49, 0.5  ;;  %v1192_v50 = vmov 0.0  }
  0x21   :  { %v1276_v53 = vpop.eup %1181  ;;  %104 = vmax.xlane.f32.xlu0 %v103_v52  ;;  %v112_v54 = vsel %vm102_vm0, %v1272_v51, -inf  ;;  %v90_v52 = vsel %vm82_vm13, 1.0, %v1192_v50 }
  0x22   :  { %v1280_v55 = vpop.eup %1183  ;;  %v106_v56 = vsel %vm102_vm0, %v1276_v53, -inf  ;;  %vm83_vm14 = vcmp.ge.f32.partialorder %v1276_v53, 0.5 }
  0x23   :  { %v1284_v57 = vpop.eup %1185  ;;  %v118_v58 = vsel %vm102_vm0, %v1280_v55, -inf }
  0x24   :  { %113 = vmax.xlane.f32.xlu1 %v112_v54  ;;  %v1288_v59 = vpop.eup %1187  ;;  %v115_v60 = vsel %vm102_vm0, %v1284_v57, -inf }
  0x25   :  { %107 = vmax.xlane.f32.xlu0 %v106_v56  ;;  %v1292_v61 = vpop.eup %1189  ;;  %v124_v62 = vsel %vm102_vm0, %v1288_v59, -inf  ;;  %v91_v56 = vsel %vm83_vm14, 1.0, %v1192_v50 }
  0x26   :  { %v121_v63 = vsel %vm102_vm0, %v1292_v61, -inf }
  0x28   :  { %119 = vmax.xlane.f32.xlu1 %v118_v58  ;;  %v92_v58 = vsel %vm84_vm15, 1.0, %v1192_v50 }
  0x29   :  { %116 = vmax.xlane.f32.xlu0 %v115_v60 }
  0x2c   :  { %125 = vmax.xlane.f32.xlu1 %v124_v62 }
  0x2d   :  { %122 = vmax.xlane.f32.xlu0 %v121_v63  ;;  %v1381_v63 = vpack.c.bf16 %v91_v56, %v90_v52 }
  0xad   :  { %v111_v2 = vpop.xlane.xlu1 %110 }
  0xae   :  { %v105_v3 = vpop.xlane.xlu0 %104 }
  0xaf   :  { %v127_v6 = vmax.f32 %v105_v3, %v111_v2 }
  0xb1   :  { %v114_v4 = vpop.xlane.xlu1 %113 }
  0xb2   :  { %v108_v5 = vpop.xlane.xlu0 %107 }
  0xb3   :  { %v128_v7 = vmax.f32 %v108_v5, %v114_v4 }
  0xb5   :  { %v129_v8 = vmax.f32 %v127_v6, %v128_v7  ;;  %v120_v9 = vpop.xlane.xlu1 %119 }
  0xb6   :  { %v117_v10 = vpop.xlane.xlu0 %116 }
  0xb7   :  { %v130_v11 = vrot.slane %v129_v8, 4 }
  0xb9   :  { %v131_v12 = vmax.f32 %v129_v8, %v130_v11  ;;  %v126_v13 = vpop.xlane.xlu1 %125 }
  0xba   :  { %v137_v14 = vmax.f32 %v120_v9, %v126_v13  ;;  %v123_v15 = vpop.xlane.xlu0 %122 }
  0xbb   :  { %v132_v16 = vrot.slane %v131_v12, 2  ;;  %v136_v17 = vmax.f32 %v117_v10, %v123_v15 }
  0xbd   :  { %v133_v18 = vmax.f32 %v131_v12, %v132_v16  ;;  %v138_v19 = vmax.f32 %v136_v17, %v137_v14 }
  0xbf   :  { %v134_v20 = vrot.slane %v133_v18, 1  ;;  %v139_v21 = vrot.slane %v138_v19, 4 }
  0xc1   :  { %v135_v22 = vmax.f32 %v133_v18, %v134_v20  ;;  %v140_v23 = vmax.f32 %v138_v19, %v139_v21 }
  0xc3   :  { %v141_v24 = vrot.slane %v140_v23, 2  ;;  %vm145_vm1 = vcmp.ge.f32.partialorder %v1268_v49, %v135_v22  ;;  %vm146_vm2 = vcmp.ge.f32.partialorder %v1276_v53, %v135_v22  ;;  %vm147_vm3 = vcmp.ge.f32.partialorder %v1266_v48, %v135_v22 }
  0xc4   :  { %vm967_vm4 = vmpackc.low %vm146_vm2, %vm145_vm1  ;;  %vm148_vm5 = vcmp.ge.f32.partialorder %v1272_v51, %v135_v22  ;;  %vm85_vm1 = vcmp.ge.f32.partialorder %v1272_v51, 0.5 }
  0xc5   :  { %v142_v25 = vmax.f32 %v140_v23, %v141_v24  ;;  %1053 = vmatprep.subr.msk.bf16.mxu0 %vm967_vm4, %v1191_v26  ;;  %vm969_vm6 = vmpackc.low %vm148_vm5, %vm147_vm3  ;;  %v93_v60 = vsel %vm85_vm1, 1.0, %v1192_v50 }
  0xc6   :  { %1054 = vmatpush3.bf16.msk.msra.mxu0 %vm967_vm4, %v1191_v26  ;;  %v1383_v2 = vpack.c.bf16 %v93_v60, %v92_v58 }
  0xc7   :  { %v143_v27 = vrot.slane %v142_v25, 1  ;;  %1055 = vmatprep.subr.msk.bf16.mxu0 %vm969_vm6, %v1191_v26 }
  0xc9   :  { %v144_v29 = vmax.f32 %v142_v25, %v143_v27 }
  0xca   :  { %1056 = vmatpush3.bf16.msk.msra.mxu0 %vm969_vm6, %v1191_v26  ;;  %vm86_vm6 = vcmp.ge.f32.partialorder %v1284_v57, 0.5 }
  0xcb   :  { %vm149_vm7 = vcmp.ge.f32.partialorder %v1284_v57, %v144_v29  ;;  %vm150_vm8 = vcmp.ge.f32.partialorder %v1280_v55, %v144_v29  ;;  %vm151_vm9 = vcmp.ge.f32.partialorder %v1292_v61, %v144_v29  ;;  %vm152_vm10 = vcmp.ge.f32.partialorder %v1288_v59, %v144_v29  ;;  %1069 = vmatprep.subr.bf16.mxu0 %v1319_v28 }
  0xcc   :  { %vm975_vm11 = vmpackc.low %vm150_vm8, %vm149_vm7  ;;  %vm87_vm7 = vcmp.ge.f32.partialorder %v1280_v55, 0.5  ;;  %vm88_vm8 = vcmp.ge.f32.partialorder %v1292_v61, 0.5  ;;  %v94_v10 = vsel %vm86_vm6, 1.0, %v1192_v50 }
  0xcd   :  { %1058 = vmatmul.mubr.msk.bf16.vlgmr.msra.gmra.mrb[0].mxu0 %vm102_vm0, %v1324_v30  ;;  %1061 = vmatprep.subr.msk.bf16.mxu1 %vm975_vm11, %v1191_v26  ;;  %vm977_vm12 = vmpackc.low %vm152_vm10, %vm151_vm9  ;;  %vm89_vm9 = vcmp.ge.f32.partialorder %v1288_v59, 0.5  ;;  %v95_v11 = vsel %vm87_vm7, 1.0, %v1192_v50  ;;  %v96_v57 = vsel %vm88_vm8, 1.0, %v1192_v50 }
  0xce   :  { %1062 = vmatpush3.bf16.msk.msra.mxu1 %vm975_vm11, %v1191_v26  ;;  %1070 = vmatpush3.bf16.msra.mxu0 %v1319_v28  ;;  %v97_v13 = vsel %vm89_vm9, 1.0, %v1192_v50  ;;  %v1398_v14 = vpack.c.bf16 %v95_v11, %v94_v10 }
  0xcf   :  { %1063 = vmatprep.subr.msk.bf16.mxu1 %vm977_vm12, %v1191_v26  ;;  %1071 = vmatprep.subr.bf16.mxu0 %v1344_v32  ;;  %v1402_v19 = vpack.c.bf16 %v97_v13, %v96_v57 }
  0xd2   :  { %1064 = vmatpush3.bf16.msk.msra.mxu1 %vm977_vm12, %v1191_v26  ;;  %1072 = vmatpush3.bf16.msra.mxu0 %v1344_v32 }
  0xd3   :  { %1077 = vmatprep.subr.bf16.mxu1 %v1351_v33 }
  0xd5   :  { %1066 = vmatmul.mubr.msk.bf16.vlgmr.msra.gmra.mrb[0].mxu1 %vm102_vm0, %v1337_v31 }
  0xd6   :  { %1078 = vmatpush3.bf16.msra.mxu1 %v1351_v33 }
  0xd7   :  { %1079 = vmatprep.subr.bf16.mxu1 %v1358_v34 }
  0xda   :  { %1080 = vmatpush3.bf16.msra.mxu1 %v1358_v34 }
 0x1a0   :  { %v1059_v35 = vpop.f32.mrb[0].mxu0 }
 0x1a1   :  { %v231_v36 = vpop.f32.mrb[1].mxu0 }
 0x1a2   :  { %v1060_v37 = vpop.f32.mrb[2].mxu0 }
 0x1a3   :  { %v312_v38 = vpack.c.bf16 %v1060_v37, %v1059_v35  ;;  %v234_v39 = vpop.f32.mrb[3].mxu0 }
 0x1a4   :  { %v311_v40 = vpack.c.bf16 %v234_v39, %v231_v36 }
 0x1a6   :  { %1073 = vmatprep.mubr.msk.bf16.mxu0 %vm102_vm0, %v311_v40 }
 0x1a7   :  { %1074 = vmatmul.mubr.msk.bf16.vlgmr.msra.gmra.mrb[4].mxu0 %vm102_vm0, %v312_v38 }
 0x1a8   :  { %v1067_v41 = vpop.f32.mrb[0].mxu1  ;;  %1089 = vmatprep.mubr.msk.bf16.mxu0 %vm102_vm0, %v1301_v0 }
 0x1a9   :  { %v296_v42 = vpop.f32.mrb[1].mxu1 }
 0x1aa   :  { %v1068_v43 = vpop.f32.mrb[2].mxu1 }
 0x1ab   :  { %v314_v44 = vpack.c.bf16 %v1068_v43, %v1067_v41  ;;  %v299_v45 = vpop.f32.mrb[3].mxu1 }
 0x1ac   :  { %v313_v46 = vpack.c.bf16 %v299_v45, %v296_v42 }
 0x1ae   :  { %1081 = vmatprep.mubr.msk.bf16.mxu1 %vm102_vm0, %v313_v46 }
 0x1af   :  { %1082 = vmatmul.mubr.msk.bf16.vlgmr.msra.gmra.mrb[4].mxu1 %vm102_vm0, %v314_v44 }
 0x1b0   :  { %1097 = vmatprep.mubr.msk.bf16.mxu1 %vm102_vm0, %v1308_v1 }
 0x27a   :  { %v1075_v47 = vpop.f32.mrb[4].mxu0 }
 0x27b   :  { %vm451_vm2 = vcmp.gt.f32.partialorder %v1075_v47, 0.0  ;;  %v367_v54 = vpop.f32.mrb[5].mxu0 }
 0x27c   :  { %v459_v49 = vsel %vm451_vm2, 1.0, %v1192_v50  ;;  %vm449_vm3 = vcmp.gt.f32.partialorder %v367_v54, 0.0  ;;  %v1076_v53 = vpop.f32.mrb[6].mxu0 }
 0x27d   :  { %v457_v48 = vsel %vm449_vm3, 1.0, %v1192_v50  ;;  %vm452_vm4 = vcmp.gt.f32.partialorder %v1076_v53, 0.0  ;;  %v370_v51 = vpop.f32.mrb[7].mxu0 }
 0x27e   :  { %v460_v62 = vsel %vm452_vm4, 1.0, %v1192_v50  ;;  %vm450_vm5 = vcmp.gt.f32.partialorder %v370_v51, 0.0 }
 0x27f   :  { %v466_v3 = vpack.c.bf16 %v460_v62, %v459_v49  ;;  %v458_v4 = vsel %vm450_vm5, 1.0, %v1192_v50 }
 0x280   :  { %v465_v5 = vpack.c.bf16 %v458_v4, %v457_v48 }
 0x281   :  { %v470_v8 = vmul.bf16 %v466_v3, %v1383_v2 }
 0x282   :  { %v1083_v6 = vpop.f32.mrb[4].mxu1  ;;  %v469_v7 = vmul.bf16 %v465_v5, %v1381_v63 }
 0x283   :  { %vm455_vm10 = vcmp.gt.f32.partialorder %v1083_v6, 0.0  ;;  %v434_v9 = vpop.f32.mrb[5].mxu1 }
 0x284   :  { %vm453_vm11 = vcmp.gt.f32.partialorder %v434_v9, 0.0  ;;  %v1084_v12 = vpop.f32.mrb[6].mxu1  ;;  %1085 = vmatprep.subr.bf16.mxu0 %v469_v7  ;;  %v463_v61 = vsel %vm455_vm10, 1.0, %v1192_v50 }
 0x285   :  { %vm456_vm12 = vcmp.gt.f32.partialorder %v1084_v12, 0.0  ;;  %v437_v55 = vpop.f32.mrb[7].mxu1  ;;  %1086 = vmatpush3.bf16.msra.mxu0 %v469_v7  ;;  %v461_v15 = vsel %vm453_vm11, 1.0, %v1192_v50 }
 0x286   :  { %v464_v59 = vsel %vm456_vm12, 1.0, %v1192_v50  ;;  %vm454_vm13 = vcmp.gt.f32.partialorder %v437_v55, 0.0  ;;  %1087 = vmatprep.subr.bf16.mxu0 %v470_v8 }
 0x287   :  { %v468_v16 = vpack.c.bf16 %v464_v59, %v463_v61  ;;  %v462_v17 = vsel %vm454_vm13, 1.0, %v1192_v50 }
 0x288   :  { %v467_v18 = vpack.c.bf16 %v462_v17, %v461_v15 }
 0x289   :  { %1088 = vmatpush3.bf16.msra.mxu0 %v470_v8  ;;  %v472_v21 = vmul.bf16 %v468_v16, %v1402_v19 }
 0x28a   :  { %v471_v20 = vmul.bf16 %v467_v18, %v1398_v14  ;;  %1101 = vmatprep.subr.bf16.mxu0 %v1319_v28 }
 0x28c   :  { %1090 = vmatmul.mubr.msk.bf16.vlgmr.msra.gmra.mrb[8].mxu0 %vm102_vm0, %v1324_v30  ;;  %1093 = vmatprep.subr.bf16.mxu1 %v471_v20 }
 0x28d   :  { %1094 = vmatpush3.bf16.msra.mxu1 %v471_v20  ;;  %1102 = vmatpush3.bf16.msra.mxu0 %v1319_v28 }
 0x28e   :  { %1095 = vmatprep.subr.bf16.mxu1 %v472_v21  ;;  %1103 = vmatprep.subr.bf16.mxu0 %v1344_v32 }
 0x291   :  { %1096 = vmatpush3.bf16.msra.mxu1 %v472_v21  ;;  %1104 = vmatpush3.bf16.msra.mxu0 %v1344_v32 }
 0x292   :  { %1109 = vmatprep.subr.bf16.mxu1 %v1351_v33 }
 0x294   :  { %1098 = vmatmul.mubr.msk.bf16.vlgmr.msra.gmra.mrb[8].mxu1 %vm102_vm0, %v1337_v31 }
 0x295   :  { %1110 = vmatpush3.bf16.msra.mxu1 %v1351_v33 }
 0x296   :  { %1111 = vmatprep.subr.bf16.mxu1 %v1358_v34 }
 0x299   :  { %1112 = vmatpush3.bf16.msra.mxu1 %v1358_v34 }
 0x35f   :  { %v1091_v22 = vpop.f32.mrb[8].mxu0 }
 0x360   :  { %v507_v23 = vpop.f32.mrb[9].mxu0 }
 0x361   :  { %v1092_v24 = vpop.f32.mrb[10].mxu0 }
 0x362   :  { %v572_v25 = vpack.c.bf16 %v1092_v24, %v1091_v22  ;;  %v510_v26 = vpop.f32.mrb[11].mxu0 }
 0x363   :  { %v571_v27 = vpack.c.bf16 %v510_v26, %v507_v23 }
 0x365   :  { %1105 = vmatprep.mubr.msk.bf16.mxu0 %vm102_vm0, %v571_v27 }
 0x366   :  { %1106 = vmatmul.mubr.msk.bf16.vlgmr.msra.gmra.mrb[12].mxu0 %vm102_vm0, %v572_v25 }
 0x367   :  { %v1099_v29 = vpop.f32.mrb[8].mxu1  ;;  %1121 = vmatprep.mubr.msk.bf16.mxu0 %vm102_vm0, %v1301_v0 }
 0x368   :  { %v556_v35 = vpop.f32.mrb[9].mxu1 }
 0x369   :  { %v1100_v36 = vpop.f32.mrb[10].mxu1 }
 0x36a   :  { %v574_v37 = vpack.c.bf16 %v1100_v36, %v1099_v29  ;;  %v559_v38 = vpop.f32.mrb[11].mxu1 }
 0x36b   :  { %v573_v39 = vpack.c.bf16 %v559_v38, %v556_v35 }
 0x36d   :  { %1113 = vmatprep.mubr.msk.bf16.mxu1 %vm102_vm0, %v573_v39 }
 0x36e   :  { %1114 = vmatmul.mubr.msk.bf16.vlgmr.msra.gmra.mrb[12].mxu1 %vm102_vm0, %v574_v37 }
 0x36f   :  { %1129 = vmatprep.mubr.msk.bf16.mxu1 %vm102_vm0, %v1308_v1 }
 0x439   :  { %v1107_v40 = vpop.f32.mrb[12].mxu0 }
 0x43a   :  { %vm687_vm14 = vcmp.gt.f32.partialorder %v1107_v40, 0.0  ;;  %v615_v41 = vpop.f32.mrb[13].mxu0 }
 0x43b   :  { %v695_v42 = vsel %vm687_vm14, 1.0, %v1192_v50  ;;  %vm685_vm15 = vcmp.gt.f32.partialorder %v615_v41, 0.0  ;;  %v1108_v43 = vpop.f32.mrb[14].mxu0 }
 0x43c   :  { %v693_v0 = vsel %vm685_vm15, 1.0, %v1192_v50  ;;  %vm688_vm1 = vcmp.gt.f32.partialorder %v1108_v43, 0.0  ;;  %v618_v44 = vpop.f32.mrb[15].mxu0 }
 0x43d   :  { %v696_v45 = vsel %vm688_vm1, 1.0, %v1192_v50  ;;  %vm686_vm2 = vcmp.gt.f32.partialorder %v618_v44, 0.0 }
 0x43e   :  { %v702_v46 = vpack.c.bf16 %v696_v45, %v695_v42  ;;  %v694_v47 = vsel %vm686_vm2, 1.0, %v1192_v50 }
 0x43f   :  { %v701_v52 = vpack.c.bf16 %v694_v47, %v693_v0 }
 0x440   :  { %v706_v56 = vmul.bf16 %v702_v46, %v1383_v2 }
 0x441   :  { %v1115_v54 = vpop.f32.mrb[12].mxu1  ;;  %v705_v1 = vmul.bf16 %v701_v52, %v1381_v63 }
 0x442   :  { %vm691_vm3 = vcmp.gt.f32.partialorder %v1115_v54, 0.0  ;;  %v670_v58 = vpop.f32.mrb[13].mxu1 }
 0x443   :  { %vm689_vm4 = vcmp.gt.f32.partialorder %v670_v58, 0.0  ;;  %v1116_v60 = vpop.f32.mrb[14].mxu1  ;;  %1117 = vmatprep.subr.bf16.mxu0 %v705_v1  ;;  %v699_v53 = vsel %vm691_vm3, 1.0, %v1192_v50 }
 0x444   :  { %vm692_vm5 = vcmp.gt.f32.partialorder %v1116_v60, 0.0  ;;  %v673_v49 = vpop.f32.mrb[15].mxu1  ;;  %1118 = vmatpush3.bf16.msra.mxu0 %v705_v1  ;;  %v697_v51 = vsel %vm689_vm4, 1.0, %v1192_v50 }
 0x445   :  { %v700_v48 = vsel %vm692_vm5, 1.0, %v1192_v50  ;;  %vm690_vm6 = vcmp.gt.f32.partialorder %v673_v49, 0.0  ;;  %1119 = vmatprep.subr.bf16.mxu0 %v706_v56 }
 0x446   :  { %v704_v62 = vpack.c.bf16 %v700_v48, %v699_v53  ;;  %v698_v3 = vsel %vm690_vm6, 1.0, %v1192_v50 }
 0x447   :  { %v703_v4 = vpack.c.bf16 %v698_v3, %v697_v51 }
 0x448   :  { %1120 = vmatpush3.bf16.msra.mxu0 %v706_v56  ;;  %v708_v6 = vmul.bf16 %v704_v62, %v1402_v19 }
 0x449   :  { %v707_v5 = vmul.bf16 %v703_v4, %v1398_v14  ;;  %1133 = vmatprep.subr.bf16.mxu0 %v1319_v28 }
 0x44b   :  { %1125 = vmatprep.subr.bf16.mxu1 %v707_v5  ;;  %1122 = vmatmul.mubr.msk.bf16.vlgmr.msra.gmra.mrb[16].mxu0 %vm102_vm0, %v1324_v30 }
 0x44c   :  { %1126 = vmatpush3.bf16.msra.mxu1 %v707_v5  ;;  %1134 = vmatpush3.bf16.msra.mxu0 %v1319_v28 }
 0x44d   :  { %1127 = vmatprep.subr.bf16.mxu1 %v708_v6  ;;  %1135 = vmatprep.subr.bf16.mxu0 %v1344_v32 }
 0x450   :  { %1128 = vmatpush3.bf16.msra.mxu1 %v708_v6  ;;  %1136 = vmatpush3.bf16.msra.mxu0 %v1344_v32 }
 0x451   :  { %1141 = vmatprep.subr.bf16.mxu1 %v1351_v33 }
 0x453   :  { %1130 = vmatmul.mubr.msk.bf16.vlgmr.msra.gmra.mrb[16].mxu1 %vm102_vm0, %v1337_v31 }
 0x454   :  { %1142 = vmatpush3.bf16.msra.mxu1 %v1351_v33 }
 0x455   :  { %1143 = vmatprep.subr.bf16.mxu1 %v1358_v34 }
 0x458   :  { %1144 = vmatpush3.bf16.msra.mxu1 %v1358_v34 }
 0x51e   :  { %v1123_v30 = vpop.f32.mrb[16].mxu0 }
 0x51f   :  { %v743_v7 = vpop.f32.mrb[17].mxu0 }
 0x520   :  { %v1124_v28 = vpop.f32.mrb[18].mxu0 }
 0x521   :  { %v808_v8 = vpack.c.bf16 %v1124_v28, %v1123_v30  ;;  %v746_v9 = vpop.f32.mrb[19].mxu0 }
 0x522   :  { %v807_v10 = vpack.c.bf16 %v746_v9, %v743_v7 }
 0x524   :  { %1137 = vmatprep.mubr.msk.bf16.mxu0 %vm102_vm0, %v807_v10 }
 0x525   :  { %1138 = vmatmul.mubr.msk.bf16.vlgmr.msra.gmra.mrb[20].mxu0 %vm102_vm0, %v808_v8 }
 0x526   :  { %v1131_v32 = vpop.f32.mrb[16].mxu1 }
 0x527   :  { %v792_v11 = vpop.f32.mrb[17].mxu1 }
 0x528   :  { %v1132_v12 = vpop.f32.mrb[18].mxu1 }
 0x529   :  { %v810_v31 = vpack.c.bf16 %v1132_v12, %v1131_v32  ;;  %v795_v55 = vpop.f32.mrb[19].mxu1 }
 0x52a   :  { %v809_v33 = vpack.c.bf16 %v795_v55, %v792_v11 }
 0x52c   :  { %1145 = vmatprep.mubr.msk.bf16.mxu1 %vm102_vm0, %v809_v33 }
 0x52d   :  { %1146 = vmatmul.mubr.msk.bf16.vlgmr.msra.gmra.mrb[20].mxu1 %vm102_vm0, %v810_v31 }
 0x5f8   :  { %v1139_v34 = vpop.f32.mrb[20].mxu0 }
 0x5f9   :  { %vm923_vm7 = vcmp.gt.f32.partialorder %v1139_v34, 0.0  ;;  %v851_v57 = vpop.f32.mrb[21].mxu0 }
 0x5fa   :  { %v931_v13 = vsel %vm923_vm7, 1.0, %v1192_v50  ;;  %vm921_vm8 = vcmp.gt.f32.partialorder %v851_v57, 0.0  ;;  %v1140_v61 = vpop.f32.mrb[22].mxu0 }
 0x5fb   :  { %v929_v59 = vsel %vm921_vm8, 1.0, %v1192_v50  ;;  %vm924_vm9 = vcmp.gt.f32.partialorder %v1140_v61, 0.0  ;;  %v854_v15 = vpop.f32.mrb[23].mxu0 }
 0x5fc   :  { %v932_v16 = vsel %vm924_vm9, 1.0, %v1192_v50  ;;  %vm922_vm10 = vcmp.gt.f32.partialorder %v854_v15, 0.0 }
 0x5fd   :  { %v938_v17 = vpack.c.bf16 %v932_v16, %v931_v13  ;;  %v930_v18 = vsel %vm922_vm10, 1.0, %v1192_v50 }
 0x5fe   :  { %v937_v20 = vpack.c.bf16 %v930_v18, %v929_v59 }
 0x5ff   :  { %v942_v21 = vmul.bf16 %v938_v17, %v1383_v2 }
 0x600   :  { %v941_v22 = vmul.bf16 %v937_v20, %v1381_v63  ;;  %v1147_v23 = vpop.f32.mrb[20].mxu1 }
 0x601   :  { %v947_v24 = vunpack.c.l.bf16 %v942_v21  ;;  %v948_v25 = vunpack.c.h.bf16 %v942_v21  ;;  %vm927_vm11 = vcmp.gt.f32.partialorder %v1147_v23, 0.0  ;;  %v906_v26 = vpop.f32.mrb[21].mxu1 }
 0x602   :  { %v945_v27 = vunpack.c.l.bf16 %v941_v22  ;;  %v946_v29 = vunpack.c.h.bf16 %v941_v22  ;;  %vm925_vm12 = vcmp.gt.f32.partialorder %v906_v26, 0.0  ;;  %v1148_v35 = vpop.f32.mrb[22].mxu1  ;;  %v935_v2 = vsel %vm927_vm11, 1.0, %v1192_v50 }
 0x603   :  { %955 = vst.msk [vmem:[%s1502_s4 + $0x10] sm:$0xff] %vm102_vm0, %v947_v24  ;;  %956 = vst.msk [vmem:[%s1502_s4 + $0x18] sm:$0xff] %vm102_vm0, %v948_v25  ;;  %vm928_vm13 = vcmp.gt.f32.partialorder %v1148_v35, 0.0  ;;  %v909_v63 = vpop.f32.mrb[23].mxu1  ;;  %v933_v37 = vsel %vm925_vm12, 1.0, %v1192_v50 }
 0x604   :  { %953 = vst.msk [vmem:[%s1502_s4] sm:$0xff] %vm102_vm0, %v945_v27  ;;  %954 = vst.msk [vmem:[%s1502_s4 + $0x8] sm:$0xff] %vm102_vm0, %v946_v29  ;;  %v936_v36 = vsel %vm928_vm13, 1.0, %v1192_v50  ;;  %vm926_vm14 = vcmp.gt.f32.partialorder %v909_v63, 0.0 }
 0x605   :  { %v940_v38 = vpack.c.bf16 %v936_v36, %v935_v2  ;;  %v934_v39 = vsel %vm926_vm14, 1.0, %v1192_v50 }
 0x606   :  { %v939_v40 = vpack.c.bf16 %v934_v39, %v933_v37 }
 0x607   :  { %v944_v41 = vmul.bf16 %v940_v38, %v1402_v19 }
 0x608   :  { %v943_v42 = vmul.bf16 %v939_v40, %v1398_v14 }
 0x609   :  { %v951_v43 = vunpack.c.l.bf16 %v944_v41  ;;  %v952_v0 = vunpack.c.h.bf16 %v944_v41 }
 0x60a   :  { %v949_v44 = vunpack.c.l.bf16 %v943_v42  ;;  %v950_v45 = vunpack.c.h.bf16 %v943_v42 }
 0x60b   :  { %959 = vst.msk [vmem:[%s1502_s4 + $0x30] sm:$0xff] %vm102_vm0, %v951_v43  ;;  %960 = vst.msk [vmem:[%s1502_s4 + $0x38] sm:$0xff] %vm102_vm0, %v952_v0 }
 0x60c   :  { %957 = vst.msk [vmem:[%s1502_s4 + $0x20] sm:$0xff] %vm102_vm0, %v949_v44  ;;  %958 = vst.msk [vmem:[%s1502_s4 + $0x28] sm:$0xff] %vm102_vm0, %v950_v45 }

// kernel: colorhandpose3d_forward.17
= control target key start
LH: loop header
LB: loop body
LE: loop exit
PB: predicated region body
PF: predicated region fallthrough
CT: control target
= control target key end

     0   :  { %vm214_vm0 = vcmask 1044480   ;;  %vm215_vm1 = vcmask 1045504   ;;  %v835_v3 = vmov 65535   ;;  %v836_v5 = vmov 0   ;;  %s1091_s1 = inlined_call_operand.vmem [shape: bf16[27,2048], index: 1, kind: input, shape index: {}]   ;;  %s1092_s0 = inlined_call_operand.vmem [shape: bf16[16,27], index: 0, kind: input, shape index: {}]   ;;  %s1093_s2 = inlined_call_operand.vmem [shape: f32[16,1], index: 2, kind: input, shape index: {}]   ;;  %s1094_s3 = inlined_call_operand.vmem [shape: bf16[16,2048], index: 3, kind: output, shape index: {}]  }
   0x1   :  { %v17_v0 = vld [vmem:[%s1091_s1] sm:$0xff]  ;;  %v18_v2 = vld [vmem:[%s1091_s1 + $0x8] sm:$0xff]  ;;  %v216_v4 = vsel %vm214_vm0, 4294967295, %v835_v3  ;;  %298 = vmatprep.mubr.bf16.mxu0 %v836_v5  ;;  %341 = vmatprep.mubr.bf16.mxu1 %v836_v5  ;;  %v19_v20 = vld [vmem:[%s1091_s1 + $0x10] sm:$0xff]  ;;  %vm210_vm2 = vcmask 220160  }
   0x2   :  { %v25_v1 = vld [vmem:[%s1091_s1 + $0x40] sm:$0xff]  ;;  %v26_v7 = vld [vmem:[%s1091_s1 + $0x48] sm:$0xff]  ;;  %v877_v11 = vsel %vm215_vm1, %v216_v4, 0  ;;  %833 = vset.pattern.permute.xlu0 %v836_v5  ;;  %v27_v23 = vld [vmem:[%s1091_s1 + $0x50] sm:$0xff] }
   0x3   :  { %v760_v6 = vcombine.high %v17_v0, %v25_v1  ;;  %v759_v8 = vcombine.low %v17_v0, %v25_v1  ;;  %v33_v9 = vld [vmem:[%s1091_s1 + $0x80] sm:$0xff]  ;;  %v762_v12 = vcombine.high %v18_v2, %v26_v7  ;;  %v761_v13 = vcombine.low %v18_v2, %v26_v7  ;;  %v34_v15 = vld [vmem:[%s1091_s1 + $0x88] sm:$0xff]  ;;  %v20_v24 = vld [vmem:[%s1091_s1 + $0x18] sm:$0xff] }
   0x4   :  { %v41_v10 = vld [vmem:[%s1091_s1 + $0xc0] sm:$0x33]  ;;  %v42_v16 = vld [vmem:[%s1091_s1 + $0xc8] sm:$0x33]  ;;  %v28_v25 = vld [vmem:[%s1091_s1 + $0x58] sm:$0xff]  ;;  %v764_v28 = vcombine.high %v19_v20, %v27_v23  ;;  %v763_v37 = vcombine.low %v19_v20, %v27_v23 }
   0x5   :  { %v776_v14 = vcombine.high %v33_v9, %v41_v10  ;;  %v775_v17 = vcombine.low %v33_v9, %v41_v10  ;;  %266 = vmatprep.subr.bf16.mxu0 %v760_v6  ;;  %v778_v18 = vcombine.high %v34_v15, %v42_v16  ;;  %v777_v19 = vcombine.low %v34_v15, %v42_v16  ;;  %v35_v29 = vld [vmem:[%s1091_s1 + $0x90] sm:$0xff]  ;;  %v36_v31 = vld [vmem:[%s1091_s1 + $0x98] sm:$0xff]  ;;  %v917_v35 = vld [vmem:[%s1092_s0] sm:$0xff]  }
   0x6   :  { %309 = vmatprep.subr.bf16.mxu1 %v762_v12  ;;  %267 = vmatpush1.bf16.msra.mxu0 %v759_v8  ;;  %v43_v30 = vld [vmem:[%s1091_s1 + $0xd0] sm:$0x33]  ;;  %v766_v32 = vcombine.high %v20_v24, %v28_v25  ;;  %v44_v34 = vld [vmem:[%s1091_s1 + $0xd8] sm:$0x33]  ;;  %v765_v39 = vcombine.low %v20_v24, %v28_v25  ;;  %v21_v42 = vld [vmem:[%s1091_s1 + $0x20] sm:$0xff] }
   0x7   :  { %v222_v21 = vand.u32 %v776_v14, %v877_v11  ;;  %v219_v22 = vand.u32 %v775_v17, %v877_v11  ;;  %310 = vmatpush1.bf16.msra.mxu1 %v761_v13  ;;  %v228_v26 = vand.u32 %v778_v18, %v877_v11  ;;  %v225_v27 = vand.u32 %v777_v19, %v877_v11  ;;  %v29_v43 = vld [vmem:[%s1091_s1 + $0x60] sm:$0xff]  ;;  %v22_v45 = vld [vmem:[%s1091_s1 + $0x28] sm:$0xff]  ;;  %v23_v0 = vld [vmem:[%s1091_s1 + $0x30] sm:$0xff] }
   0x8   :  { %v780_v33 = vcombine.high %v35_v29, %v43_v30  ;;  %v782_v36 = vcombine.high %v36_v31, %v44_v34  ;;  %v779_v38 = vcombine.low %v35_v29, %v43_v30  ;;  %v781_v41 = vcombine.low %v36_v31, %v44_v34  ;;  %v37_v46 = vld [vmem:[%s1091_s1 + $0xa0] sm:$0xff]  ;;  %v30_v48 = vld [vmem:[%s1091_s1 + $0x68] sm:$0xff]  ;;  %v31_v1 = vld [vmem:[%s1091_s1 + $0x70] sm:$0xff] }
   0x9   :  { %268 = vmatprep.subr.bf16.mxu0 %v222_v21  ;;  %311 = vmatprep.subr.bf16.mxu1 %v228_v26  ;;  %v45_v47 = vld [vmem:[%s1091_s1 + $0xe0] sm:$0x33]  ;;  %v38_v49 = vld [vmem:[%s1091_s1 + $0xa8] sm:$0xff]  ;;  %v768_v54 = vcombine.high %v21_v42, %v29_v43  ;;  %v770_v56 = vcombine.high %v22_v45, %v30_v48  ;;  %v767_v58 = vcombine.low %v21_v42, %v29_v43  ;;  %v24_v3 = vld [vmem:[%s1091_s1 + $0x38] sm:$0xff] }
   0xa   :  { %269 = vmatpush1.bf16.msra.mxu0 %v219_v22  ;;  %v234_v40 = vand.u32 %v780_v33, %v877_v11  ;;  %v240_v44 = vand.u32 %v782_v36, %v877_v11  ;;  %v46_v50 = vld [vmem:[%s1091_s1 + $0xe8] sm:$0x33]  ;;  %v231_v51 = vand.u32 %v779_v38, %v877_v11  ;;  %v49_v52 = vld [vmem:[%s1093_s2] sm:$0xff]  ;;  %v237_v53 = vand.u32 %v781_v41, %v877_v11  ;;  %v39_v4 = vld [vmem:[%s1091_s1 + $0xb0] sm:$0xff] }
   0xb   :  { %312 = vmatpush1.bf16.msra.mxu1 %v225_v27  ;;  %352 = vmatprep.subr.bf16.mxu0 %v764_v28  ;;  %v784_v55 = vcombine.high %v37_v46, %v45_v47  ;;  %v786_v57 = vcombine.high %v38_v49, %v46_v50  ;;  %v783_v59 = vcombine.low %v37_v46, %v45_v47  ;;  %v50_v60 = vld [vmem:[%s1093_s2 + $0x8] sm:$0xff]  ;;  %v47_v6 = vld [vmem:[%s1091_s1 + $0xf0] sm:$0x33]  ;;  %v32_v7 = vld [vmem:[%s1091_s1 + $0x78] sm:$0xff] }
   0xc   :  { %395 = vmatprep.subr.bf16.mxu1 %v766_v32  ;;  %53 = vperm.xlu0 %833, %v49_v52   ;;  %v769_v61 = vcombine.low %v22_v45, %v30_v48  ;;  %v785_v63 = vcombine.low %v38_v49, %v46_v50  ;;  %v40_v8 = vld [vmem:[%s1091_s1 + $0xb8] sm:$0xff]  ;;  %v772_v13 = vcombine.high %v23_v0, %v31_v1 }
   0xd   :  { %791 = vmatmul.mubr.msk.bf16.vlgmr.msra.gmra.mrb[0].mxu0 %vm210_vm2, %v917_v35  ;;  %v246_v62 = vand.u32 %v784_v55, %v877_v11  ;;  %v252_v2 = vand.u32 %v786_v57, %v877_v11  ;;  %v48_v9 = vld [vmem:[%s1091_s1 + $0xf8] sm:$0x33]  ;;  %v243_v10 = vand.u32 %v783_v59, %v877_v11  ;;  %v788_v14 = vcombine.high %v39_v4, %v47_v6 }
   0xe   :  { %792 = vmatmul.mubr.msk.bf16.vlgmr.msra.gmra.mrb[0].mxu1 %vm210_vm2, %v917_v35  ;;  %353 = vmatpush1.bf16.msra.mxu0 %v763_v37  ;;  %v249_v12 = vand.u32 %v785_v63, %v877_v11  ;;  %v774_v15 = vcombine.high %v24_v3, %v32_v7  ;;  %v790_v16 = vcombine.high %v40_v8, %v48_v9 }
   0xf   :  { %396 = vmatpush1.bf16.msra.mxu1 %v765_v39  ;;  %354 = vmatprep.subr.bf16.mxu0 %v234_v40  ;;  %v771_v17 = vcombine.low %v23_v0, %v31_v1  ;;  %v787_v18 = vcombine.low %v39_v4, %v47_v6  ;;  %v773_v19 = vcombine.low %v24_v3, %v32_v7 }
  0x10   :  { %397 = vmatprep.subr.bf16.mxu1 %v240_v44  ;;  %384 = vmatprep.mubr.bf16.mxu0 %v836_v5  ;;  %v258_v20 = vand.u32 %v788_v14, %v877_v11  ;;  %v789_v21 = vcombine.low %v40_v8, %v48_v9  ;;  %v264_v22 = vand.u32 %v790_v16, %v877_v11 }
  0x11   :  { %427 = vmatprep.mubr.bf16.mxu1 %v836_v5  ;;  %58 = vperm.xlu0 %833, %v50_v60   ;;  %v255_v23 = vand.u32 %v787_v18, %v877_v11 }
  0x12   :  { %355 = vmatpush1.bf16.msra.mxu0 %v231_v51  ;;  %v261_v24 = vand.u32 %v789_v21, %v877_v11 }
  0x13   :  { %398 = vmatpush1.bf16.msra.mxu1 %v237_v53  ;;  %438 = vmatprep.subr.bf16.mxu0 %v768_v54 }
  0x14   :  { %481 = vmatprep.subr.bf16.mxu1 %v770_v56 }
  0x15   :  { %793 = vmatmul.mubr.msk.bf16.vlgmr.msra.gmra.mrb[4].mxu0 %vm210_vm2, %v917_v35 }
  0x16   :  { %794 = vmatmul.mubr.msk.bf16.vlgmr.msra.gmra.mrb[4].mxu1 %vm210_vm2, %v917_v35  ;;  %439 = vmatpush1.bf16.msra.mxu0 %v767_v58 }
  0x17   :  { %482 = vmatpush1.bf16.msra.mxu1 %v769_v61  ;;  %440 = vmatprep.subr.bf16.mxu0 %v246_v62 }
  0x18   :  { %483 = vmatprep.subr.bf16.mxu1 %v252_v2  ;;  %470 = vmatprep.mubr.bf16.mxu0 %v836_v5 }
  0x19   :  { %513 = vmatprep.mubr.bf16.mxu1 %v836_v5 }
  0x1a   :  { %441 = vmatpush1.bf16.msra.mxu0 %v243_v10 }
  0x1b   :  { %484 = vmatpush1.bf16.msra.mxu1 %v249_v12  ;;  %524 = vmatprep.subr.bf16.mxu0 %v772_v13 }
  0x1c   :  { %567 = vmatprep.subr.bf16.mxu1 %v774_v15 }
  0x1d   :  { %795 = vmatmul.mubr.msk.bf16.vlgmr.msra.gmra.mrb[8].mxu0 %vm210_vm2, %v917_v35 }
  0x1e   :  { %796 = vmatmul.mubr.msk.bf16.vlgmr.msra.gmra.mrb[8].mxu1 %vm210_vm2, %v917_v35  ;;  %525 = vmatpush1.bf16.msra.mxu0 %v771_v17 }
  0x1f   :  { %568 = vmatpush1.bf16.msra.mxu1 %v773_v19  ;;  %526 = vmatprep.subr.bf16.mxu0 %v258_v20 }
  0x20   :  { %569 = vmatprep.subr.bf16.mxu1 %v264_v22  ;;  %556 = vmatprep.mubr.bf16.mxu0 %v836_v5 }
  0x21   :  { %599 = vmatprep.mubr.bf16.mxu1 %v836_v5 }
  0x22   :  { %527 = vmatpush1.bf16.msra.mxu0 %v255_v23 }
  0x23   :  { %570 = vmatpush1.bf16.msra.mxu1 %v261_v24 }
  0x25   :  { %797 = vmatmul.mubr.msk.bf16.vlgmr.msra.gmra.mrb[12].mxu0 %vm210_vm2, %v917_v35 }
  0x26   :  { %798 = vmatmul.mubr.msk.bf16.vlgmr.msra.gmra.mrb[12].mxu1 %vm210_vm2, %v917_v35 }
  0x8b   :  { %v1007_v25 = vpop.permute.xlu0 %53 }
  0x90   :  { %v1009_v27 = vpop.permute.xlu0 %58 }
  0xe0   :  { %v300_v26 = vpop.f32.mrb[0].mxu0 }
  0xe1   :  { %v301_v11 = vadd.f32 %v300_v26, %v1007_v25  ;;  %v343_v28 = vpop.f32.mrb[0].mxu1  ;;  %v302_v29 = vpop.f32.mrb[1].mxu0 }
  0xe2   :  { %v344_v30 = vadd.f32 %v343_v28, %v1007_v25  ;;  %v303_v5 = vadd.f32 %v302_v29, %v1007_v25  ;;  %v345_v31 = vpop.f32.mrb[1].mxu1  ;;  %v304_v32 = vpop.f32.mrb[2].mxu0 }
  0xe3   :  { %v610_v33 = vmax.f32 %v301_v11, 0.0  ;;  %v346_v34 = vadd.f32 %v345_v31, %v1007_v25  ;;  %v305_v35 = vadd.f32 %v304_v32, %v1009_v27  ;;  %v347_v36 = vpop.f32.mrb[2].mxu1  ;;  %v306_v37 = vpop.f32.mrb[3].mxu0 }
  0xe4   :  { %v612_v38 = vmax.f32 %v344_v30, 0.0  ;;  %v611_v39 = vmax.f32 %v303_v5, 0.0  ;;  %v348_v40 = vadd.f32 %v347_v36, %v1009_v27  ;;  %v307_v41 = vadd.f32 %v306_v37, %v1009_v27  ;;  %v349_v42 = vpop.f32.mrb[3].mxu1 }
  0xe5   :  { %v613_v43 = vmax.f32 %v346_v34, 0.0  ;;  %v626_v44 = vmax.f32 %v305_v35, 0.0  ;;  %v350_v45 = vadd.f32 %v349_v42, %v1009_v27 }
  0xe6   :  { %v815_v46 = vpack.c.bf16 %v611_v39, %v610_v33  ;;  %v628_v47 = vmax.f32 %v348_v40, 0.0  ;;  %v627_v48 = vmax.f32 %v307_v41, 0.0 }
  0xe7   :  { %v816_v49 = vpack.c.bf16 %v613_v43, %v612_v38  ;;  %v629_v50 = vmax.f32 %v350_v45, 0.0 }
  0xe8   :  { %738 = vst [vmem:[%s1094_s3] sm:$0xff] %v815_v46  ;;  %v823_v51 = vpack.c.bf16 %v627_v48, %v626_v44  ;;  %v386_v52 = vpop.f32.mrb[4].mxu0 }
  0xe9   :  { %739 = vst [vmem:[%s1094_s3 + $0x8] sm:$0xff] %v816_v49  ;;  %v824_v53 = vpack.c.bf16 %v629_v50, %v628_v47  ;;  %v387_v54 = vadd.f32 %v386_v52, %v1007_v25  ;;  %v429_v55 = vpop.f32.mrb[4].mxu1  ;;  %v388_v56 = vpop.f32.mrb[5].mxu0 }
  0xea   :  { %746 = vst [vmem:[%s1094_s3 + $0x40] sm:$0xff] %v823_v51  ;;  %v430_v57 = vadd.f32 %v429_v55, %v1007_v25  ;;  %v389_v58 = vadd.f32 %v388_v56, %v1007_v25  ;;  %v431_v59 = vpop.f32.mrb[5].mxu1  ;;  %v390_v60 = vpop.f32.mrb[6].mxu0 }
  0xeb   :  { %747 = vst [vmem:[%s1094_s3 + $0x48] sm:$0xff] %v824_v53  ;;  %v614_v61 = vmax.f32 %v387_v54, 0.0  ;;  %v432_v62 = vadd.f32 %v431_v59, %v1007_v25  ;;  %v391_v63 = vadd.f32 %v390_v60, %v1009_v27  ;;  %v433_v0 = vpop.f32.mrb[6].mxu1  ;;  %v392_v1 = vpop.f32.mrb[7].mxu0 }
  0xec   :  { %v616_v2 = vmax.f32 %v430_v57, 0.0  ;;  %v615_v3 = vmax.f32 %v389_v58, 0.0  ;;  %v434_v4 = vadd.f32 %v433_v0, %v1009_v27  ;;  %v393_v6 = vadd.f32 %v392_v1, %v1009_v27  ;;  %v435_v7 = vpop.f32.mrb[7].mxu1 }
  0xed   :  { %v617_v8 = vmax.f32 %v432_v62, 0.0  ;;  %v630_v9 = vmax.f32 %v391_v63, 0.0  ;;  %v436_v10 = vadd.f32 %v435_v7, %v1009_v27 }
  0xee   :  { %v817_v12 = vpack.c.bf16 %v615_v3, %v614_v61  ;;  %v632_v13 = vmax.f32 %v434_v4, 0.0  ;;  %v631_v14 = vmax.f32 %v393_v6, 0.0 }
  0xef   :  { %v818_v15 = vpack.c.bf16 %v617_v8, %v616_v2  ;;  %v633_v16 = vmax.f32 %v436_v10, 0.0 }
  0xf0   :  { %740 = vst [vmem:[%s1094_s3 + $0x10] sm:$0xff] %v817_v12  ;;  %v825_v17 = vpack.c.bf16 %v631_v14, %v630_v9  ;;  %v472_v18 = vpop.f32.mrb[8].mxu0 }
  0xf1   :  { %741 = vst [vmem:[%s1094_s3 + $0x18] sm:$0xff] %v818_v15  ;;  %v826_v19 = vpack.c.bf16 %v633_v16, %v632_v13  ;;  %v473_v20 = vadd.f32 %v472_v18, %v1007_v25  ;;  %v515_v21 = vpop.f32.mrb[8].mxu1  ;;  %v474_v22 = vpop.f32.mrb[9].mxu0 }
  0xf2   :  { %748 = vst [vmem:[%s1094_s3 + $0x50] sm:$0xff] %v825_v17  ;;  %v516_v23 = vadd.f32 %v515_v21, %v1007_v25  ;;  %v475_v24 = vadd.f32 %v474_v22, %v1007_v25  ;;  %v517_v26 = vpop.f32.mrb[9].mxu1  ;;  %v476_v11 = vpop.f32.mrb[10].mxu0 }
  0xf3   :  { %749 = vst [vmem:[%s1094_s3 + $0x58] sm:$0xff] %v826_v19  ;;  %v618_v28 = vmax.f32 %v473_v20, 0.0  ;;  %v518_v29 = vadd.f32 %v517_v26, %v1007_v25  ;;  %v477_v30 = vadd.f32 %v476_v11, %v1009_v27  ;;  %v519_v5 = vpop.f32.mrb[10].mxu1  ;;  %v478_v31 = vpop.f32.mrb[11].mxu0 }
  0xf4   :  { %v620_v32 = vmax.f32 %v516_v23, 0.0  ;;  %v619_v33 = vmax.f32 %v475_v24, 0.0  ;;  %v520_v34 = vadd.f32 %v519_v5, %v1009_v27  ;;  %v479_v35 = vadd.f32 %v478_v31, %v1009_v27  ;;  %v521_v36 = vpop.f32.mrb[11].mxu1 }
  0xf5   :  { %v621_v37 = vmax.f32 %v518_v29, 0.0  ;;  %v634_v38 = vmax.f32 %v477_v30, 0.0  ;;  %v522_v39 = vadd.f32 %v521_v36, %v1009_v27 }
  0xf6   :  { %v819_v40 = vpack.c.bf16 %v619_v33, %v618_v28  ;;  %v636_v41 = vmax.f32 %v520_v34, 0.0  ;;  %v635_v42 = vmax.f32 %v479_v35, 0.0 }
  0xf7   :  { %v820_v43 = vpack.c.bf16 %v621_v37, %v620_v32  ;;  %v637_v44 = vmax.f32 %v522_v39, 0.0 }
  0xf8   :  { %742 = vst [vmem:[%s1094_s3 + $0x20] sm:$0xff] %v819_v40  ;;  %v827_v45 = vpack.c.bf16 %v635_v42, %v634_v38  ;;  %v558_v46 = vpop.f32.mrb[12].mxu0 }
  0xf9   :  { %743 = vst [vmem:[%s1094_s3 + $0x28] sm:$0xff] %v820_v43  ;;  %v828_v47 = vpack.c.bf16 %v637_v44, %v636_v41  ;;  %v559_v48 = vadd.f32 %v558_v46, %v1007_v25  ;;  %v601_v49 = vpop.f32.mrb[12].mxu1  ;;  %v560_v50 = vpop.f32.mrb[13].mxu0 }
  0xfa   :  { %750 = vst [vmem:[%s1094_s3 + $0x60] sm:$0xff] %v827_v45  ;;  %v602_v51 = vadd.f32 %v601_v49, %v1007_v25  ;;  %v561_v52 = vadd.f32 %v560_v50, %v1007_v25  ;;  %v603_v53 = vpop.f32.mrb[13].mxu1  ;;  %v562_v54 = vpop.f32.mrb[14].mxu0 }
  0xfb   :  { %751 = vst [vmem:[%s1094_s3 + $0x68] sm:$0xff] %v828_v47  ;;  %v622_v55 = vmax.f32 %v559_v48, 0.0  ;;  %v604_v56 = vadd.f32 %v603_v53, %v1007_v25  ;;  %v563_v57 = vadd.f32 %v562_v54, %v1009_v27  ;;  %v605_v58 = vpop.f32.mrb[14].mxu1  ;;  %v564_v59 = vpop.f32.mrb[15].mxu0 }
  0xfc   :  { %v624_v60 = vmax.f32 %v602_v51, 0.0  ;;  %v623_v61 = vmax.f32 %v561_v52, 0.0  ;;  %v606_v62 = vadd.f32 %v605_v58, %v1009_v27  ;;  %v565_v63 = vadd.f32 %v564_v59, %v1009_v27  ;;  %v607_v0 = vpop.f32.mrb[15].mxu1 }
  0xfd   :  { %v625_v1 = vmax.f32 %v604_v56, 0.0  ;;  %v638_v2 = vmax.f32 %v563_v57, 0.0  ;;  %v608_v3 = vadd.f32 %v607_v0, %v1009_v27 }
  0xfe   :  { %v821_v4 = vpack.c.bf16 %v623_v61, %v622_v55  ;;  %v640_v6 = vmax.f32 %v606_v62, 0.0  ;;  %v639_v7 = vmax.f32 %v565_v63, 0.0 }
  0xff   :  { %v822_v8 = vpack.c.bf16 %v625_v1, %v624_v60  ;;  %v641_v25 = vmax.f32 %v608_v3, 0.0 }
 0x100   :  { %744 = vst [vmem:[%s1094_s3 + $0x30] sm:$0xff] %v821_v4  ;;  %v829_v9 = vpack.c.bf16 %v639_v7, %v638_v2 }
 0x101   :  { %745 = vst [vmem:[%s1094_s3 + $0x38] sm:$0xff] %v822_v8  ;;  %v830_v10 = vpack.c.bf16 %v641_v25, %v640_v6 }
 0x102   :  { %752 = vst [vmem:[%s1094_s3 + $0x70] sm:$0xff] %v829_v9 }
 0x103   :  { %753 = vst [vmem:[%s1094_s3 + $0x78] sm:$0xff] %v830_v10 }

// kernel: colorhandpose3d_forward.18
= control target key start
LH: loop header
LB: loop body
LE: loop exit
PB: predicated region body
PF: predicated region fallthrough
CT: control target
= control target key end

     0   :  { %v589_v1 = vmov 0   ;;  %vm277_vm0 = vcmask 130048   ;;  %s770_s1 = inlined_call_operand.vmem [shape: bf16[144,512], index: 1, kind: input, shape index: {}]   ;;  %s771_s0 = inlined_call_operand.vmem [shape: bf16[32,144], index: 0, kind: input, shape index: {}]   ;;  %s772_s2 = inlined_call_operand.vmem [shape: f32[32,1], index: 2, kind: input, shape index: {}]   ;;  %s773_s3 = inlined_call_operand.vmem [shape: bf16[32,512], index: 3, kind: output, shape index: {}]  }
   0x1   :  { %v529_v0 = vld [vmem:[%s770_s1 + $0x4] ss:$16 sps:$4 sm:$0xff]   ;;  %527 = vset.pattern.permute.xlu0 %v589_v1  ;;  %528 = vset.pattern.permute.xlu1 %v589_v1  ;;  %v531_v2 = vld [vmem:[%s770_s1 + $0xc] ss:$16 sps:$4 sm:$0xff]   ;;  %v533_v3 = vld [vmem:[%s770_s1] ss:$16 sps:$4 sm:$0xff]  }
   0x2   :  { %284 = vmatprep.subr.bf16.mxu0 %v529_v0  ;;  %v534_v4 = vld [vmem:[%s770_s1 + $0x8] ss:$16 sps:$4 sm:$0xff]   ;;  %337 = vmatprep.subr.bf16.mxu1 %v531_v2  ;;  %v535_v5 = vld [vmem:[%s770_s1 + $0x24] ss:$16 sps:$4 sm:$0xff]   ;;  %v537_v6 = vld [vmem:[%s770_s1 + $0x2c] ss:$16 sps:$4 sm:$0xff]  }
   0x3   :  { %285 = vmatpush1.bf16.msra.mxu0 %v533_v3  ;;  %338 = vmatpush1.bf16.msra.mxu1 %v534_v4  ;;  %v539_v7 = vld [vmem:[%s770_s1 + $0x20] ss:$16 sps:$4 sm:$0xff]   ;;  %v540_v8 = vld [vmem:[%s770_s1 + $0x28] ss:$16 sps:$4 sm:$0xff]   ;;  %v541_v9 = vld [vmem:[%s770_s1 + $0x44] ss:$16 sps:$4 sm:$0xff]  }
   0x4   :  { %286 = vmatprep.subr.bf16.mxu0 %v535_v5  ;;  %339 = vmatprep.subr.bf16.mxu1 %v537_v6  ;;  %v543_v10 = vld [vmem:[%s770_s1 + $0x4c] ss:$16 sps:$4 sm:$0xff]   ;;  %v545_v11 = vld [vmem:[%s770_s1 + $0x40] ss:$16 sps:$4 sm:$0xff]   ;;  %v546_v12 = vld [vmem:[%s770_s1 + $0x48] ss:$16 sps:$4 sm:$0xff]  }
   0x5   :  { %v547_v13 = vld [vmem:[%s770_s1 + $0x64] ss:$16 sps:$4 sm:$0xff]   ;;  %v549_v14 = vld [vmem:[%s770_s1 + $0x6c] ss:$16 sps:$4 sm:$0xff]   ;;  %v551_v15 = vld [vmem:[%s770_s1 + $0x60] ss:$16 sps:$4 sm:$0xff]  }
   0x6   :  { %v552_v16 = vld [vmem:[%s770_s1 + $0x68] ss:$16 sps:$4 sm:$0xff]   ;;  %v553_v17 = vld [vmem:[%s770_s1 + $0x84] ss:$16 sps:$4 sm:$0xff]   ;;  %v555_v18 = vld [vmem:[%s770_s1 + $0x8c] ss:$16 sps:$4 sm:$0xff]  }
   0x7   :  { %287 = vmatpush1.bf16.msra.mxu0 %v539_v7  ;;  %340 = vmatpush1.bf16.msra.mxu1 %v540_v8  ;;  %v557_v19 = vld [vmem:[%s770_s1 + $0x80] ss:$16 sps:$4 sm:$0xff]   ;;  %v558_v20 = vld [vmem:[%s770_s1 + $0x88] ss:$16 sps:$4 sm:$0xff]   ;;  %v559_v21 = vld [vmem:[%s770_s1 + $0xa4] ss:$16 sps:$4 sm:$0xff]  }
   0x8   :  { %288 = vmatprep.subr.bf16.mxu0 %v541_v9  ;;  %341 = vmatprep.subr.bf16.mxu1 %v543_v10  ;;  %v561_v22 = vld [vmem:[%s770_s1 + $0xac] ss:$16 sps:$4 sm:$0xff]   ;;  %v563_v23 = vld [vmem:[%s770_s1 + $0xa0] ss:$16 sps:$4 sm:$0xff]   ;;  %v564_v24 = vld [vmem:[%s770_s1 + $0xa8] ss:$16 sps:$4 sm:$0xff]  }
   0x9   :  { %v565_v25 = vld [vmem:[%s770_s1 + $0xc4] ss:$16 sps:$4 sm:$0xff]   ;;  %v567_v26 = vld [vmem:[%s770_s1 + $0xcc] ss:$16 sps:$4 sm:$0xff]   ;;  %v569_v27 = vld [vmem:[%s770_s1 + $0xc0] ss:$16 sps:$4 sm:$0xff]  }
   0xa   :  { %v570_v28 = vld [vmem:[%s770_s1 + $0xc8] ss:$16 sps:$4 sm:$0xff]   ;;  %v571_v29 = vld [vmem:[%s770_s1 + $0xe4] ss:$16 sps:$4 sm:$0xff]   ;;  %v573_v30 = vld [vmem:[%s770_s1 + $0xec] ss:$16 sps:$4 sm:$0xff]  }
   0xb   :  { %289 = vmatpush1.bf16.msra.mxu0 %v545_v11  ;;  %342 = vmatpush1.bf16.msra.mxu1 %v546_v12  ;;  %v585_v31 = vld [vmem:[%s771_s0 + $0x4] ss:$8 sps:$4 sm:$0xff]   ;;  %v57_v33 = vld [vmem:[%s772_s2 + $0x10] sm:$0xff]  ;;  %v576_v35 = vld [vmem:[%s770_s1 + $0xe8] ss:$16 sps:$4 sm:$0xff]  }
   0xc   :  { %290 = vmatprep.subr.bf16.mxu0 %v547_v13  ;;  %343 = vmatprep.subr.bf16.mxu1 %v549_v14  ;;  %v55_v32 = vld [vmem:[%s772_s2] sm:$0xff]  ;;  %v579_v37 = vld [vmem:[%s770_s1 + $0x10c] ss:$16 sps:$4 sm:$0xff]   ;;  %v582_v41 = vld [vmem:[%s770_s1 + $0x108] ss:$16 sps:$4 sm:$0xff]  }
   0xd   :  { %506 = vmatprep.mubr.msk.bf16.mxu0 %vm277_vm0, %v585_v31  ;;  %508 = vmatprep.mubr.msk.bf16.mxu1 %vm277_vm0, %v585_v31  ;;  %v575_v34 = vld [vmem:[%s770_s1 + $0xe0] ss:$16 sps:$4 sm:$0xff]   ;;  %v577_v36 = vld [vmem:[%s770_s1 + $0x104] ss:$16 sps:$4 sm:$0xff]   ;;  %v56_v38 = vld [vmem:[%s772_s2 + $0x8] sm:$0xff] }
   0xe   :  { %61 = vperm.xlu0 %527, %v55_v32   ;;  %71 = vperm.xlu1 %528, %v57_v33   ;;  %v58_v39 = vld [vmem:[%s772_s2 + $0x18] sm:$0xff]  ;;  %v581_v40 = vld [vmem:[%s770_s1 + $0x100] ss:$16 sps:$4 sm:$0xff]  }
   0xf   :  { %291 = vmatpush1.bf16.msra.mxu0 %v551_v15  ;;  %344 = vmatpush1.bf16.msra.mxu1 %v552_v16  ;;  %v583_v42 = vld [vmem:[%s771_s0] ss:$8 sps:$4 sm:$0xff]   ;;  %v586_v43 = vld [vmem:[%s771_s0 + $0x14] ss:$8 sps:$4 sm:$0xff]   ;;  %v588_v44 = vld [vmem:[%s771_s0 + $0x10] ss:$8 sps:$4 sm:$0xff]  }
  0x10   :  { %292 = vmatprep.subr.bf16.mxu0 %v553_v17  ;;  %345 = vmatprep.subr.bf16.mxu1 %v555_v18 }
  0x12   :  { %66 = vperm.xlu0 %527, %v56_v38   ;;  %76 = vperm.xlu1 %528, %v58_v39  }
  0x13   :  { %293 = vmatpush1.bf16.msra.mxu0 %v557_v19  ;;  %346 = vmatpush1.bf16.msra.mxu1 %v558_v20 }
  0x14   :  { %294 = vmatprep.subr.bf16.mxu0 %v559_v21  ;;  %347 = vmatprep.subr.bf16.mxu1 %v561_v22 }
  0x17   :  { %295 = vmatpush1.bf16.msra.mxu0 %v563_v23  ;;  %348 = vmatpush1.bf16.msra.mxu1 %v564_v24 }
  0x18   :  { %296 = vmatprep.subr.bf16.mxu0 %v565_v25  ;;  %349 = vmatprep.subr.bf16.mxu1 %v567_v26 }
  0x1b   :  { %297 = vmatpush1.bf16.msra.mxu0 %v569_v27  ;;  %350 = vmatpush1.bf16.msra.mxu1 %v570_v28 }
  0x1c   :  { %298 = vmatprep.subr.bf16.mxu0 %v571_v29  ;;  %351 = vmatprep.subr.bf16.mxu1 %v573_v30 }
  0x1f   :  { %299 = vmatpush1.bf16.msra.mxu0 %v575_v34  ;;  %352 = vmatpush1.bf16.msra.mxu1 %v576_v35 }
  0x20   :  { %300 = vmatprep.subr.bf16.mxu0 %v577_v36  ;;  %353 = vmatprep.subr.bf16.mxu1 %v579_v37 }
  0x23   :  { %301 = vmatpush1.bf16.msra.mxu0 %v581_v40  ;;  %354 = vmatpush1.bf16.msra.mxu1 %v582_v41 }
  0x26   :  { %317 = vmatmul.mubr.bf16.vlgmr.msra.gmra.mrb[0].mxu0 %v583_v42  ;;  %370 = vmatmul.mubr.bf16.vlgmr.msra.gmra.mrb[0].mxu1 %v583_v42 }
  0x27   :  { %507 = vmatprep.mubr.msk.bf16.mxu0 %vm277_vm0, %v586_v43  ;;  %509 = vmatprep.mubr.msk.bf16.mxu1 %vm277_vm0, %v586_v43 }
  0x2e   :  { %327 = vmatmul.mubr.bf16.gmra.mrb[4].mxu0 %v588_v44  ;;  %380 = vmatmul.mubr.bf16.gmra.mrb[4].mxu1 %v588_v44 }
  0x8d   :  { %v62_v45 = vpop.permute.xlu0 %61  ;;  %v72_v47 = vpop.permute.xlu1 %71 }
  0x91   :  { %v67_v46 = vpop.permute.xlu0 %66  ;;  %v77_v10 = vpop.permute.xlu1 %76 }
  0xf9   :  { %v318_v48 = vpop.f32.mrb[0].mxu0  ;;  %v371_v49 = vpop.f32.mrb[0].mxu1 }
  0xfa   :  { %v319_v50 = vadd.f32 %v318_v48, %v62_v45  ;;  %v372_v51 = vadd.f32 %v371_v49, %v62_v45  ;;  %v320_v52 = vpop.f32.mrb[1].mxu0  ;;  %v373_v53 = vpop.f32.mrb[1].mxu1 }
  0xfb   :  { %v321_v54 = vadd.f32 %v320_v52, %v62_v45  ;;  %v374_v55 = vadd.f32 %v373_v53, %v62_v45  ;;  %v322_v56 = vpop.f32.mrb[2].mxu0  ;;  %v375_v57 = vpop.f32.mrb[2].mxu1 }
  0xfc   :  { %v390_v58 = vmax.f32 %v319_v50, 0.0  ;;  %v392_v59 = vmax.f32 %v372_v51, 0.0  ;;  %v323_v60 = vadd.f32 %v322_v56, %v67_v46  ;;  %v376_v61 = vadd.f32 %v375_v57, %v67_v46  ;;  %v324_v62 = vpop.f32.mrb[3].mxu0  ;;  %v377_v63 = vpop.f32.mrb[3].mxu1 }
  0xfd   :  { %v391_v0 = vmax.f32 %v321_v54, 0.0  ;;  %v393_v1 = vmax.f32 %v374_v55, 0.0  ;;  %v325_v2 = vadd.f32 %v324_v62, %v67_v46  ;;  %v378_v3 = vadd.f32 %v377_v63, %v67_v46 }
  0xfe   :  { %v394_v4 = vmax.f32 %v323_v60, 0.0  ;;  %v396_v5 = vmax.f32 %v376_v61, 0.0 }
  0xff   :  { %v518_v6 = vpack.c.bf16 %v391_v0, %v390_v58  ;;  %v519_v7 = vpack.c.bf16 %v393_v1, %v392_v59  ;;  %v395_v8 = vmax.f32 %v325_v2, 0.0  ;;  %v397_v9 = vmax.f32 %v378_v3, 0.0 }
 0x101   :  { %454 = vst [vmem:[%s773_s3] sm:$0xff] %v518_v6  ;;  %455 = vst [vmem:[%s773_s3 + $0x8] sm:$0xff] %v519_v7  ;;  %v520_v11 = vpack.c.bf16 %v395_v8, %v394_v4  ;;  %v521_v12 = vpack.c.bf16 %v397_v9, %v396_v5  ;;  %v328_v13 = vpop.f32.mrb[4].mxu0  ;;  %v381_v14 = vpop.f32.mrb[4].mxu1 }
 0x102   :  { %v329_v15 = vadd.f32 %v328_v13, %v72_v47  ;;  %v382_v16 = vadd.f32 %v381_v14, %v72_v47  ;;  %v330_v17 = vpop.f32.mrb[5].mxu0  ;;  %v383_v18 = vpop.f32.mrb[5].mxu1 }
 0x103   :  { %456 = vst [vmem:[%s773_s3 + $0x10] sm:$0xff] %v520_v11  ;;  %457 = vst [vmem:[%s773_s3 + $0x18] sm:$0xff] %v521_v12  ;;  %v331_v19 = vadd.f32 %v330_v17, %v72_v47  ;;  %v384_v20 = vadd.f32 %v383_v18, %v72_v47  ;;  %v332_v21 = vpop.f32.mrb[6].mxu0  ;;  %v385_v22 = vpop.f32.mrb[6].mxu1 }
 0x104   :  { %v398_v23 = vmax.f32 %v329_v15, 0.0  ;;  %v400_v24 = vmax.f32 %v382_v16, 0.0  ;;  %v333_v25 = vadd.f32 %v332_v21, %v77_v10  ;;  %v386_v26 = vadd.f32 %v385_v22, %v77_v10  ;;  %v334_v27 = vpop.f32.mrb[7].mxu0  ;;  %v387_v28 = vpop.f32.mrb[7].mxu1 }
 0x105   :  { %v399_v29 = vmax.f32 %v331_v19, 0.0  ;;  %v401_v30 = vmax.f32 %v384_v20, 0.0  ;;  %v335_v31 = vadd.f32 %v334_v27, %v77_v10  ;;  %v388_v32 = vadd.f32 %v387_v28, %v77_v10 }
 0x106   :  { %v402_v33 = vmax.f32 %v333_v25, 0.0  ;;  %v404_v34 = vmax.f32 %v386_v26, 0.0 }
 0x107   :  { %v522_v35 = vpack.c.bf16 %v399_v29, %v398_v23  ;;  %v523_v36 = vpack.c.bf16 %v401_v30, %v400_v24  ;;  %v403_v37 = vmax.f32 %v335_v31, 0.0  ;;  %v405_v38 = vmax.f32 %v388_v32, 0.0 }
 0x109   :  { %458 = vst [vmem:[%s773_s3 + $0x20] sm:$0xff] %v522_v35  ;;  %459 = vst [vmem:[%s773_s3 + $0x28] sm:$0xff] %v523_v36  ;;  %v524_v39 = vpack.c.bf16 %v403_v37, %v402_v33  ;;  %v525_v40 = vpack.c.bf16 %v405_v38, %v404_v34 }
 0x10b   :  { %460 = vst [vmem:[%s773_s3 + $0x30] sm:$0xff] %v524_v39  ;;  %461 = vst [vmem:[%s773_s3 + $0x38] sm:$0xff] %v525_v40 }

// kernel: colorhandpose3d_forward.19
= control target key start
LH: loop header
LB: loop body
LE: loop exit
PB: predicated region body
PF: predicated region fallthrough
CT: control target
= control target key end

     0   :  { %v441_v1 = vmov 0   ;;  %vm208_vm0 = vcmask 261120   ;;  %vm326_vm1 = vcmask 1042432   ;;  %vm327_vm2 = vsmask.f32 2304  ;;  %s551_s1 = inlined_call_operand.vmem [shape: bf16[288,128], index: 1, kind: input, shape index: {}]   ;;  %s552_s0 = inlined_call_operand.vmem [shape: bf16[21,288], index: 0, kind: input, shape index: {}]   ;;  %s553_s2 = inlined_call_operand.vmem [shape: f32[21,1], index: 2, kind: input, shape index: {}]   ;;  %s554_s3 = inlined_call_operand.vmem [shape: bf16[21,128], index: 3, kind: output, shape index: {}]  }
   0x1   :  { %v416_v0 = vld [vmem:[%s551_s1 + $0x40] sm:$0xff]   ;;  %414 = vset.pattern.permute.xlu0 %v441_v1  ;;  %415 = vset.pattern.permute.xlu1 %v441_v1  ;;  %v418_v3 = vld [vmem:[%s551_s1 + $0x48] sm:$0xff]   ;;  %v420_v5 = vld [vmem:[%s551_s1 + $0x50] sm:$0xff]  }
   0x2   :  { %v417_v2 = vld [vmem:[%s551_s1] sm:$0xff]   ;;  %373 = vmatprep.subr.bf16.mxu0 %v416_v0  ;;  %v419_v4 = vld [vmem:[%s551_s1 + $0x8] sm:$0xff]   ;;  %v421_v6 = vld [vmem:[%s551_s1 + $0x10] sm:$0xff]  }
   0x3   :  { %374 = vmatpush3.bf16.msra.mxu0 %v417_v2  ;;  %v422_v7 = vld [vmem:[%s551_s1 + $0x58] sm:$0xff]   ;;  %v424_v9 = vld [vmem:[%s551_s1 + $0x60] sm:$0xff]   ;;  %v426_v12 = vld [vmem:[%s551_s1 + $0x68] sm:$0xff]  }
   0x4   :  { %375 = vmatprep.subr.bf16.mxu0 %v418_v3  ;;  %v423_v8 = vld [vmem:[%s551_s1 + $0x18] sm:$0xff]   ;;  %v425_v10 = vld [vmem:[%s551_s1 + $0x20] sm:$0xff]   ;;  %v427_v13 = vld [vmem:[%s551_s1 + $0x28] sm:$0xff]  }
   0x5   :  { %v431_v11 = vld [vmem:[%s551_s1 + $0x80] sm:$0xff]   ;;  %v436_v15 = vld [vmem:[%s551_s1 + $0x88] sm:$0xff]   ;;  %v428_v16 = vld [vmem:[%s551_s1 + $0x70] sm:$0xff]  }
   0x6   :  { %405 = vmatprep.subr.bf16.mxu1 %v431_v11  ;;  %v435_v14 = vld [vmem:[%s552_s0 + $0x4] ss:$12 sps:$4 sm:$0xff]   ;;  %v437_v17 = vld [vmem:[%s552_s0 + $0x8] ss:$12 sps:$4 sm:$0xff]   ;;  %v430_v22 = vld [vmem:[%s551_s1 + $0x78] sm:$0xff]  }
   0x7   :  { %376 = vmatpush3.bf16.msra.mxu0 %v419_v4  ;;  %406 = vmatpush3.bf16.msra.mxu1 %v431_v11  ;;  %v438_v18 = vld [vmem:[%s552_s0 + $0x20] ss:$0 sps:$4 sm:$0x77]   ;;  %v59_v19 = vld [vmem:[%s553_s2 + $0x10] sm:$0x1f]  ;;  %v58_v20 = vld [vmem:[%s553_s2 + $0x8] sm:$0xff] }
   0x8   :  { %377 = vmatprep.subr.bf16.mxu0 %v420_v5  ;;  %247 = vmatprep.mubr.bf16.mxu0 %v435_v14  ;;  %v429_v21 = vld [vmem:[%s551_s1 + $0x30] sm:$0xff]   ;;  %v57_v23 = vld [vmem:[%s553_s2] sm:$0xff]  ;;  %v432_v24 = vld [vmem:[%s551_s1 + $0x38] sm:$0xff]  }
   0x9   :  { %407 = vmatprep.subr.bf16.mxu1 %v436_v15  ;;  %409 = vmatprep.mubr.msk.bf16.mxu1 %vm208_vm0, %v437_v17  ;;  %v19_v25 = vld [vmem:[%s552_s0 + $0x18] sm:$0x77]  ;;  %v433_v26 = vld [vmem:[%s552_s0] ss:$12 sps:$4 sm:$0xff]   ;;  %v329_v54 = vld [vmem:[%s554_s3 + $0x8] sm:$0x7] }
   0xa   :  { %72 = vperm.xlu0 %414, %v59_v19   ;;  %67 = vperm.xlu1 %415, %v58_v20   ;;  %v340_v27 = vcombine.high %v19_v25, %v19_v25  ;;  %v339_v28 = vcombine.low %v19_v25, %v19_v25  ;;  %vm328_vm3 = vmand %vm326_vm1, %vm327_vm2 }
   0xb   :  { %378 = vmatpush3.bf16.msra.mxu0 %v421_v6  ;;  %408 = vmatpush3.bf16.msra.mxu1 %v436_v15 }
   0xc   :  { %379 = vmatprep.subr.bf16.mxu0 %v422_v7 }
   0xe   :  { %410 = vmatmul.mubr.msk.bf16.vlgmr.msra.gmra.mrb[0].mxu1 %vm208_vm0, %v438_v18  ;;  %62 = vperm.xlu0 %414, %v57_v23  }
   0xf   :  { %380 = vmatpush3.bf16.msra.mxu0 %v423_v8 }
  0x10   :  { %381 = vmatprep.subr.bf16.mxu0 %v424_v9 }
  0x13   :  { %382 = vmatpush3.bf16.msra.mxu0 %v425_v10 }
  0x14   :  { %383 = vmatprep.subr.bf16.mxu0 %v426_v12 }
  0x17   :  { %384 = vmatpush3.bf16.msra.mxu0 %v427_v13 }
  0x18   :  { %385 = vmatprep.subr.bf16.mxu0 %v428_v16 }
  0x1b   :  { %386 = vmatpush3.bf16.msra.mxu0 %v429_v21 }
  0x1c   :  { %387 = vmatprep.subr.bf16.mxu0 %v430_v22 }
  0x1f   :  { %388 = vmatpush3.bf16.msra.mxu0 %v432_v24 }
  0x22   :  { %248 = vmatmul.mubr.bf16.vlgmr.msra.gmra.mrb[0].mxu0 %v433_v26 }
  0x23   :  { %255 = vmatprep.mubr.bf16.mxu0 %v340_v27 }
  0x2a   :  { %256 = vmatmul.mubr.bf16.gmra.mrb[4].mxu0 %v339_v28 }
  0x89   :  { %v73_v33 = vpop.permute.xlu0 %72  ;;  %v68_v40 = vpop.permute.xlu1 %67 }
  0x8d   :  { %v63_v36 = vpop.permute.xlu0 %62 }
  0xe1   :  { %v411_v29 = vpop.f32.mrb[0].mxu1 }
  0xe2   :  { %v297_v30 = vpop.f32.mrb[1].mxu1 }
  0xe3   :  { %v412_v31 = vpop.f32.mrb[2].mxu1 }
  0xe4   :  { %v300_v32 = vpop.f32.mrb[3].mxu1 }
  0xf5   :  { %v389_v34 = vpop.f32.mrb[0].mxu0 }
  0xf6   :  { %v390_v35 = vpop.f32.mrb[1].mxu0 }
  0xf7   :  { %v391_v37 = vadd.f32 %v390_v35, %v389_v34  ;;  %v392_v38 = vpop.f32.mrb[2].mxu0 }
  0xf8   :  { %v393_v39 = vpop.f32.mrb[3].mxu0 }
  0xf9   :  { %v250_v41 = vadd.f32 %v391_v37, %v63_v36  ;;  %v394_v42 = vadd.f32 %v393_v39, %v392_v38 }
  0xfb   :  { %v253_v43 = vadd.f32 %v394_v42, %v68_v40  ;;  %v298_v44 = vadd.f32 %v297_v30, %v250_v41 }
  0xfd   :  { %v301_v45 = vadd.f32 %v300_v32, %v253_v43  ;;  %v395_v46 = vpop.f32.mrb[4].mxu0 }
  0xfe   :  { %v396_v47 = vpop.f32.mrb[5].mxu0 }
  0xff   :  { %v371_v48 = vpack.c.bf16 %v301_v45, %v298_v44  ;;  %v397_v49 = vadd.f32 %v396_v47, %v395_v46  ;;  %v398_v50 = vpop.f32.mrb[6].mxu0 }
 0x100   :  { %v399_v51 = vpop.f32.mrb[7].mxu0 }
 0x101   :  { %372 = vst [vmem:[%s554_s3] sm:$0xff] %v371_v48   ;;  %v258_v52 = vadd.f32 %v397_v49, %v73_v33 }
 0x103   :  { %v306_v53 = vadd.f32 %v411_v29, %v258_v52 }
 0x105   :  { %v367_v55 = vpack.c.bf16 %v306_v53, %v306_v53 }
 0x107   :  { %v330_v56 = vsel %vm328_vm3, %v367_v55, %v329_v54 }
 0x108   :  { %331 = vst [vmem:[%s554_s3 + $0x8] sm:$0x7] %v330_v56 }

// kernel: colorhandpose3d_forward.20
= control target key start
LH: loop header
LB: loop body
LE: loop exit
PB: predicated region body
PF: predicated region fallthrough
CT: control target
= control target key end

     0   :  { %v454_v0 = vmov 0   ;;  %vm202_vm0 = vcmask 498688   ;;  %vm215_vm1 = vcmask 1045504   ;;  %vm216_vm2 = vcmask 1046528   ;;  %s602_s1 = inlined_call_operand.vmem [shape: bf16[189,128], index: 1, kind: input, shape index: {}]   ;;  %s603_s0 = inlined_call_operand.vmem [shape: bf16[64,189], index: 0, kind: input, shape index: {}]   ;;  %s604_s2 = inlined_call_operand.vmem [shape: f32[64,1], index: 2, kind: input, shape index: {}]   ;;  %s605_s3 = inlined_call_operand.vmem [shape: bf16[64,128], index: 3, kind: output, shape index: {}]  }
   0x1   :  { %222 = vmatprep.subr.bf16.mxu0 %v454_v0  ;;  %402 = vmatprep.subr.bf16.mxu1 %v454_v0  ;;  %v430_v1 = vld [vmem:[%s602_s1] sm:$0xff]   ;;  %v431_v2 = vld [vmem:[%s602_s1 + $0x8] sm:$0xff]   ;;  %v432_v3 = vld [vmem:[%s602_s1 + $0x10] sm:$0xff]   ;;  %v455_v21 = vmov 65535  }
   0x2   :  { %429 = vset.pattern.permute.xlu1 %v454_v0  ;;  %428 = vset.pattern.permute.xlu0 %v454_v0  ;;  %v433_v4 = vld [vmem:[%s602_s1 + $0x18] sm:$0xff]   ;;  %v444_v5 = vld [vmem:[%s603_s0 + $0x4] ss:$8 sps:$4 sm:$0xff]   ;;  %v49_v8 = vld [vmem:[%s604_s2 + $0x10] sm:$0xff]  ;;  %v217_v22 = vsel %vm215_vm1, 4294967295, %v455_v21 }
   0x3   :  { %223 = vmatpush1.bf16.msra.mxu0 %v430_v1  ;;  %414 = vmatpush1.bf16.msra.mxu1 %v430_v1  ;;  %v434_v6 = vld [vmem:[%s602_s1 + $0x20] sm:$0xff]   ;;  %v435_v10 = vld [vmem:[%s602_s1 + $0x28] sm:$0xff]   ;;  %v50_v11 = vld [vmem:[%s604_s2 + $0x18] sm:$0xff]  ;;  %v218_v25 = vsel %vm216_vm2, %v217_v22, 0 }
   0x4   :  { %224 = vmatprep.subr.bf16.mxu0 %v454_v0  ;;  %403 = vmatprep.subr.bf16.mxu1 %v454_v0  ;;  %v447_v7 = vld [vmem:[%s603_s0 + $0x24] ss:$8 sps:$4 sm:$0xff]   ;;  %v436_v13 = vld [vmem:[%s602_s1 + $0x30] sm:$0xff]   ;;  %v437_v16 = vld [vmem:[%s602_s1 + $0x38] sm:$0xff]  }
   0x5   :  { %359 = vmatprep.mubr.msk.bf16.mxu0 %vm202_vm0, %v444_v5  ;;  %361 = vmatprep.mubr.msk.bf16.mxu1 %vm202_vm0, %v447_v7  ;;  %v47_v9 = vld [vmem:[%s604_s2] sm:$0xff]  ;;  %v48_v12 = vld [vmem:[%s604_s2 + $0x8] sm:$0xff]  ;;  %v54_v17 = vld [vmem:[%s604_s2 + $0x38] sm:$0xff] }
   0x6   :  { %67 = vperm.xlu1 %429, %v49_v8   ;;  %57 = vperm.xlu0 %428, %v47_v9   ;;  %v52_v14 = vld [vmem:[%s604_s2 + $0x28] sm:$0xff]  ;;  %v51_v15 = vld [vmem:[%s604_s2 + $0x20] sm:$0xff]  ;;  %v53_v18 = vld [vmem:[%s604_s2 + $0x30] sm:$0xff] }
   0x7   :  { %225 = vmatpush1.bf16.msra.mxu0 %v431_v2  ;;  %415 = vmatpush1.bf16.msra.mxu1 %v431_v2  ;;  %v438_v19 = vld [vmem:[%s602_s1 + $0x40] sm:$0xff]   ;;  %v439_v20 = vld [vmem:[%s602_s1 + $0x48] sm:$0xff]   ;;  %v440_v23 = vld [vmem:[%s602_s1 + $0x50] sm:$0xff]  }
   0x8   :  { %226 = vmatprep.subr.bf16.mxu0 %v454_v0  ;;  %404 = vmatprep.subr.bf16.mxu1 %v454_v0  ;;  %v441_v24 = vld [vmem:[%s602_s1 + $0x58] sm:$0x7f]   ;;  %v442_v27 = vld [vmem:[%s603_s0] ss:$8 sps:$4 sm:$0xff]  }
   0x9   :  { %v220_v26 = vand.u32 %v441_v24, %v218_v25  ;;  %v445_v28 = vld [vmem:[%s603_s0 + $0x20] ss:$8 sps:$4 sm:$0xff]   ;;  %v448_v29 = vld [vmem:[%s603_s0 + $0x14] ss:$8 sps:$4 sm:$0xff]   ;;  %v452_v31 = vld [vmem:[%s603_s0 + $0x10] ss:$8 sps:$4 sm:$0xff]  }
   0xa   :  { %72 = vperm.xlu1 %429, %v50_v11   ;;  %62 = vperm.xlu0 %428, %v48_v12   ;;  %v450_v30 = vld [vmem:[%s603_s0 + $0x34] ss:$8 sps:$4 sm:$0xff]   ;;  %v453_v32 = vld [vmem:[%s603_s0 + $0x30] ss:$8 sps:$4 sm:$0xff]  }
   0xb   :  { %227 = vmatpush1.bf16.msra.mxu0 %v432_v3  ;;  %416 = vmatpush1.bf16.msra.mxu1 %v432_v3 }
   0xc   :  { %228 = vmatprep.subr.bf16.mxu0 %v454_v0  ;;  %405 = vmatprep.subr.bf16.mxu1 %v454_v0 }
   0xe   :  { %82 = vperm.xlu1 %429, %v52_v14   ;;  %77 = vperm.xlu0 %428, %v51_v15  }
   0xf   :  { %229 = vmatpush1.bf16.msra.mxu0 %v433_v4  ;;  %417 = vmatpush1.bf16.msra.mxu1 %v433_v4 }
  0x10   :  { %230 = vmatprep.subr.bf16.mxu0 %v454_v0  ;;  %406 = vmatprep.subr.bf16.mxu1 %v454_v0 }
  0x12   :  { %92 = vperm.xlu1 %429, %v54_v17   ;;  %87 = vperm.xlu0 %428, %v53_v18  }
  0x13   :  { %231 = vmatpush1.bf16.msra.mxu0 %v434_v6  ;;  %418 = vmatpush1.bf16.msra.mxu1 %v434_v6 }
  0x14   :  { %232 = vmatprep.subr.bf16.mxu0 %v454_v0  ;;  %407 = vmatprep.subr.bf16.mxu1 %v454_v0 }
  0x17   :  { %233 = vmatpush1.bf16.msra.mxu0 %v435_v10  ;;  %419 = vmatpush1.bf16.msra.mxu1 %v435_v10 }
  0x18   :  { %234 = vmatprep.subr.bf16.mxu0 %v454_v0  ;;  %408 = vmatprep.subr.bf16.mxu1 %v454_v0 }
  0x1b   :  { %235 = vmatpush1.bf16.msra.mxu0 %v436_v13  ;;  %420 = vmatpush1.bf16.msra.mxu1 %v436_v13 }
  0x1c   :  { %236 = vmatprep.subr.bf16.mxu0 %v454_v0  ;;  %409 = vmatprep.subr.bf16.mxu1 %v454_v0 }
  0x1f   :  { %237 = vmatpush1.bf16.msra.mxu0 %v437_v16  ;;  %421 = vmatpush1.bf16.msra.mxu1 %v437_v16 }
  0x20   :  { %238 = vmatprep.subr.bf16.mxu0 %v454_v0  ;;  %410 = vmatprep.subr.bf16.mxu1 %v454_v0 }
  0x23   :  { %239 = vmatpush1.bf16.msra.mxu0 %v438_v19  ;;  %422 = vmatpush1.bf16.msra.mxu1 %v438_v19 }
  0x24   :  { %240 = vmatprep.subr.bf16.mxu0 %v454_v0  ;;  %411 = vmatprep.subr.bf16.mxu1 %v454_v0 }
  0x27   :  { %241 = vmatpush1.bf16.msra.mxu0 %v439_v20  ;;  %423 = vmatpush1.bf16.msra.mxu1 %v439_v20 }
  0x28   :  { %242 = vmatprep.subr.bf16.mxu0 %v454_v0  ;;  %412 = vmatprep.subr.bf16.mxu1 %v454_v0 }
  0x2b   :  { %243 = vmatpush1.bf16.msra.mxu0 %v440_v23  ;;  %424 = vmatpush1.bf16.msra.mxu1 %v440_v23 }
  0x2c   :  { %244 = vmatprep.subr.bf16.mxu0 %v454_v0  ;;  %413 = vmatprep.subr.bf16.mxu1 %v454_v0 }
  0x2f   :  { %245 = vmatpush1.bf16.msra.mxu0 %v220_v26  ;;  %425 = vmatpush1.bf16.msra.mxu1 %v220_v26 }
  0x32   :  { %255 = vmatmul.mubr.bf16.vlgmr.msra.gmra.mrb[0].mxu0 %v442_v27  ;;  %271 = vmatmul.mubr.bf16.vlgmr.msra.gmra.mrb[0].mxu1 %v445_v28 }
  0x33   :  { %360 = vmatprep.mubr.msk.bf16.mxu0 %vm202_vm0, %v448_v29  ;;  %362 = vmatprep.mubr.msk.bf16.mxu1 %vm202_vm0, %v450_v30 }
  0x3a   :  { %263 = vmatmul.mubr.bf16.gmra.mrb[4].mxu0 %v452_v31  ;;  %279 = vmatmul.mubr.bf16.gmra.mrb[4].mxu1 %v453_v32 }
  0x85   :  { %v68_v33 = vpop.permute.xlu1 %67  ;;  %v58_v34 = vpop.permute.xlu0 %57 }
  0x89   :  { %v73_v35 = vpop.permute.xlu1 %72  ;;  %v63_v36 = vpop.permute.xlu0 %62 }
  0x8d   :  { %v83_v37 = vpop.permute.xlu1 %82  ;;  %v78_v38 = vpop.permute.xlu0 %77 }
  0x91   :  { %v93_v55 = vpop.permute.xlu1 %92  ;;  %v88_v56 = vpop.permute.xlu0 %87 }
 0x105   :  { %v256_v39 = vpop.f32.mrb[0].mxu0  ;;  %v272_v40 = vpop.f32.mrb[0].mxu1 }
 0x106   :  { %v257_v41 = vadd.f32 %v256_v39, %v58_v34  ;;  %v273_v42 = vadd.f32 %v272_v40, %v78_v38  ;;  %v258_v43 = vpop.f32.mrb[1].mxu0  ;;  %v274_v44 = vpop.f32.mrb[1].mxu1 }
 0x107   :  { %v259_v45 = vpop.f32.mrb[2].mxu0  ;;  %v275_v46 = vpop.f32.mrb[2].mxu1 }
 0x108   :  { %v260_v47 = vadd.f32 %v259_v45, %v63_v36  ;;  %v276_v48 = vadd.f32 %v275_v46, %v83_v37  ;;  %v261_v49 = vpop.f32.mrb[3].mxu0  ;;  %v277_v50 = vpop.f32.mrb[3].mxu1  ;;  %v287_v51 = vmax.f32 %v257_v41, 0.0  ;;  %v291_v52 = vmax.f32 %v273_v42, 0.0 }
 0x10a   :  { %v288_v53 = vmax.f32 %v260_v47, 0.0  ;;  %v292_v54 = vmax.f32 %v276_v48, 0.0 }
 0x10c   :  { %v382_v57 = vpack.c.bf16 %v288_v53, %v287_v51  ;;  %v392_v58 = vpack.c.bf16 %v292_v54, %v291_v52 }
 0x10d   :  { %v264_v59 = vpop.f32.mrb[4].mxu0  ;;  %v280_v60 = vpop.f32.mrb[4].mxu1 }
 0x10e   :  { %383 = vst [vmem:[%s605_s3] sm:$0xff] %v382_v57   ;;  %400 = vst [vmem:[%s605_s3 + $0x10] sm:$0xff] %v392_v58   ;;  %v265_v61 = vadd.f32 %v264_v59, %v68_v33  ;;  %v281_v62 = vadd.f32 %v280_v60, %v88_v56  ;;  %v266_v63 = vpop.f32.mrb[5].mxu0  ;;  %v282_v0 = vpop.f32.mrb[5].mxu1 }
 0x10f   :  { %v267_v1 = vpop.f32.mrb[6].mxu0  ;;  %v283_v2 = vpop.f32.mrb[6].mxu1 }
 0x110   :  { %v268_v3 = vadd.f32 %v267_v1, %v73_v35  ;;  %v284_v4 = vadd.f32 %v283_v2, %v93_v55  ;;  %v269_v5 = vpop.f32.mrb[7].mxu0  ;;  %v285_v6 = vpop.f32.mrb[7].mxu1  ;;  %v289_v7 = vmax.f32 %v265_v61, 0.0  ;;  %v293_v8 = vmax.f32 %v281_v62, 0.0 }
 0x112   :  { %v290_v9 = vmax.f32 %v268_v3, 0.0  ;;  %v294_v10 = vmax.f32 %v284_v4, 0.0 }
 0x114   :  { %v387_v11 = vpack.c.bf16 %v290_v9, %v289_v7  ;;  %v397_v12 = vpack.c.bf16 %v294_v10, %v293_v8 }
 0x116   :  { %399 = vst [vmem:[%s605_s3 + $0x8] sm:$0xff] %v387_v11   ;;  %401 = vst [vmem:[%s605_s3 + $0x18] sm:$0xff] %v397_v12  }

// kernel: colorhandpose3d_forward.22
= control target key start
LH: loop header
LB: loop body
LE: loop exit
PB: predicated region body
PF: predicated region fallthrough
CT: control target
= control target key end

     0   :  { %v181_v0 = vmov 0.0   ;;  %vm182_vm0 = vmmov 0   ;;  %vm127_vm1 = vcmask 539648   ;;  %s236_s1 = inlined_call_operand.vmem [shape: bf16[128,66], index: 1, kind: input, shape index: {}]   ;;  %s237_s0 = inlined_call_operand.vmem [shape: bf16[8,128], index: 0, kind: input, shape index: {}]   ;;  %s238_s2 = inlined_call_operand.vmem [shape: f32[1,66], index: 2, kind: input, shape index: {}]   ;;  %s239_s3 = inlined_call_operand.vmem [shape: f32[8,66], index: 3, kind: output, shape index: {}]  }
   0x1   :  { %151 = vmatprep.subr.bf16.mxu0 %v181_v0  ;;  %v173_v1 = vld [vmem:[%s236_s1] sm:$0xff]   ;;  %167 = vmatprep.mubr.msk.bf16.mxu0 %vm182_vm0, %v181_v0  ;;  %v174_v2 = vld [vmem:[%s236_s1 + $0x8] sm:$0xff]   ;;  %v175_v3 = vld [vmem:[%s236_s1 + $0x10] sm:$0xff]  }
   0x2   :  { %152 = vmatpush3.bf16.msra.mxu0 %v173_v1  ;;  %v176_v4 = vld [vmem:[%s236_s1 + $0x18] sm:$0xff]   ;;  %v177_v5 = vld [vmem:[%s236_s1 + $0x20] sm:$0xff]   ;;  %v178_v6 = vld [vmem:[%s236_s1 + $0x28] sm:$0xff]  }
   0x3   :  { %153 = vmatprep.subr.bf16.mxu0 %v181_v0  ;;  %v179_v7 = vld [vmem:[%s236_s1 + $0x30] sm:$0xff]   ;;  %v180_v8 = vld [vmem:[%s236_s1 + $0x38] sm:$0xff]   ;;  %v15_v9 = vld [vmem:[%s237_s0] sm:$0xf] }
   0x4   :  { %v133_v10 = vld [vmem:[%s238_s2] ss:$0 sm:$0xff] }
   0x6   :  { %154 = vmatpush3.bf16.msra.mxu0 %v174_v2 }
   0x7   :  { %155 = vmatprep.subr.bf16.mxu0 %v181_v0 }
   0xa   :  { %156 = vmatpush3.bf16.msra.mxu0 %v175_v3 }
   0xb   :  { %157 = vmatprep.subr.bf16.mxu0 %v181_v0 }
   0xe   :  { %158 = vmatpush3.bf16.msra.mxu0 %v176_v4 }
   0xf   :  { %159 = vmatprep.subr.bf16.mxu0 %v181_v0 }
  0x12   :  { %160 = vmatpush3.bf16.msra.mxu0 %v177_v5 }
  0x13   :  { %161 = vmatprep.subr.bf16.mxu0 %v181_v0 }
  0x16   :  { %162 = vmatpush3.bf16.msra.mxu0 %v178_v6 }
  0x17   :  { %163 = vmatprep.subr.bf16.mxu0 %v181_v0 }
  0x1a   :  { %164 = vmatpush3.bf16.msra.mxu0 %v179_v7 }
  0x1b   :  { %165 = vmatprep.subr.bf16.mxu0 %v181_v0 }
  0x1e   :  { %166 = vmatpush3.bf16.msra.mxu0 %v180_v8 }
  0x21   :  { %168 = vmatmul.mubr.bf16.vlgmr.msra.gmra.mrb[0].mxu0 %v15_v9 }
  0xf4   :  { %v121_v11 = vpop.f32.mrb[0].mxu0 }
  0xf5   :  { %v122_v12 = vadd.f32 %v133_v10, %v121_v11  ;;  %v169_v13 = vpop.f32.mrb[1].mxu0 }
  0xf6   :  { %v124_v14 = vpop.f32.mrb[2].mxu0 }
  0xf7   :  { %128 = vst.msk [vmem:[%s239_s3] sm:$0xff] %vm127_vm1, %v122_v12  ;;  %v170_v15 = vpop.f32.mrb[3].mxu0 }

// kernel: cos.0
= control target key start
LH: loop header
LB: loop body
LE: loop exit
PB: predicated region body
PF: predicated region fallthrough
CT: control target
= control target key end

     0   :  { %v125_v12 = vmov 683565275   ;;  %v126_v14 = vmov 2475754826   ;;  %v127_v16 = vmov 2131351028   ;;  %s168_s0 = inlined_call_operand.vmem [shape: f32[2,1], index: 0, kind: input, shape index: {}]   ;;  %s169_s1 = inlined_call_operand.vmem [shape: f32[2,1], index: 1, kind: output, shape index: {}]  }
   0x1   :  { %v144_v0 = vld [vmem:[%s168_s0] sm:$0x3]  ;;  %v128_v18 = vmov 2102212464   ;;  %v129_v20 = vmov 920167782  }
   0x2   :  { %v6_v1 = vand.u32 2139095040, %v144_v0  ;;  %v3_v3 = vand.u32 2147483647, %v144_v0  ;;  %v130_v27 = vmov 1326507024   ;;  %vm5_vm7 = vcmp.lt.s32.totalorder %v144_v0, 0 }
   0x3   :  { %vm95_vm12 = vweird.f32 %v144_v0 }
   0x4   :  { %v7_v2 = vshrl.u32 %v6_v1, 23  ;;  %v10_v6 = vand.u32 8388607, %v3_v3  ;;  %vm4_vm8 = vcmp.le.f32.partialorder %v3_v3, 0.7853982 }
   0x6   :  { %v107_v4 = vadd.s32 4294967169, %v7_v2  ;;  %v11_v9 = vor.u32 8388608, %v10_v6 }
   0x8   :  { %v13_v5 = vadd.s32 1, %v107_v4  ;;  %v51_v29 = vshll.u32 %v11_v9, 8 }
   0xa   :  { %vm14_vm0 = vcmp.gt.s32.totalorder %v13_v5, 0 }
   0xb   :  { %v15_v7 = vsel %vm14_vm0, %v13_v5, 0 }
   0xc   :  { %v17_v8 = vand.u32 31, %v15_v7  ;;  %v16_v10 = vshrl.u32 %v15_v7, 5 }
   0xe   :  { %v18_v11 = vsub.s32 32, %v17_v8  ;;  %v20_v13 = vshll.u32 %v125_v12, %v17_v8  ;;  %v23_v15 = vshll.u32 %v126_v14, %v17_v8  ;;  %v26_v17 = vshll.u32 %v127_v16, %v17_v8 }
   0xf   :  { %v29_v19 = vshll.u32 %v128_v18, %v17_v8  ;;  %v32_v21 = vshll.u32 %v129_v20, %v17_v8  ;;  %vm35_vm1 = vcmp.lt.s32.totalorder %v16_v10, 1  ;;  %vm38_vm2 = vcmp.lt.s32.totalorder %v16_v10, 4 }
  0x10   :  { %v19_v22 = vshrl.u32 %v125_v12, %v18_v11  ;;  %v21_v23 = vshrl.u32 %v126_v14, %v18_v11  ;;  %v24_v24 = vshrl.u32 %v127_v16, %v18_v11  ;;  %v27_v25 = vshrl.u32 %v128_v18, %v18_v11 }
  0x11   :  { %v30_v26 = vshrl.u32 %v129_v20, %v18_v11  ;;  %v33_v28 = vshrl.u32 %v130_v27, %v18_v11  ;;  %vm36_vm3 = vcmp.lt.s32.totalorder %v16_v10, 2  ;;  %vm37_vm4 = vcmp.lt.s32.totalorder %v16_v10, 3 }
  0x12   :  { %v22_v30 = vor.u32 %v21_v23, %v20_v13  ;;  %v25_v31 = vor.u32 %v24_v24, %v23_v15  ;;  %v28_v32 = vor.u32 %v27_v25, %v26_v17 }
  0x13   :  { %v31_v33 = vor.u32 %v30_v26, %v29_v19  ;;  %v34_v34 = vor.u32 %v33_v28, %v32_v21 }
  0x14   :  { %v39_v35 = vsel %vm35_vm1, %v19_v22, %v22_v30  ;;  %v40_v36 = vsel %vm38_vm2, %v28_v32, 2102212464  ;;  %v43_v37 = vsel %vm35_vm1, %v22_v30, %v25_v31  ;;  %v47_v38 = vsel %vm35_vm1, %v25_v31, %v28_v32 }
  0x15   :  { %v41_v39 = vsel %vm37_vm4, %v25_v31, %v40_v36  ;;  %v44_v40 = vsel %vm38_vm2, %v31_v33, 920167782  ;;  %v48_v41 = vsel %vm38_vm2, %v34_v34, 1326507024 }
  0x16   :  { %v45_v42 = vsel %vm37_vm4, %v28_v32, %v44_v40  ;;  %v49_v43 = vsel %vm37_vm4, %v31_v33, %v48_v41  ;;  %v42_v44 = vsel %vm36_vm3, %v39_v35, %v41_v39 }
  0x17   :  { %v46_v45 = vsel %vm36_vm3, %v43_v37, %v45_v42  ;;  %v50_v46 = vsel %vm36_vm3, %v47_v38, %v49_v43  ;;  %v58_v51 = vmul.u32 %v51_v29, %v42_v44 }
  0x18   :  { %v150_v47 = vmul.u32.u64.low %v51_v29, %v50_v46  ;;  %v151_v48 = vmul.u32.u64.high %v51_v29, %v50_v46, %v150_v47  ;;  %v153_v49 = vmul.u32.u64.low %v51_v29, %v46_v45  ;;  %v154_v50 = vmul.u32.u64.high %v51_v29, %v46_v45, %v153_v49 }
  0x1a   :  { %vm60_vm5 = vc.u32 %v151_v48, %v153_v49  ;;  %v61_v52 = vadd.s32 1, %v154_v50  ;;  %v59_v63 = vadd.s32 %v153_v49, %v151_v48 }
  0x1c   :  { %v62_v53 = vsel %vm60_vm5, %v61_v52, %v154_v50 }
  0x1d   :  { %v63_v54 = vadd.s32 %v62_v53, %v58_v51 }
  0x1f   :  { %v64_v55 = vadd.s32 536870912, %v63_v54 }
  0x21   :  { %v65_v56 = vshrl.u32 %v64_v55, 30 }
  0x23   :  { %v66_v57 = vshll.u32 %v65_v56, 30  ;;  %v89_v14 = vsub.s32 4, %v65_v56 }
  0x25   :  { %v67_v58 = vsub.s32 %v63_v54, %v66_v57  ;;  %v90_v17 = vsel %vm5_vm7, %v89_v14, %v65_v56 }
  0x26   :  { %v92_v18 = vsel %vm4_vm8, 0, %v90_v17 }
  0x27   :  { %v69_v59 = vsub.s32 0, %v67_v58  ;;  %v96_v19 = vand.u32 3, %v92_v18 }
  0x29   :  { %v108_v60 = vmin.u32 %v69_v59, %v67_v58  ;;  %vm101_vm9 = vcmp.eq.s32.totalorder %v96_v19, 2  ;;  %vm98_vm10 = vcmp.eq.s32.totalorder %v96_v19, 0  ;;  %vm97_vm11 = vcmp.lt.s32.totalorder %v96_v19, 2 }
  0x2b   :  { %v71_v61 = vclz %v108_v60 }
  0x2d   :  { %v109_v62 = vadd.s32 4294967294, %v71_v61 }
  0x2f   :  { %vm110_vm6 = vcmp.lt.s32.totalorder %v109_v62, 0 }
  0x30   :  { %v74_v1 = vsel %vm110_vm6, 0, %v109_v62 }
  0x31   :  { %v75_v2 = vsub.s32 32, %v74_v1  ;;  %v76_v4 = vshll.u32 %v67_v58, %v74_v1  ;;  %v79_v5 = vsub.s32 4294967266, %v74_v1 }
  0x33   :  { %v77_v6 = vshrl.u32 %v59_v63, %v75_v2  ;;  %v80_v7 = vadd.s32 127, %v79_v5 }
  0x35   :  { %v78_v8 = vor.u32 %v77_v6, %v76_v4  ;;  %v81_v9 = vshll.u32 %v80_v7, 23 }
  0x37   :  { %v82_v10 = vor.u32 4788187, %v81_v9  ;;  %v85_v11 = vcvt.s32.f32 %v78_v8 }
  0x39   :  { %v83_v12 = vand.u32 2147483647, %v82_v10 }
  0x3b   :  { %v86_v13 = vmul.f32 %v85_v11, %v83_v12 }
  0x3d   :  { %v87_v3 = vxor.u32 2147483648, %v86_v13 }
  0x3f   :  { %v88_v15 = vsel %vm5_vm7, %v87_v3, %v86_v13 }
  0x40   :  { %v91_v16 = vsel %vm4_vm8, %v144_v0, %v88_v15 }
  0x41   :  { %121 = vcosq.f32 %v91_v16 }
  0x42   :  { %123 = vsinq.f32 %v91_v16 }
  0x4b   :  { %v122_v20 = vpop.eup %121 }
  0x4c   :  { %v124_v21 = vpop.eup %123  ;;  %v102_v22 = vxor.u32 2147483648, %v122_v20 }
  0x4d   :  { %v99_v23 = vxor.u32 2147483648, %v124_v21 }
  0x4e   :  { %v103_v0 = vsel %vm101_vm9, %v102_v22, %v124_v21 }
  0x4f   :  { %v100_v24 = vsel %vm98_vm10, %v122_v20, %v99_v23 }
  0x50   :  { %v104_v25 = vsel %vm97_vm11, %v100_v24, %v103_v0 }
  0x51   :  { %v105_v26 = vsel %vm95_vm12, nan, %v104_v25 }
  0x52   :  { %106 = vst [vmem:[%s169_s1] sm:$0x3] %v105_v26 }

// kernel: colorhandpose3d_forward.21
= control target key start
LH: loop header
LB: loop body
LE: loop exit
PB: predicated region body
PF: predicated region fallthrough
CT: control target
= control target key end

     0   :  { %vm578_vm0 = vcmask 1041408   ;;  %vm1037_vm1 = vmmov 0   ;;  %vm574_vm2 = vcmask 31744   ;;  %s1274_s1 = inlined_call_operand.vmem [shape: bf16[1028,128], index: 1, kind: input, shape index: {}]   ;;  %s1275_s0 = inlined_call_operand.vmem [shape: bf16[8,1028], index: 0, kind: input, shape index: {}]   ;;  %s1276_s2 = inlined_call_operand.vmem [shape: f32[1,128], index: 2, kind: input, shape index: {}]   ;;  %s1277_s3 = inlined_call_operand.vmem [shape: f32[8,128], index: 3, kind: output, shape index: {}]  }
   0x1   :  { %v962_v0 = vld [vmem:[%s1274_s1 + $0x40] sm:$0xff]   ;;  %v966_v4 = vld [vmem:[%s1274_s1 + $0x48] sm:$0xff]   ;;  %v970_v8 = vld [vmem:[%s1274_s1 + $0x50] sm:$0xff]  }
   0x2   :  { %v963_v1 = vld [vmem:[%s1274_s1] sm:$0xff]   ;;  %864 = vmatprep.subr.bf16.mxu0 %v962_v0  ;;  %v967_v5 = vld [vmem:[%s1274_s1 + $0x8] sm:$0xff]   ;;  %v971_v9 = vld [vmem:[%s1274_s1 + $0x10] sm:$0xff]  }
   0x3   :  { %v964_v2 = vld [vmem:[%s1274_s1 + $0xc0] sm:$0xff]   ;;  %865 = vmatpush3.bf16.msra.mxu0 %v963_v1  ;;  %v968_v6 = vld [vmem:[%s1274_s1 + $0xc8] sm:$0xff]   ;;  %v972_v10 = vld [vmem:[%s1274_s1 + $0xd0] sm:$0xff]  }
   0x4   :  { %v965_v3 = vld [vmem:[%s1274_s1 + $0x80] sm:$0xff]   ;;  %886 = vmatprep.subr.bf16.mxu1 %v964_v2  ;;  %866 = vmatprep.subr.bf16.mxu0 %v966_v4  ;;  %v969_v7 = vld [vmem:[%s1274_s1 + $0x88] sm:$0xff]   ;;  %v973_v11 = vld [vmem:[%s1274_s1 + $0x90] sm:$0xff]  }
   0x5   :  { %887 = vmatpush3.bf16.msra.mxu1 %v965_v3  ;;  %v974_v12 = vld [vmem:[%s1274_s1 + $0x58] sm:$0xff]   ;;  %v978_v16 = vld [vmem:[%s1274_s1 + $0x60] sm:$0xff]   ;;  %v982_v20 = vld [vmem:[%s1274_s1 + $0x68] sm:$0xff]  }
   0x6   :  { %888 = vmatprep.subr.bf16.mxu1 %v968_v6  ;;  %v975_v13 = vld [vmem:[%s1274_s1 + $0x18] sm:$0xff]   ;;  %v979_v17 = vld [vmem:[%s1274_s1 + $0x20] sm:$0xff]   ;;  %v983_v21 = vld [vmem:[%s1274_s1 + $0x28] sm:$0xff]  }
   0x7   :  { %867 = vmatpush3.bf16.msra.mxu0 %v967_v5  ;;  %v976_v14 = vld [vmem:[%s1274_s1 + $0xd8] sm:$0xff]   ;;  %v980_v18 = vld [vmem:[%s1274_s1 + $0xe0] sm:$0xff]   ;;  %v984_v22 = vld [vmem:[%s1274_s1 + $0xe8] sm:$0xff]  }
   0x8   :  { %868 = vmatprep.subr.bf16.mxu0 %v970_v8  ;;  %v977_v15 = vld [vmem:[%s1274_s1 + $0x98] sm:$0xff]   ;;  %v981_v19 = vld [vmem:[%s1274_s1 + $0xa0] sm:$0xff]   ;;  %v985_v23 = vld [vmem:[%s1274_s1 + $0xa8] sm:$0xff]  }
   0x9   :  { %889 = vmatpush3.bf16.msra.mxu1 %v969_v7  ;;  %v986_v24 = vld [vmem:[%s1274_s1 + $0x70] sm:$0xff]   ;;  %v990_v28 = vld [vmem:[%s1274_s1 + $0x78] sm:$0xff]   ;;  %v15_v32 = vld [vmem:[%s1275_s0] sm:$0xff] }
   0xa   :  { %890 = vmatprep.subr.bf16.mxu1 %v972_v10  ;;  %v987_v25 = vld [vmem:[%s1274_s1 + $0x30] sm:$0xff]   ;;  %v991_v29 = vld [vmem:[%s1274_s1 + $0x38] sm:$0xff]   ;;  %v789_v33 = vcombine.low %v15_v32, %v15_v32  ;;  %v790_v34 = vcombine.high %v15_v32, %v15_v32  ;;  %v996_v35 = vld [vmem:[%s1274_s1 + $0x140] sm:$0xff]  }
   0xb   :  { %869 = vmatpush3.bf16.msra.mxu0 %v971_v9  ;;  %v988_v26 = vld [vmem:[%s1274_s1 + $0xf0] sm:$0xff]   ;;  %v992_v30 = vld [vmem:[%s1274_s1 + $0xf8] sm:$0xff]   ;;  %v16_v36 = vld [vmem:[%s1275_s0 + $0x8] sm:$0xff] }
   0xc   :  { %870 = vmatprep.subr.bf16.mxu0 %v974_v12  ;;  %v989_v27 = vld [vmem:[%s1274_s1 + $0xb0] sm:$0xff]   ;;  %v993_v31 = vld [vmem:[%s1274_s1 + $0xb8] sm:$0xff]   ;;  %v791_v37 = vcombine.low %v16_v36, %v16_v36  ;;  %v792_v38 = vcombine.high %v16_v36, %v16_v36  ;;  %v999_v39 = vld [vmem:[%s1274_s1 + $0x100] sm:$0xff]   ;;  %614 = vmatprep.mubr.bf16.mxu0 %v790_v34 }
   0xd   :  { %891 = vmatpush3.bf16.msra.mxu1 %v973_v11  ;;  %v1000_v40 = vld [vmem:[%s1274_s1 + $0x1c0] sm:$0xff]   ;;  %v1002_v42 = vld [vmem:[%s1274_s1 + $0x148] sm:$0xff]   ;;  %v1006_v46 = vld [vmem:[%s1274_s1 + $0x150] sm:$0xff]  }
   0xe   :  { %892 = vmatprep.subr.bf16.mxu1 %v976_v14  ;;  %654 = vmatprep.mubr.bf16.mxu1 %v792_v38  ;;  %v1001_v41 = vld [vmem:[%s1274_s1 + $0x180] sm:$0xff]   ;;  %v1003_v43 = vld [vmem:[%s1274_s1 + $0x108] sm:$0xff]   ;;  %v1007_v47 = vld [vmem:[%s1274_s1 + $0x110] sm:$0xff]  }
   0xf   :  { %871 = vmatpush3.bf16.msra.mxu0 %v975_v13  ;;  %v1004_v44 = vld [vmem:[%s1274_s1 + $0x1c8] sm:$0xff]   ;;  %v1008_v48 = vld [vmem:[%s1274_s1 + $0x1d0] sm:$0xff]   ;;  %v1010_v50 = vld [vmem:[%s1274_s1 + $0x158] sm:$0xff]   ;;  %v1036_v13 = vmov 0.0  }
  0x10   :  { %872 = vmatprep.subr.bf16.mxu0 %v978_v16  ;;  %v1005_v45 = vld [vmem:[%s1274_s1 + $0x188] sm:$0xff]   ;;  %v1009_v49 = vld [vmem:[%s1274_s1 + $0x190] sm:$0xff]   ;;  %v1011_v51 = vld [vmem:[%s1274_s1 + $0x118] sm:$0xff]  }
  0x11   :  { %893 = vmatpush3.bf16.msra.mxu1 %v977_v15  ;;  %v1012_v52 = vld [vmem:[%s1274_s1 + $0x1d8] sm:$0xff]   ;;  %v1014_v54 = vld [vmem:[%s1274_s1 + $0x160] sm:$0xff]   ;;  %v1018_v58 = vld [vmem:[%s1274_s1 + $0x168] sm:$0xff]  }
  0x12   :  { %894 = vmatprep.subr.bf16.mxu1 %v980_v18  ;;  %v1013_v53 = vld [vmem:[%s1274_s1 + $0x198] sm:$0xff]   ;;  %v1015_v55 = vld [vmem:[%s1274_s1 + $0x120] sm:$0xff]   ;;  %v1019_v59 = vld [vmem:[%s1274_s1 + $0x128] sm:$0xff]  }
  0x13   :  { %873 = vmatpush3.bf16.msra.mxu0 %v979_v17  ;;  %v1016_v56 = vld [vmem:[%s1274_s1 + $0x1e0] sm:$0xff]   ;;  %v1020_v60 = vld [vmem:[%s1274_s1 + $0x1e8] sm:$0xff]   ;;  %v1022_v62 = vld [vmem:[%s1274_s1 + $0x170] sm:$0xff]  }
  0x14   :  { %874 = vmatprep.subr.bf16.mxu0 %v982_v20  ;;  %v1017_v57 = vld [vmem:[%s1274_s1 + $0x1a0] sm:$0xff]   ;;  %v1021_v61 = vld [vmem:[%s1274_s1 + $0x1a8] sm:$0xff]   ;;  %v1023_v63 = vld [vmem:[%s1274_s1 + $0x130] sm:$0xff]  }
  0x15   :  { %895 = vmatpush3.bf16.msra.mxu1 %v981_v19  ;;  %v1024_v0 = vld [vmem:[%s1274_s1 + $0x1f0] sm:$0xff]   ;;  %v1026_v2 = vld [vmem:[%s1274_s1 + $0x178] sm:$0xff]   ;;  %v1034_v10 = vld [vmem:[%s1274_s1 + $0x200] ss:$0 sps:$4 sm:$0x33]  }
  0x16   :  { %896 = vmatprep.subr.bf16.mxu1 %v984_v22  ;;  %v1025_v1 = vld [vmem:[%s1274_s1 + $0x1b0] sm:$0xff]   ;;  %v1027_v3 = vld [vmem:[%s1274_s1 + $0x138] sm:$0xff]   ;;  %v580_v14 = vsel %vm578_vm0, %v1034_v10, 0  ;;  %v1035_v15 = vld [vmem:[%s1275_s0 + $0x20] ss:$0 sps:$4 sm:$0xff]  }
  0x17   :  { %875 = vmatpush3.bf16.msra.mxu0 %v983_v21  ;;  %v1028_v4 = vld [vmem:[%s1274_s1 + $0x1f8] sm:$0xff]   ;;  %v17_v6 = vld [vmem:[%s1275_s0 + $0x10] sm:$0xff]  ;;  %v788_v17 = vld [vmem:[%s1276_s2] ss:$0 sm:$0xff] }
  0x18   :  { %876 = vmatprep.subr.bf16.mxu0 %v986_v24  ;;  %v1029_v5 = vld [vmem:[%s1274_s1 + $0x1b8] sm:$0xff]   ;;  %v793_v7 = vcombine.low %v17_v6, %v17_v6  ;;  %v794_v8 = vcombine.high %v17_v6, %v17_v6 }
  0x19   :  { %897 = vmatpush3.bf16.msra.mxu1 %v985_v23  ;;  %v18_v9 = vld [vmem:[%s1275_s0 + $0x18] sm:$0xff] }
  0x1a   :  { %898 = vmatprep.subr.bf16.mxu1 %v988_v26  ;;  %v795_v11 = vcombine.low %v18_v9, %v18_v9  ;;  %v796_v12 = vcombine.high %v18_v9, %v18_v9 }
  0x1b   :  { %877 = vmatpush3.bf16.msra.mxu0 %v987_v25 }
  0x1c   :  { %878 = vmatprep.subr.bf16.mxu0 %v990_v28 }
  0x1d   :  { %899 = vmatpush3.bf16.msra.mxu1 %v989_v27 }
  0x1e   :  { %900 = vmatprep.subr.bf16.mxu1 %v992_v30 }
  0x1f   :  { %879 = vmatpush3.bf16.msra.mxu0 %v991_v29 }
  0x20   :  { %908 = vmatprep.subr.bf16.mxu0 %v996_v35 }
  0x21   :  { %901 = vmatpush3.bf16.msra.mxu1 %v993_v31 }
  0x22   :  { %615 = vmatmul.mubr.bf16.vlgmr.msra.gmra.mrb[0].mxu0 %v789_v33  ;;  %930 = vmatprep.subr.bf16.mxu1 %v1000_v40 }
  0x23   :  { %909 = vmatpush3.bf16.msra.mxu0 %v999_v39  ;;  %694 = vmatprep.mubr.bf16.mxu0 %v794_v8 }
  0x24   :  { %655 = vmatmul.mubr.bf16.vlgmr.msra.gmra.mrb[0].mxu1 %v791_v37  ;;  %910 = vmatprep.subr.bf16.mxu0 %v1002_v42 }
  0x25   :  { %931 = vmatpush3.bf16.msra.mxu1 %v1001_v41  ;;  %734 = vmatprep.mubr.bf16.mxu1 %v796_v12 }
  0x26   :  { %932 = vmatprep.subr.bf16.mxu1 %v1004_v44 }
  0x27   :  { %911 = vmatpush3.bf16.msra.mxu0 %v1003_v43 }
  0x28   :  { %912 = vmatprep.subr.bf16.mxu0 %v1006_v46 }
  0x29   :  { %933 = vmatpush3.bf16.msra.mxu1 %v1005_v45 }
  0x2a   :  { %934 = vmatprep.subr.bf16.mxu1 %v1008_v48 }
  0x2b   :  { %913 = vmatpush3.bf16.msra.mxu0 %v1007_v47 }
  0x2c   :  { %914 = vmatprep.subr.bf16.mxu0 %v1010_v50 }
  0x2d   :  { %935 = vmatpush3.bf16.msra.mxu1 %v1009_v49 }
  0x2e   :  { %936 = vmatprep.subr.bf16.mxu1 %v1012_v52 }
  0x2f   :  { %915 = vmatpush3.bf16.msra.mxu0 %v1011_v51 }
  0x30   :  { %916 = vmatprep.subr.bf16.mxu0 %v1014_v54 }
  0x31   :  { %937 = vmatpush3.bf16.msra.mxu1 %v1013_v53 }
  0x32   :  { %938 = vmatprep.subr.bf16.mxu1 %v1016_v56 }
  0x33   :  { %917 = vmatpush3.bf16.msra.mxu0 %v1015_v55 }
  0x34   :  { %918 = vmatprep.subr.bf16.mxu0 %v1018_v58 }
  0x35   :  { %939 = vmatpush3.bf16.msra.mxu1 %v1017_v57 }
  0x36   :  { %940 = vmatprep.subr.bf16.mxu1 %v1020_v60 }
  0x37   :  { %919 = vmatpush3.bf16.msra.mxu0 %v1019_v59 }
  0x38   :  { %920 = vmatprep.subr.bf16.mxu0 %v1022_v62 }
  0x39   :  { %941 = vmatpush3.bf16.msra.mxu1 %v1021_v61 }
  0x3a   :  { %942 = vmatprep.subr.bf16.mxu1 %v1024_v0 }
  0x3b   :  { %921 = vmatpush3.bf16.msra.mxu0 %v1023_v63 }
  0x3c   :  { %922 = vmatprep.subr.bf16.mxu0 %v1026_v2 }
  0x3d   :  { %943 = vmatpush3.bf16.msra.mxu1 %v1025_v1 }
  0x3e   :  { %944 = vmatprep.subr.bf16.mxu1 %v1028_v4 }
  0x3f   :  { %923 = vmatpush3.bf16.msra.mxu0 %v1027_v3 }
  0x40   :  { %954 = vmatprep.subr.bf16.mxu0 %v1036_v13 }
  0x41   :  { %945 = vmatpush3.bf16.msra.mxu1 %v1029_v5 }
  0x42   :  { %695 = vmatmul.mubr.bf16.vlgmr.msra.gmra.mrb[4].mxu0 %v793_v7 }
  0x43   :  { %955 = vmatpush3.bf16.msra.mxu0 %v580_v14  ;;  %956 = vmatprep.mubr.msk.bf16.mxu0 %vm1037_vm1, %v1036_v13 }
  0x44   :  { %735 = vmatmul.mubr.bf16.vlgmr.msra.gmra.mrb[4].mxu1 %v795_v11 }
  0x4a   :  { %957 = vmatmul.mubr.msk.bf16.vlgmr.msra.gmra.mrb[8].mxu0 %vm574_vm2, %v1035_v15 }
  0xf5   :  { %v880_v16 = vpop.f32.mrb[0].mxu0 }
  0xf6   :  { %v881_v18 = vpop.f32.mrb[1].mxu0 }
  0xf7   :  { %v882_v19 = vadd.f32 %v881_v18, %v880_v16  ;;  %v883_v20 = vpop.f32.mrb[2].mxu0  ;;  %v902_v21 = vpop.f32.mrb[0].mxu1 }
  0xf8   :  { %v884_v22 = vpop.f32.mrb[3].mxu0  ;;  %v903_v23 = vpop.f32.mrb[1].mxu1 }
  0xf9   :  { %v617_v24 = vadd.f32 %v882_v19, %v788_v17  ;;  %v904_v25 = vadd.f32 %v903_v23, %v902_v21  ;;  %v905_v26 = vpop.f32.mrb[2].mxu1 }
  0xfa   :  { %v906_v27 = vpop.f32.mrb[3].mxu1 }
  0xfb   :  { %v657_v28 = vadd.f32 %v904_v25, %v617_v24 }
 0x115   :  { %v924_v29 = vpop.f32.mrb[4].mxu0 }
 0x116   :  { %v925_v30 = vpop.f32.mrb[5].mxu0 }
 0x117   :  { %v926_v31 = vadd.f32 %v925_v30, %v924_v29  ;;  %v946_v32 = vpop.f32.mrb[4].mxu1  ;;  %v927_v33 = vpop.f32.mrb[6].mxu0 }
 0x118   :  { %v947_v34 = vpop.f32.mrb[5].mxu1  ;;  %v928_v35 = vpop.f32.mrb[7].mxu0 }
 0x119   :  { %v697_v36 = vadd.f32 %v926_v31, %v657_v28  ;;  %v948_v37 = vadd.f32 %v947_v34, %v946_v32  ;;  %v949_v38 = vpop.f32.mrb[6].mxu1 }
 0x11a   :  { %v950_v39 = vpop.f32.mrb[7].mxu1 }
 0x11b   :  { %v737_v40 = vadd.f32 %v948_v37, %v697_v36 }
 0x11d   :  { %v776_v41 = vpop.f32.mrb[8].mxu0 }
 0x11e   :  { %v777_v42 = vadd.f32 %v776_v41, %v737_v40  ;;  %v958_v43 = vpop.f32.mrb[9].mxu0 }
 0x11f   :  { %v779_v44 = vpop.f32.mrb[10].mxu0 }
 0x120   :  { %v782_v45 = vmax.f32 %v777_v42, 0.0  ;;  %v959_v46 = vpop.f32.mrb[11].mxu0 }
 0x122   :  { %783 = vst [vmem:[%s1277_s3] sm:$0xff] %v782_v45 }

// kernel: colorhandpose3d_forward.23
= control target key start
LH: loop header
LB: loop body
LE: loop exit
PB: predicated region body
PF: predicated region fallthrough
CT: control target
= control target key end

     0   :  { %vm104_vm0 = vcmask 1043456   ;;  %v6364_v2 = vmov 0.0   ;;  %vm100_vm1 = vcmask 64512   ;;  %vm6365_vm2 = vmmov 0   ;;  %s7457_s0 = inlined_call_operand.vmem [shape: bf16[42,8,8], index: 0, kind: input, shape index: {}]   ;;  %s7458_s1 = inlined_call_operand.vmem [shape: bf16[42,32,8], index: 1, kind: input, shape index: {}]   ;;  %s7459_s2 = inlined_call_operand.vmem [shape: bf16[42,8,32], index: 2, kind: input, shape index: {}]   ;;  %s7460_s3 = inlined_call_operand.hbm [shape: f32[42,32,32], index: 3, kind: output, shape index: {}]  }
   0x1   :  { %v58_v0 = vld [vmem:[%s7459_s2] sm:$0xf]  ;;  %v59_v1 = vld [vmem:[%s7459_s2 + $0x4] sm:$0xf]  ;;  %5705 = vmatprep.subr.bf16.mxu0 %v6364_v2  ;;  %5711 = vmatprep.subr.bf16.mxu1 %v6364_v2  ;;  %v60_v7 = vld [vmem:[%s7459_s2 + $0x8] sm:$0xf] }
   0x2   :  { %v106_v3 = vsel %vm104_vm0, %v58_v0, 0  ;;  %v152_v4 = vsel %vm104_vm0, %v59_v1, 0  ;;  %v16_v5 = vld [vmem:[%s7457_s0] sm:$0xf]  ;;  %v17_v6 = vld [vmem:[%s7457_s0 + $0x4] sm:$0xf]  ;;  %5707 = vmatprep.mubr.msk.bf16.mxu0 %vm6365_vm2, %v6364_v2  ;;  %5713 = vmatprep.mubr.msk.bf16.mxu1 %vm6365_vm2, %v6364_v2 }
   0x3   :  { %5706 = vmatpush3.bf16.msra.mxu0 %v106_v3  ;;  %5712 = vmatpush3.bf16.msra.mxu1 %v152_v4  ;;  %v61_v8 = vld [vmem:[%s7459_s2 + $0xc] sm:$0xf]  ;;  %v198_v9 = vsel %vm104_vm0, %v60_v7, 0  ;;  %v62_v11 = vld [vmem:[%s7459_s2 + $0x10] sm:$0xf] }
   0x4   :  { %v244_v10 = vsel %vm104_vm0, %v61_v8, 0  ;;  %5717 = vmatprep.subr.bf16.mxu0 %v6364_v2  ;;  %5723 = vmatprep.subr.bf16.mxu1 %v6364_v2  ;;  %v63_v12 = vld [vmem:[%s7459_s2 + $0x14] sm:$0xf]  ;;  %v18_v13 = vld [vmem:[%s7457_s0 + $0x8] sm:$0xf]  ;;  %v290_v15 = vsel %vm104_vm0, %v62_v11, 0 }
   0x5   :  { %v19_v14 = vld [vmem:[%s7457_s0 + $0xc] sm:$0xf]  ;;  %v336_v16 = vsel %vm104_vm0, %v63_v12, 0  ;;  %v64_v17 = vld [vmem:[%s7459_s2 + $0x18] sm:$0xf] }
   0x6   :  { %5708 = vmatmul.mubr.msk.bf16.vlgmr.msra.gmra.mrb[0].mxu0 %vm100_vm1, %v16_v5  ;;  %5714 = vmatmul.mubr.msk.bf16.vlgmr.msra.gmra.mrb[0].mxu1 %vm100_vm1, %v17_v6  ;;  %v65_v18 = vld [vmem:[%s7459_s2 + $0x1c] sm:$0xf]  ;;  %v20_v19 = vld [vmem:[%s7457_s0 + $0x10] sm:$0xf]  ;;  %v21_v20 = vld [vmem:[%s7457_s0 + $0x14] sm:$0xf] }
   0x7   :  { %5718 = vmatpush3.bf16.msra.mxu0 %v198_v9  ;;  %5724 = vmatpush3.bf16.msra.mxu1 %v244_v10  ;;  %v382_v21 = vsel %vm104_vm0, %v64_v17, 0  ;;  %v428_v22 = vsel %vm104_vm0, %v65_v18, 0  ;;  %v66_v23 = vld [vmem:[%s7459_s2 + $0x20] sm:$0xf]  ;;  %v67_v24 = vld [vmem:[%s7459_s2 + $0x24] sm:$0xf] }
   0x8   :  { %5719 = vmatprep.mubr.msk.bf16.mxu0 %vm6365_vm2, %v6364_v2  ;;  %5725 = vmatprep.mubr.msk.bf16.mxu1 %vm6365_vm2, %v6364_v2  ;;  %v22_v25 = vld [vmem:[%s7457_s0 + $0x18] sm:$0xf]  ;;  %v23_v26 = vld [vmem:[%s7457_s0 + $0x1c] sm:$0xf]  ;;  %v474_v27 = vsel %vm104_vm0, %v66_v23, 0  ;;  %v520_v28 = vsel %vm104_vm0, %v67_v24, 0 }
   0x9   :  { %5729 = vmatprep.subr.bf16.mxu0 %v6364_v2  ;;  %5735 = vmatprep.subr.bf16.mxu1 %v6364_v2  ;;  %v68_v29 = vld [vmem:[%s7459_s2 + $0x28] sm:$0xf]  ;;  %v69_v30 = vld [vmem:[%s7459_s2 + $0x2c] sm:$0xf]  ;;  %v70_v31 = vld [vmem:[%s7459_s2 + $0x30] sm:$0xf] }
   0xa   :  { %v71_v32 = vld [vmem:[%s7459_s2 + $0x34] sm:$0xf]  ;;  %v24_v33 = vld [vmem:[%s7457_s0 + $0x20] sm:$0xf]  ;;  %v25_v34 = vld [vmem:[%s7457_s0 + $0x24] sm:$0xf] }
   0xb   :  { %v566_v35 = vsel %vm104_vm0, %v68_v29, 0  ;;  %v612_v36 = vsel %vm104_vm0, %v69_v30, 0  ;;  %v658_v37 = vsel %vm104_vm0, %v70_v31, 0  ;;  %v704_v38 = vsel %vm104_vm0, %v71_v32, 0  ;;  %v72_v39 = vld [vmem:[%s7459_s2 + $0x38] sm:$0xf] }
   0xc   :  { %v73_v40 = vld [vmem:[%s7459_s2 + $0x3c] sm:$0xf]  ;;  %v74_v41 = vld [vmem:[%s7459_s2 + $0x40] sm:$0xf]  ;;  %v75_v42 = vld [vmem:[%s7459_s2 + $0x44] sm:$0xf] }
   0xd   :  { %v76_v43 = vld [vmem:[%s7459_s2 + $0x48] sm:$0xf]  ;;  %v77_v44 = vld [vmem:[%s7459_s2 + $0x4c] sm:$0xf]  ;;  %v78_v45 = vld [vmem:[%s7459_s2 + $0x50] sm:$0xf] }
   0xe   :  { %5720 = vmatmul.mubr.msk.bf16.vlgmr.msra.gmra.mrb[4].mxu0 %vm100_vm1, %v18_v13  ;;  %5726 = vmatmul.mubr.msk.bf16.vlgmr.msra.gmra.mrb[4].mxu1 %vm100_vm1, %v19_v14  ;;  %v79_v46 = vld [vmem:[%s7459_s2 + $0x54] sm:$0xf]  ;;  %v80_v47 = vld [vmem:[%s7459_s2 + $0x58] sm:$0xf]  ;;  %v81_v48 = vld [vmem:[%s7459_s2 + $0x5c] sm:$0xf] }
   0xf   :  { %5730 = vmatpush3.bf16.msra.mxu0 %v290_v15  ;;  %5736 = vmatpush3.bf16.msra.mxu1 %v336_v16  ;;  %v82_v49 = vld [vmem:[%s7459_s2 + $0x60] sm:$0xf]  ;;  %v83_v50 = vld [vmem:[%s7459_s2 + $0x64] sm:$0xf]  ;;  %v750_v51 = vsel %vm104_vm0, %v72_v39, 0  ;;  %v796_v52 = vsel %vm104_vm0, %v73_v40, 0 }
  0x10   :  { %5731 = vmatprep.mubr.msk.bf16.mxu0 %vm6365_vm2, %v6364_v2  ;;  %5737 = vmatprep.mubr.msk.bf16.mxu1 %vm6365_vm2, %v6364_v2  ;;  %v842_v53 = vsel %vm104_vm0, %v74_v41, 0  ;;  %v888_v54 = vsel %vm104_vm0, %v75_v42, 0  ;;  %v26_v55 = vld [vmem:[%s7457_s0 + $0x28] sm:$0xf]  ;;  %v27_v56 = vld [vmem:[%s7457_s0 + $0x2c] sm:$0xf] }
  0x11   :  { %5741 = vmatprep.subr.bf16.mxu0 %v6364_v2  ;;  %5747 = vmatprep.subr.bf16.mxu1 %v6364_v2  ;;  %v934_v57 = vsel %vm104_vm0, %v76_v43, 0  ;;  %v980_v58 = vsel %vm104_vm0, %v77_v44, 0  ;;  %v1026_v59 = vsel %vm104_vm0, %v78_v45, 0  ;;  %v1072_v60 = vsel %vm104_vm0, %v79_v46, 0  ;;  %v28_v1 = vld [vmem:[%s7457_s0 + $0x30] sm:$0xf] }
  0x12   :  { %v1118_v61 = vsel %vm104_vm0, %v80_v47, 0  ;;  %v1164_v62 = vsel %vm104_vm0, %v81_v48, 0  ;;  %v6576_v63 = vsel %vm104_vm0, %v82_v49, 0  ;;  %v6579_v0 = vsel %vm104_vm0, %v83_v50, 0  ;;  %v29_v3 = vld [vmem:[%s7457_s0 + $0x34] sm:$0xf] }
  0x13   :  { %v30_v4 = vld [vmem:[%s7457_s0 + $0x38] sm:$0xf]  ;;  %v31_v5 = vld [vmem:[%s7457_s0 + $0x3c] sm:$0xf]  ;;  %v32_v6 = vld [vmem:[%s7457_s0 + $0x40] sm:$0xf] }
  0x14   :  { %v33_v7 = vld [vmem:[%s7457_s0 + $0x44] sm:$0xf]  ;;  %v34_v8 = vld [vmem:[%s7457_s0 + $0x48] sm:$0xf]  ;;  %v35_v9 = vld [vmem:[%s7457_s0 + $0x4c] sm:$0xf] }
  0x15   :  { %v36_v10 = vld [vmem:[%s7457_s0 + $0x50] sm:$0xf]  ;;  %v37_v11 = vld [vmem:[%s7457_s0 + $0x54] sm:$0xf]  ;;  %v38_v12 = vld [vmem:[%s7457_s0 + $0x58] sm:$0xf] }
  0x16   :  { %5732 = vmatmul.mubr.msk.bf16.vlgmr.msra.gmra.mrb[8].mxu0 %vm100_vm1, %v20_v19  ;;  %5738 = vmatmul.mubr.msk.bf16.vlgmr.msra.gmra.mrb[8].mxu1 %vm100_vm1, %v21_v20  ;;  %v39_v13 = vld [vmem:[%s7457_s0 + $0x5c] sm:$0xf]  ;;  %v84_v14 = vld [vmem:[%s7459_s2 + $0x68] sm:$0xf]  ;;  %v85_v15 = vld [vmem:[%s7459_s2 + $0x6c] sm:$0xf] }
  0x17   :  { %5742 = vmatpush3.bf16.msra.mxu0 %v382_v21  ;;  %5748 = vmatpush3.bf16.msra.mxu1 %v428_v22  ;;  %v40_v16 = vld [vmem:[%s7457_s0 + $0x60] sm:$0xf]  ;;  %v41_v17 = vld [vmem:[%s7457_s0 + $0x64] sm:$0xf]  ;;  %v1302_v18 = vsel %vm104_vm0, %v84_v14, 0  ;;  %v1348_v19 = vsel %vm104_vm0, %v85_v15, 0 }
  0x18   :  { %5743 = vmatprep.mubr.msk.bf16.mxu0 %vm6365_vm2, %v6364_v2  ;;  %5749 = vmatprep.mubr.msk.bf16.mxu1 %vm6365_vm2, %v6364_v2 }
  0x19   :  { %5753 = vmatprep.subr.bf16.mxu0 %v6364_v2  ;;  %5759 = vmatprep.subr.bf16.mxu1 %v6364_v2 }
  0x1e   :  { %5744 = vmatmul.mubr.msk.bf16.vlgmr.msra.gmra.mrb[12].mxu0 %vm100_vm1, %v22_v25  ;;  %5750 = vmatmul.mubr.msk.bf16.vlgmr.msra.gmra.mrb[12].mxu1 %vm100_vm1, %v23_v26 }
  0x1f   :  { %5754 = vmatpush3.bf16.msra.mxu0 %v474_v27  ;;  %5760 = vmatpush3.bf16.msra.mxu1 %v520_v28 }
  0x20   :  { %5755 = vmatprep.mubr.msk.bf16.mxu0 %vm6365_vm2, %v6364_v2  ;;  %5761 = vmatprep.mubr.msk.bf16.mxu1 %vm6365_vm2, %v6364_v2 }
  0x21   :  { %5765 = vmatprep.subr.bf16.mxu0 %v6364_v2  ;;  %5771 = vmatprep.subr.bf16.mxu1 %v6364_v2 }
  0x26   :  { %5756 = vmatmul.mubr.msk.bf16.vlgmr.msra.gmra.mrb[16].mxu0 %vm100_vm1, %v24_v33  ;;  %5762 = vmatmul.mubr.msk.bf16.vlgmr.msra.gmra.mrb[16].mxu1 %vm100_vm1, %v25_v34 }
  0x27   :  { %5766 = vmatpush3.bf16.msra.mxu0 %v566_v35  ;;  %5772 = vmatpush3.bf16.msra.mxu1 %v612_v36 }
  0x28   :  { %5767 = vmatprep.mubr.msk.bf16.mxu0 %vm6365_vm2, %v6364_v2  ;;  %5773 = vmatprep.mubr.msk.bf16.mxu1 %vm6365_vm2, %v6364_v2 }
  0x29   :  { %5777 = vmatprep.subr.bf16.mxu0 %v6364_v2  ;;  %5783 = vmatprep.subr.bf16.mxu1 %v6364_v2 }
  0x2e   :  { %5768 = vmatmul.mubr.msk.bf16.vlgmr.msra.gmra.mrb[20].mxu0 %vm100_vm1, %v26_v55  ;;  %5774 = vmatmul.mubr.msk.bf16.vlgmr.msra.gmra.mrb[20].mxu1 %vm100_vm1, %v27_v56 }
  0x2f   :  { %5778 = vmatpush3.bf16.msra.mxu0 %v658_v37  ;;  %5784 = vmatpush3.bf16.msra.mxu1 %v704_v38 }
  0x30   :  { %5779 = vmatprep.mubr.msk.bf16.mxu0 %vm6365_vm2, %v6364_v2  ;;  %5785 = vmatprep.mubr.msk.bf16.mxu1 %vm6365_vm2, %v6364_v2 }
  0x31   :  { %5789 = vmatprep.subr.bf16.mxu0 %v6364_v2  ;;  %5795 = vmatprep.subr.bf16.mxu1 %v6364_v2 }
  0x36   :  { %5780 = vmatmul.mubr.msk.bf16.vlgmr.msra.gmra.mrb[24].mxu0 %vm100_vm1, %v28_v1  ;;  %5786 = vmatmul.mubr.msk.bf16.vlgmr.msra.gmra.mrb[24].mxu1 %vm100_vm1, %v29_v3 }
  0x37   :  { %5790 = vmatpush3.bf16.msra.mxu0 %v750_v51  ;;  %5796 = vmatpush3.bf16.msra.mxu1 %v796_v52 }
  0x38   :  { %5791 = vmatprep.mubr.msk.bf16.mxu0 %vm6365_vm2, %v6364_v2  ;;  %5797 = vmatprep.mubr.msk.bf16.mxu1 %vm6365_vm2, %v6364_v2 }
  0x39   :  { %5801 = vmatprep.subr.bf16.mxu0 %v6364_v2  ;;  %5807 = vmatprep.subr.bf16.mxu1 %v6364_v2 }
  0x3e   :  { %5792 = vmatmul.mubr.msk.bf16.vlgmr.msra.gmra.mrb[28].mxu0 %vm100_vm1, %v30_v4  ;;  %5798 = vmatmul.mubr.msk.bf16.vlgmr.msra.gmra.mrb[28].mxu1 %vm100_vm1, %v31_v5 }
  0x3f   :  { %5802 = vmatpush3.bf16.msra.mxu0 %v842_v53  ;;  %5808 = vmatpush3.bf16.msra.mxu1 %v888_v54 }
  0x40   :  { %5803 = vmatprep.mubr.msk.bf16.mxu0 %vm6365_vm2, %v6364_v2  ;;  %5809 = vmatprep.mubr.msk.bf16.mxu1 %vm6365_vm2, %v6364_v2 }
  0x41   :  { %5813 = vmatprep.subr.bf16.mxu0 %v6364_v2  ;;  %5819 = vmatprep.subr.bf16.mxu1 %v6364_v2 }
  0x46   :  { %5804 = vmatmul.mubr.msk.bf16.vlgmr.msra.gmra.mrb[32].mxu0 %vm100_vm1, %v32_v6  ;;  %5810 = vmatmul.mubr.msk.bf16.vlgmr.msra.gmra.mrb[32].mxu1 %vm100_vm1, %v33_v7 }
  0x47   :  { %5814 = vmatpush3.bf16.msra.mxu0 %v934_v57  ;;  %5820 = vmatpush3.bf16.msra.mxu1 %v980_v58 }
  0x48   :  { %5815 = vmatprep.mubr.msk.bf16.mxu0 %vm6365_vm2, %v6364_v2  ;;  %5821 = vmatprep.mubr.msk.bf16.mxu1 %vm6365_vm2, %v6364_v2 }
  0x49   :  { %5825 = vmatprep.subr.bf16.mxu0 %v6364_v2  ;;  %5831 = vmatprep.subr.bf16.mxu1 %v6364_v2 }
  0x4e   :  { %5816 = vmatmul.mubr.msk.bf16.vlgmr.msra.gmra.mrb[36].mxu0 %vm100_vm1, %v34_v8  ;;  %5822 = vmatmul.mubr.msk.bf16.vlgmr.msra.gmra.mrb[36].mxu1 %vm100_vm1, %v35_v9 }
  0x4f   :  { %5826 = vmatpush3.bf16.msra.mxu0 %v1026_v59  ;;  %5832 = vmatpush3.bf16.msra.mxu1 %v1072_v60 }
  0x50   :  { %5827 = vmatprep.mubr.msk.bf16.mxu0 %vm6365_vm2, %v6364_v2  ;;  %5833 = vmatprep.mubr.msk.bf16.mxu1 %vm6365_vm2, %v6364_v2 }
  0x51   :  { %5837 = vmatprep.subr.bf16.mxu0 %v6364_v2  ;;  %5843 = vmatprep.subr.bf16.mxu1 %v6364_v2 }
  0x56   :  { %5828 = vmatmul.mubr.msk.bf16.vlgmr.msra.gmra.mrb[40].mxu0 %vm100_vm1, %v36_v10  ;;  %5834 = vmatmul.mubr.msk.bf16.vlgmr.msra.gmra.mrb[40].mxu1 %vm100_vm1, %v37_v11 }
  0x57   :  { %5838 = vmatpush3.bf16.msra.mxu0 %v1118_v61  ;;  %5844 = vmatpush3.bf16.msra.mxu1 %v1164_v62 }
  0x58   :  { %5839 = vmatprep.mubr.msk.bf16.mxu0 %vm6365_vm2, %v6364_v2  ;;  %5845 = vmatprep.mubr.msk.bf16.mxu1 %vm6365_vm2, %v6364_v2 }
  0x59   :  { %5849 = vmatprep.subr.bf16.mxu0 %v6364_v2  ;;  %5855 = vmatprep.subr.bf16.mxu1 %v6364_v2 }
  0x5e   :  { %5840 = vmatmul.mubr.msk.bf16.vlgmr.msra.gmra.mrb[44].mxu0 %vm100_vm1, %v38_v12  ;;  %5846 = vmatmul.mubr.msk.bf16.vlgmr.msra.gmra.mrb[44].mxu1 %vm100_vm1, %v39_v13 }
  0x5f   :  { %5850 = vmatpush3.bf16.msra.mxu0 %v6576_v63  ;;  %5856 = vmatpush3.bf16.msra.mxu1 %v6579_v0 }
  0x60   :  { %5851 = vmatprep.mubr.msk.bf16.mxu0 %vm6365_vm2, %v6364_v2  ;;  %5857 = vmatprep.mubr.msk.bf16.mxu1 %vm6365_vm2, %v6364_v2 }
  0x61   :  { %5861 = vmatprep.subr.bf16.mxu0 %v6364_v2  ;;  %5867 = vmatprep.subr.bf16.mxu1 %v6364_v2 }
  0x62   :  { %8 = vsyncpa [#allocation3], 0  ;;  %v86_v20 = vld [vmem:[%s7459_s2 + $0x70] sm:$0xf]  ;;  %v87_v21 = vld [vmem:[%s7459_s2 + $0x74] sm:$0xf] }
  0x63   :  { %v42_v22 = vld [vmem:[%s7457_s0 + $0x68] sm:$0xf]  ;;  %v43_v23 = vld [vmem:[%s7457_s0 + $0x6c] sm:$0xf]  ;;  %v1394_v24 = vsel %vm104_vm0, %v86_v20, 0  ;;  %v1440_v25 = vsel %vm104_vm0, %v87_v21, 0 }
  0x64   :  { %v88_v26 = vld [vmem:[%s7459_s2 + $0x78] sm:$0xf]  ;;  %v89_v27 = vld [vmem:[%s7459_s2 + $0x7c] sm:$0xf]  ;;  %v44_v28 = vld [vmem:[%s7457_s0 + $0x70] sm:$0xf] }
  0x65   :  { %v45_v29 = vld [vmem:[%s7457_s0 + $0x74] sm:$0xf]  ;;  %v1486_v30 = vsel %vm104_vm0, %v88_v26, 0  ;;  %v1532_v31 = vsel %vm104_vm0, %v89_v27, 0  ;;  %v90_v32 = vld [vmem:[%s7459_s2 + $0x80] sm:$0xf] }
  0x66   :  { %5852 = vmatmul.mubr.msk.bf16.vlgmr.msra.gmra.mrb[48].mxu0 %vm100_vm1, %v40_v16  ;;  %5858 = vmatmul.mubr.msk.bf16.vlgmr.msra.gmra.mrb[48].mxu1 %vm100_vm1, %v41_v17  ;;  %v91_v33 = vld [vmem:[%s7459_s2 + $0x84] sm:$0xf]  ;;  %v46_v34 = vld [vmem:[%s7457_s0 + $0x78] sm:$0xf]  ;;  %v47_v35 = vld [vmem:[%s7457_s0 + $0x7c] sm:$0xf] }
  0x67   :  { %5862 = vmatpush3.bf16.msra.mxu0 %v1302_v18  ;;  %5868 = vmatpush3.bf16.msra.mxu1 %v1348_v19  ;;  %v1578_v36 = vsel %vm104_vm0, %v90_v32, 0  ;;  %v1624_v37 = vsel %vm104_vm0, %v91_v33, 0  ;;  %v92_v38 = vld [vmem:[%s7459_s2 + $0x88] sm:$0xf]  ;;  %v93_v39 = vld [vmem:[%s7459_s2 + $0x8c] sm:$0xf] }
  0x68   :  { %5863 = vmatprep.mubr.msk.bf16.mxu0 %vm6365_vm2, %v6364_v2  ;;  %5869 = vmatprep.mubr.msk.bf16.mxu1 %vm6365_vm2, %v6364_v2  ;;  %v48_v40 = vld [vmem:[%s7457_s0 + $0x80] sm:$0xf]  ;;  %v49_v41 = vld [vmem:[%s7457_s0 + $0x84] sm:$0xf]  ;;  %v1670_v42 = vsel %vm104_vm0, %v92_v38, 0  ;;  %v1716_v43 = vsel %vm104_vm0, %v93_v39, 0 }
  0x69   :  { %5873 = vmatprep.subr.bf16.mxu0 %v6364_v2  ;;  %5879 = vmatprep.subr.bf16.mxu1 %v6364_v2  ;;  %v94_v44 = vld [vmem:[%s7459_s2 + $0x90] sm:$0xf]  ;;  %v95_v45 = vld [vmem:[%s7459_s2 + $0x94] sm:$0xf]  ;;  %v50_v46 = vld [vmem:[%s7457_s0 + $0x88] sm:$0xf] }
  0x6a   :  { %v51_v47 = vld [vmem:[%s7457_s0 + $0x8c] sm:$0xf]  ;;  %v1762_v48 = vsel %vm104_vm0, %v94_v44, 0  ;;  %v1808_v49 = vsel %vm104_vm0, %v95_v45, 0  ;;  %v96_v50 = vld [vmem:[%s7459_s2 + $0x98] sm:$0xf] }
  0x6b   :  { %v97_v51 = vld [vmem:[%s7459_s2 + $0x9c] sm:$0xf]  ;;  %v52_v52 = vld [vmem:[%s7457_s0 + $0x90] sm:$0xf]  ;;  %v53_v53 = vld [vmem:[%s7457_s0 + $0x94] sm:$0xf] }
  0x6c   :  { %v1854_v54 = vsel %vm104_vm0, %v96_v50, 0  ;;  %v1900_v55 = vsel %vm104_vm0, %v97_v51, 0  ;;  %v98_v56 = vld [vmem:[%s7459_s2 + $0xa0] sm:$0xf]  ;;  %v99_v57 = vld [vmem:[%s7459_s2 + $0xa4] sm:$0xf] }
  0x6d   :  { %v54_v58 = vld [vmem:[%s7457_s0 + $0x98] sm:$0xf]  ;;  %v55_v59 = vld [vmem:[%s7457_s0 + $0x9c] sm:$0xf]  ;;  %v1946_v60 = vsel %vm104_vm0, %v98_v56, 0  ;;  %v1992_v61 = vsel %vm104_vm0, %v99_v57, 0 }
  0x6e   :  { %5864 = vmatmul.mubr.msk.bf16.vlgmr.msra.gmra.mrb[52].mxu0 %vm100_vm1, %v42_v22  ;;  %5870 = vmatmul.mubr.msk.bf16.vlgmr.msra.gmra.mrb[52].mxu1 %vm100_vm1, %v43_v23  ;;  %v56_v62 = vld [vmem:[%s7457_s0 + $0xa0] sm:$0xf]  ;;  %v57_v63 = vld [vmem:[%s7457_s0 + $0xa4] sm:$0xf]  ;;  %v6257_v1 = vld [vmem:[%s7458_s1 + $0x10] sm:$0xff]   ;;  %vm5100_vm3 = vcmask 261120  }
  0x6f   :  { %5874 = vmatpush3.bf16.msra.mxu0 %v1394_v24  ;;  %5880 = vmatpush3.bf16.msra.mxu1 %v1440_v25  ;;  %v6256_v0 = vld [vmem:[%s7458_s1] sm:$0xff]   ;;  %v6258_v14 = vld [vmem:[%s7458_s1 + $0x8] sm:$0xff]   ;;  %v6259_v15 = vld [vmem:[%s7458_s1 + $0x18] sm:$0xff]  }
  0x70   :  { %5875 = vmatprep.mubr.msk.bf16.mxu0 %vm6365_vm2, %v6364_v2  ;;  %5881 = vmatprep.mubr.msk.bf16.mxu1 %vm6365_vm2, %v6364_v2  ;;  %v6260_v16 = vld [vmem:[%s7458_s1 + $0x20] sm:$0xff]   ;;  %v6261_v17 = vld [vmem:[%s7458_s1 + $0x30] sm:$0xff]  }
  0x71   :  { %5885 = vmatprep.subr.bf16.mxu0 %v6364_v2  ;;  %5891 = vmatprep.subr.bf16.mxu1 %v6364_v2  ;;  %v6264_v32 = vld [vmem:[%s7458_s1 + $0x40] sm:$0xff]   ;;  %v6265_v33 = vld [vmem:[%s7458_s1 + $0x50] sm:$0xff]  }
  0x76   :  { %5876 = vmatmul.mubr.msk.bf16.vlgmr.msra.gmra.mrb[56].mxu0 %vm100_vm1, %v44_v28  ;;  %5882 = vmatmul.mubr.msk.bf16.vlgmr.msra.gmra.mrb[56].mxu1 %vm100_vm1, %v45_v29 }
  0x77   :  { %5886 = vmatpush3.bf16.msra.mxu0 %v1486_v30  ;;  %5892 = vmatpush3.bf16.msra.mxu1 %v1532_v31  ;;  %v6262_v30 = vld [vmem:[%s7458_s1 + $0x28] sm:$0xff]   ;;  %v6263_v31 = vld [vmem:[%s7458_s1 + $0x38] sm:$0xff]  }
  0x78   :  { %5887 = vmatprep.mubr.msk.bf16.mxu0 %vm6365_vm2, %v6364_v2  ;;  %5893 = vmatprep.mubr.msk.bf16.mxu1 %vm6365_vm2, %v6364_v2 }
  0x79   :  { %5897 = vmatprep.subr.bf16.mxu0 %v6364_v2  ;;  %5903 = vmatprep.subr.bf16.mxu1 %v6364_v2 }
  0x7e   :  { %5888 = vmatmul.mubr.msk.bf16.vlgmr.msra.gmra.mrb[60].mxu0 %vm100_vm1, %v46_v34  ;;  %5894 = vmatmul.mubr.msk.bf16.vlgmr.msra.gmra.mrb[60].mxu1 %vm100_vm1, %v47_v35 }
  0x7f   :  { %5898 = vmatpush3.bf16.msra.mxu0 %v1578_v36  ;;  %5904 = vmatpush3.bf16.msra.mxu1 %v1624_v37 }
  0x80   :  { %5899 = vmatprep.mubr.msk.bf16.mxu0 %vm6365_vm2, %v6364_v2  ;;  %5905 = vmatprep.mubr.msk.bf16.mxu1 %vm6365_vm2, %v6364_v2 }
  0x81   :  { %5909 = vmatprep.subr.bf16.mxu0 %v6364_v2  ;;  %5915 = vmatprep.subr.bf16.mxu1 %v6364_v2 }
  0x86   :  { %5900 = vmatmul.mubr.msk.bf16.vlgmr.msra.gmra.mrb[64].mxu0 %vm100_vm1, %v48_v40  ;;  %5906 = vmatmul.mubr.msk.bf16.vlgmr.msra.gmra.mrb[64].mxu1 %vm100_vm1, %v49_v41 }
  0x87   :  { %5910 = vmatpush3.bf16.msra.mxu0 %v1670_v42  ;;  %5916 = vmatpush3.bf16.msra.mxu1 %v1716_v43 }
  0x88   :  { %5911 = vmatprep.mubr.msk.bf16.mxu0 %vm6365_vm2, %v6364_v2  ;;  %5917 = vmatprep.mubr.msk.bf16.mxu1 %vm6365_vm2, %v6364_v2 }
  0x89   :  { %5921 = vmatprep.subr.bf16.mxu0 %v6364_v2  ;;  %5927 = vmatprep.subr.bf16.mxu1 %v6364_v2 }
  0x8e   :  { %5912 = vmatmul.mubr.msk.bf16.vlgmr.msra.gmra.mrb[68].mxu0 %vm100_vm1, %v50_v46  ;;  %5918 = vmatmul.mubr.msk.bf16.vlgmr.msra.gmra.mrb[68].mxu1 %vm100_vm1, %v51_v47  ;;  %v6266_v46 = vld [vmem:[%s7458_s1 + $0x48] sm:$0xff]   ;;  %v6267_v47 = vld [vmem:[%s7458_s1 + $0x58] sm:$0xff]  }
  0x8f   :  { %5922 = vmatpush3.bf16.msra.mxu0 %v1762_v48  ;;  %5928 = vmatpush3.bf16.msra.mxu1 %v1808_v49  ;;  %v6268_v48 = vld [vmem:[%s7458_s1 + $0x60] sm:$0xff]   ;;  %v6269_v49 = vld [vmem:[%s7458_s1 + $0x70] sm:$0xff]  }
  0x90   :  { %5923 = vmatprep.mubr.msk.bf16.mxu0 %vm6365_vm2, %v6364_v2  ;;  %5929 = vmatprep.mubr.msk.bf16.mxu1 %vm6365_vm2, %v6364_v2 }
  0x91   :  { %5933 = vmatprep.subr.bf16.mxu0 %v6364_v2  ;;  %5939 = vmatprep.subr.bf16.mxu1 %v6364_v2 }
  0x96   :  { %5924 = vmatmul.mubr.msk.bf16.vlgmr.msra.gmra.mrb[72].mxu0 %vm100_vm1, %v52_v52  ;;  %5930 = vmatmul.mubr.msk.bf16.vlgmr.msra.gmra.mrb[72].mxu1 %vm100_vm1, %v53_v53 }
  0x97   :  { %5934 = vmatpush3.bf16.msra.mxu0 %v1854_v54  ;;  %5940 = vmatpush3.bf16.msra.mxu1 %v1900_v55 }
  0x98   :  { %5935 = vmatprep.mubr.msk.bf16.mxu0 %vm6365_vm2, %v6364_v2  ;;  %5941 = vmatprep.mubr.msk.bf16.mxu1 %vm6365_vm2, %v6364_v2 }
  0x99   :  { %5945 = vmatprep.subr.bf16.mxu0 %v6364_v2  ;;  %5951 = vmatprep.subr.bf16.mxu1 %v6364_v2 }
  0x9e   :  { %5936 = vmatmul.mubr.msk.bf16.vlgmr.msra.gmra.mrb[76].mxu0 %vm100_vm1, %v54_v58  ;;  %5942 = vmatmul.mubr.msk.bf16.vlgmr.msra.gmra.mrb[76].mxu1 %vm100_vm1, %v55_v59 }
  0x9f   :  { %5946 = vmatpush3.bf16.msra.mxu0 %v1946_v60  ;;  %5952 = vmatpush3.bf16.msra.mxu1 %v1992_v61 }
  0xa0   :  { %5947 = vmatprep.mubr.msk.bf16.mxu0 %vm6365_vm2, %v6364_v2  ;;  %5953 = vmatprep.mubr.msk.bf16.mxu1 %vm6365_vm2, %v6364_v2 }
  0xa6   :  { %5948 = vmatmul.mubr.msk.bf16.vlgmr.msra.gmra.mrb[80].mxu0 %vm100_vm1, %v56_v62  ;;  %5954 = vmatmul.mubr.msk.bf16.vlgmr.msra.gmra.mrb[80].mxu1 %vm100_vm1, %v57_v63  ;;  %v6270_v62 = vld [vmem:[%s7458_s1 + $0x68] sm:$0xff]   ;;  %v6271_v63 = vld [vmem:[%s7458_s1 + $0x78] sm:$0xff]  }
  0xa7   :  { %5959 = vmatprep.mubr.msk.bf16.mxu0 %vm100_vm1, %v6256_v0  ;;  %5965 = vmatprep.mubr.msk.bf16.mxu1 %vm100_vm1, %v6257_v1  ;;  %v6272_v0 = vld [vmem:[%s7458_s1 + $0x80] sm:$0xff]   ;;  %v6273_v1 = vld [vmem:[%s7458_s1 + $0x90] sm:$0xff]  }
  0xd9   :  { %v142_v2 = vpop.f32.mrb[0].mxu0  ;;  %v188_v3 = vpop.f32.mrb[0].mxu1 }
  0xda   :  { %v2202_v4 = vpack.c.bf16 %v142_v2, %v142_v2  ;;  %v2203_v5 = vpack.c.bf16 %v188_v3, %v188_v3  ;;  %v5709_v6 = vpop.f32.mrb[1].mxu0  ;;  %v5715_v7 = vpop.f32.mrb[1].mxu1 }
  0xdb   :  { %v145_v8 = vpop.f32.mrb[2].mxu0  ;;  %v191_v9 = vpop.f32.mrb[2].mxu1 }
  0xdc   :  { %v2261_v10 = vsel %vm104_vm0, %v2202_v4, 0  ;;  %v2329_v11 = vsel %vm104_vm0, %v2203_v5, 0  ;;  %v5710_v12 = vpop.f32.mrb[3].mxu0  ;;  %v5716_v13 = vpop.f32.mrb[3].mxu1  ;;  %6209 = vmatprep.subr.msk.bf16.mxu0 %vm104_vm0, %v2202_v4  ;;  %6210 = vmatprep.subr.msk.bf16.mxu1 %vm104_vm0, %v2203_v5 }
  0xdd   :  { %5958 = vmatpush3.bf16.msra.mxu0 %v2261_v10  ;;  %5964 = vmatpush3.bf16.msra.mxu1 %v2329_v11 }
  0xe0   :  { %5960 = vmatmul.mubr.msk.bf16.vlgmr.msra.gmra.mrb[84].mxu0 %vm100_vm1, %v6258_v14  ;;  %5966 = vmatmul.mubr.msk.bf16.vlgmr.msra.gmra.mrb[84].mxu1 %vm100_vm1, %v6259_v15  ;;  %v6274_v14 = vld [vmem:[%s7458_s1 + $0x88] sm:$0xff]   ;;  %v6275_v15 = vld [vmem:[%s7458_s1 + $0x98] sm:$0xff]  }
  0xe1   :  { %v234_v18 = vpop.f32.mrb[4].mxu0  ;;  %v280_v19 = vpop.f32.mrb[4].mxu1  ;;  %5971 = vmatprep.mubr.msk.bf16.mxu0 %vm100_vm1, %v6260_v16  ;;  %5977 = vmatprep.mubr.msk.bf16.mxu1 %vm100_vm1, %v6261_v17  ;;  %v6276_v16 = vld [vmem:[%s7458_s1 + $0xa0] sm:$0xff]   ;;  %v6277_v17 = vld [vmem:[%s7458_s1 + $0xb0] sm:$0xff]  }
  0xe2   :  { %v2204_v20 = vpack.c.bf16 %v234_v18, %v234_v18  ;;  %v2205_v21 = vpack.c.bf16 %v280_v19, %v280_v19  ;;  %v5721_v22 = vpop.f32.mrb[5].mxu0  ;;  %v5727_v23 = vpop.f32.mrb[5].mxu1 }
  0xe3   :  { %v237_v24 = vpop.f32.mrb[6].mxu0  ;;  %v283_v25 = vpop.f32.mrb[6].mxu1 }
  0xe4   :  { %v2397_v26 = vsel %vm104_vm0, %v2204_v20, 0  ;;  %v2465_v27 = vsel %vm104_vm0, %v2205_v21, 0  ;;  %v5722_v28 = vpop.f32.mrb[7].mxu0  ;;  %v5728_v29 = vpop.f32.mrb[7].mxu1  ;;  %6211 = vmatprep.subr.msk.bf16.mxu0 %vm104_vm0, %v2204_v20  ;;  %6212 = vmatprep.subr.msk.bf16.mxu1 %vm104_vm0, %v2205_v21 }
  0xe5   :  { %5970 = vmatpush3.bf16.msra.mxu0 %v2397_v26  ;;  %5976 = vmatpush3.bf16.msra.mxu1 %v2465_v27 }
  0xe8   :  { %5972 = vmatmul.mubr.msk.bf16.vlgmr.msra.gmra.mrb[88].mxu0 %vm100_vm1, %v6262_v30  ;;  %5978 = vmatmul.mubr.msk.bf16.vlgmr.msra.gmra.mrb[88].mxu1 %vm100_vm1, %v6263_v31  ;;  %v6278_v30 = vld [vmem:[%s7458_s1 + $0xa8] sm:$0xff]   ;;  %v6279_v31 = vld [vmem:[%s7458_s1 + $0xb8] sm:$0xff]  }
  0xe9   :  { %v326_v34 = vpop.f32.mrb[8].mxu0  ;;  %v372_v35 = vpop.f32.mrb[8].mxu1  ;;  %5983 = vmatprep.mubr.msk.bf16.mxu0 %vm100_vm1, %v6264_v32  ;;  %5989 = vmatprep.mubr.msk.bf16.mxu1 %vm100_vm1, %v6265_v33  ;;  %v6280_v32 = vld [vmem:[%s7458_s1 + $0xc0] sm:$0xff]   ;;  %v6281_v33 = vld [vmem:[%s7458_s1 + $0xd0] sm:$0xff]  }
  0xea   :  { %v2206_v36 = vpack.c.bf16 %v326_v34, %v326_v34  ;;  %v2207_v37 = vpack.c.bf16 %v372_v35, %v372_v35  ;;  %v5733_v38 = vpop.f32.mrb[9].mxu0  ;;  %v5739_v39 = vpop.f32.mrb[9].mxu1 }
  0xeb   :  { %v329_v40 = vpop.f32.mrb[10].mxu0  ;;  %v375_v41 = vpop.f32.mrb[10].mxu1 }
  0xec   :  { %v2533_v42 = vsel %vm104_vm0, %v2206_v36, 0  ;;  %v2601_v43 = vsel %vm104_vm0, %v2207_v37, 0  ;;  %v5734_v44 = vpop.f32.mrb[11].mxu0  ;;  %v5740_v45 = vpop.f32.mrb[11].mxu1  ;;  %6213 = vmatprep.subr.msk.bf16.mxu0 %vm104_vm0, %v2206_v36  ;;  %6214 = vmatprep.subr.msk.bf16.mxu1 %vm104_vm0, %v2207_v37 }
  0xed   :  { %5982 = vmatpush3.bf16.msra.mxu0 %v2533_v42  ;;  %5988 = vmatpush3.bf16.msra.mxu1 %v2601_v43 }
  0xf0   :  { %5984 = vmatmul.mubr.msk.bf16.vlgmr.msra.gmra.mrb[92].mxu0 %vm100_vm1, %v6266_v46  ;;  %5990 = vmatmul.mubr.msk.bf16.vlgmr.msra.gmra.mrb[92].mxu1 %vm100_vm1, %v6267_v47  ;;  %v6282_v46 = vld [vmem:[%s7458_s1 + $0xc8] sm:$0xff]   ;;  %v6283_v47 = vld [vmem:[%s7458_s1 + $0xd8] sm:$0xff]  }
  0xf1   :  { %v418_v50 = vpop.f32.mrb[12].mxu0  ;;  %v464_v51 = vpop.f32.mrb[12].mxu1  ;;  %5995 = vmatprep.mubr.msk.bf16.mxu0 %vm100_vm1, %v6268_v48  ;;  %6001 = vmatprep.mubr.msk.bf16.mxu1 %vm100_vm1, %v6269_v49  ;;  %v6284_v48 = vld [vmem:[%s7458_s1 + $0xe0] sm:$0xff]   ;;  %v6285_v49 = vld [vmem:[%s7458_s1 + $0xf0] sm:$0xff]  }
  0xf2   :  { %v2208_v52 = vpack.c.bf16 %v418_v50, %v418_v50  ;;  %v2209_v53 = vpack.c.bf16 %v464_v51, %v464_v51  ;;  %v5745_v54 = vpop.f32.mrb[13].mxu0  ;;  %v5751_v55 = vpop.f32.mrb[13].mxu1 }
  0xf3   :  { %v421_v56 = vpop.f32.mrb[14].mxu0  ;;  %v467_v57 = vpop.f32.mrb[14].mxu1 }
  0xf4   :  { %v2669_v58 = vsel %vm104_vm0, %v2208_v52, 0  ;;  %v2737_v59 = vsel %vm104_vm0, %v2209_v53, 0  ;;  %v5746_v60 = vpop.f32.mrb[15].mxu0  ;;  %v5752_v61 = vpop.f32.mrb[15].mxu1  ;;  %6215 = vmatprep.subr.msk.bf16.mxu0 %vm104_vm0, %v2208_v52  ;;  %6216 = vmatprep.subr.msk.bf16.mxu1 %vm104_vm0, %v2209_v53 }
  0xf5   :  { %5994 = vmatpush3.bf16.msra.mxu0 %v2669_v58  ;;  %6000 = vmatpush3.bf16.msra.mxu1 %v2737_v59 }
  0xf8   :  { %5996 = vmatmul.mubr.msk.bf16.vlgmr.msra.gmra.mrb[96].mxu0 %vm100_vm1, %v6270_v62  ;;  %6002 = vmatmul.mubr.msk.bf16.vlgmr.msra.gmra.mrb[96].mxu1 %vm100_vm1, %v6271_v63  ;;  %v6286_v62 = vld [vmem:[%s7458_s1 + $0xe8] sm:$0xff]   ;;  %v6287_v63 = vld [vmem:[%s7458_s1 + $0xf8] sm:$0xff]  }
  0xf9   :  { %v510_v2 = vpop.f32.mrb[16].mxu0  ;;  %v556_v3 = vpop.f32.mrb[16].mxu1  ;;  %6007 = vmatprep.mubr.msk.bf16.mxu0 %vm100_vm1, %v6272_v0  ;;  %6013 = vmatprep.mubr.msk.bf16.mxu1 %vm100_vm1, %v6273_v1  ;;  %v6288_v0 = vld [vmem:[%s7458_s1 + $0x100] sm:$0xff]   ;;  %v6289_v1 = vld [vmem:[%s7458_s1 + $0x110] sm:$0xff]  }
  0xfa   :  { %v2210_v4 = vpack.c.bf16 %v510_v2, %v510_v2  ;;  %v2211_v5 = vpack.c.bf16 %v556_v3, %v556_v3  ;;  %v5757_v6 = vpop.f32.mrb[17].mxu0  ;;  %v5763_v7 = vpop.f32.mrb[17].mxu1 }
  0xfb   :  { %v513_v8 = vpop.f32.mrb[18].mxu0  ;;  %v559_v9 = vpop.f32.mrb[18].mxu1 }
  0xfc   :  { %v2805_v10 = vsel %vm104_vm0, %v2210_v4, 0  ;;  %v2873_v11 = vsel %vm104_vm0, %v2211_v5, 0  ;;  %v5758_v12 = vpop.f32.mrb[19].mxu0  ;;  %v5764_v13 = vpop.f32.mrb[19].mxu1  ;;  %6217 = vmatprep.subr.msk.bf16.mxu0 %vm104_vm0, %v2210_v4  ;;  %6218 = vmatprep.subr.msk.bf16.mxu1 %vm104_vm0, %v2211_v5 }
  0xfd   :  { %6006 = vmatpush3.bf16.msra.mxu0 %v2805_v10  ;;  %6012 = vmatpush3.bf16.msra.mxu1 %v2873_v11 }
 0x100   :  { %6008 = vmatmul.mubr.msk.bf16.vlgmr.msra.gmra.mrb[100].mxu0 %vm100_vm1, %v6274_v14  ;;  %6014 = vmatmul.mubr.msk.bf16.vlgmr.msra.gmra.mrb[100].mxu1 %vm100_vm1, %v6275_v15  ;;  %v6290_v14 = vld [vmem:[%s7458_s1 + $0x108] sm:$0xff]   ;;  %v6291_v15 = vld [vmem:[%s7458_s1 + $0x118] sm:$0xff]  }
 0x101   :  { %v602_v18 = vpop.f32.mrb[20].mxu0  ;;  %v648_v19 = vpop.f32.mrb[20].mxu1  ;;  %6019 = vmatprep.mubr.msk.bf16.mxu0 %vm100_vm1, %v6276_v16  ;;  %6025 = vmatprep.mubr.msk.bf16.mxu1 %vm100_vm1, %v6277_v17  ;;  %v6292_v16 = vld [vmem:[%s7458_s1 + $0x120] sm:$0xff]   ;;  %v6293_v17 = vld [vmem:[%s7458_s1 + $0x130] sm:$0xff]  }
 0x102   :  { %v2212_v20 = vpack.c.bf16 %v602_v18, %v602_v18  ;;  %v2213_v21 = vpack.c.bf16 %v648_v19, %v648_v19  ;;  %v5769_v22 = vpop.f32.mrb[21].mxu0  ;;  %v5775_v23 = vpop.f32.mrb[21].mxu1 }
 0x103   :  { %v605_v24 = vpop.f32.mrb[22].mxu0  ;;  %v651_v25 = vpop.f32.mrb[22].mxu1 }
 0x104   :  { %v2941_v26 = vsel %vm104_vm0, %v2212_v20, 0  ;;  %v3009_v27 = vsel %vm104_vm0, %v2213_v21, 0  ;;  %v5770_v28 = vpop.f32.mrb[23].mxu0  ;;  %v5776_v29 = vpop.f32.mrb[23].mxu1  ;;  %6219 = vmatprep.subr.msk.bf16.mxu0 %vm104_vm0, %v2212_v20  ;;  %6220 = vmatprep.subr.msk.bf16.mxu1 %vm104_vm0, %v2213_v21 }
 0x105   :  { %6018 = vmatpush3.bf16.msra.mxu0 %v2941_v26  ;;  %6024 = vmatpush3.bf16.msra.mxu1 %v3009_v27 }
 0x108   :  { %6020 = vmatmul.mubr.msk.bf16.vlgmr.msra.gmra.mrb[104].mxu0 %vm100_vm1, %v6278_v30  ;;  %6026 = vmatmul.mubr.msk.bf16.vlgmr.msra.gmra.mrb[104].mxu1 %vm100_vm1, %v6279_v31  ;;  %v6294_v30 = vld [vmem:[%s7458_s1 + $0x128] sm:$0xff]   ;;  %v6295_v31 = vld [vmem:[%s7458_s1 + $0x138] sm:$0xff]  }
 0x109   :  { %v694_v34 = vpop.f32.mrb[24].mxu0  ;;  %v740_v35 = vpop.f32.mrb[24].mxu1  ;;  %6031 = vmatprep.mubr.msk.bf16.mxu0 %vm100_vm1, %v6280_v32  ;;  %6037 = vmatprep.mubr.msk.bf16.mxu1 %vm100_vm1, %v6281_v33  ;;  %v6296_v32 = vld [vmem:[%s7458_s1 + $0x140] sm:$0xff]   ;;  %v6297_v33 = vld [vmem:[%s7458_s1 + $0x150] sm:$0xff]  }
 0x10a   :  { %v2214_v36 = vpack.c.bf16 %v694_v34, %v694_v34  ;;  %v2215_v37 = vpack.c.bf16 %v740_v35, %v740_v35  ;;  %v5781_v38 = vpop.f32.mrb[25].mxu0  ;;  %v5787_v39 = vpop.f32.mrb[25].mxu1 }
 0x10b   :  { %v697_v40 = vpop.f32.mrb[26].mxu0  ;;  %v743_v41 = vpop.f32.mrb[26].mxu1 }
 0x10c   :  { %v3077_v42 = vsel %vm104_vm0, %v2214_v36, 0  ;;  %v3145_v43 = vsel %vm104_vm0, %v2215_v37, 0  ;;  %v5782_v44 = vpop.f32.mrb[27].mxu0  ;;  %v5788_v45 = vpop.f32.mrb[27].mxu1  ;;  %6221 = vmatprep.subr.msk.bf16.mxu0 %vm104_vm0, %v2214_v36  ;;  %6222 = vmatprep.subr.msk.bf16.mxu1 %vm104_vm0, %v2215_v37 }
 0x10d   :  { %6030 = vmatpush3.bf16.msra.mxu0 %v3077_v42  ;;  %6036 = vmatpush3.bf16.msra.mxu1 %v3145_v43 }
 0x110   :  { %6032 = vmatmul.mubr.msk.bf16.vlgmr.msra.gmra.mrb[108].mxu0 %vm100_vm1, %v6282_v46  ;;  %6038 = vmatmul.mubr.msk.bf16.vlgmr.msra.gmra.mrb[108].mxu1 %vm100_vm1, %v6283_v47  ;;  %v6298_v46 = vld [vmem:[%s7458_s1 + $0x148] sm:$0xff]   ;;  %v6299_v47 = vld [vmem:[%s7458_s1 + $0x158] sm:$0xff]  }
 0x111   :  { %v786_v50 = vpop.f32.mrb[28].mxu0  ;;  %v832_v51 = vpop.f32.mrb[28].mxu1  ;;  %6043 = vmatprep.mubr.msk.bf16.mxu0 %vm100_vm1, %v6284_v48  ;;  %6049 = vmatprep.mubr.msk.bf16.mxu1 %vm100_vm1, %v6285_v49  ;;  %v6300_v48 = vld [vmem:[%s7458_s1 + $0x160] sm:$0xff]   ;;  %v6301_v49 = vld [vmem:[%s7458_s1 + $0x170] sm:$0xff]  }
 0x112   :  { %v2216_v52 = vpack.c.bf16 %v786_v50, %v786_v50  ;;  %v2217_v53 = vpack.c.bf16 %v832_v51, %v832_v51  ;;  %v5793_v54 = vpop.f32.mrb[29].mxu0  ;;  %v5799_v55 = vpop.f32.mrb[29].mxu1 }
 0x113   :  { %v789_v56 = vpop.f32.mrb[30].mxu0  ;;  %v835_v57 = vpop.f32.mrb[30].mxu1 }
 0x114   :  { %v3213_v58 = vsel %vm104_vm0, %v2216_v52, 0  ;;  %v3281_v59 = vsel %vm104_vm0, %v2217_v53, 0  ;;  %v5794_v60 = vpop.f32.mrb[31].mxu0  ;;  %v5800_v61 = vpop.f32.mrb[31].mxu1  ;;  %6223 = vmatprep.subr.msk.bf16.mxu0 %vm104_vm0, %v2216_v52  ;;  %6224 = vmatprep.subr.msk.bf16.mxu1 %vm104_vm0, %v2217_v53 }
 0x115   :  { %6042 = vmatpush3.bf16.msra.mxu0 %v3213_v58  ;;  %6048 = vmatpush3.bf16.msra.mxu1 %v3281_v59 }
 0x118   :  { %6044 = vmatmul.mubr.msk.bf16.vlgmr.msra.gmra.mrb[112].mxu0 %vm100_vm1, %v6286_v62  ;;  %6050 = vmatmul.mubr.msk.bf16.vlgmr.msra.gmra.mrb[112].mxu1 %vm100_vm1, %v6287_v63  ;;  %v6302_v62 = vld [vmem:[%s7458_s1 + $0x168] sm:$0xff]   ;;  %v6303_v63 = vld [vmem:[%s7458_s1 + $0x178] sm:$0xff]  }
 0x119   :  { %v878_v2 = vpop.f32.mrb[32].mxu0  ;;  %v924_v3 = vpop.f32.mrb[32].mxu1  ;;  %6055 = vmatprep.mubr.msk.bf16.mxu0 %vm100_vm1, %v6288_v0  ;;  %6061 = vmatprep.mubr.msk.bf16.mxu1 %vm100_vm1, %v6289_v1  ;;  %v6304_v0 = vld [vmem:[%s7458_s1 + $0x180] sm:$0xff]   ;;  %v6305_v1 = vld [vmem:[%s7458_s1 + $0x190] sm:$0xff]  }
 0x11a   :  { %v2218_v4 = vpack.c.bf16 %v878_v2, %v878_v2  ;;  %v2219_v5 = vpack.c.bf16 %v924_v3, %v924_v3  ;;  %v5805_v6 = vpop.f32.mrb[33].mxu0  ;;  %v5811_v7 = vpop.f32.mrb[33].mxu1 }
 0x11b   :  { %v881_v8 = vpop.f32.mrb[34].mxu0  ;;  %v927_v9 = vpop.f32.mrb[34].mxu1 }
 0x11c   :  { %v3349_v10 = vsel %vm104_vm0, %v2218_v4, 0  ;;  %v3417_v11 = vsel %vm104_vm0, %v2219_v5, 0  ;;  %v5806_v12 = vpop.f32.mrb[35].mxu0  ;;  %v5812_v13 = vpop.f32.mrb[35].mxu1  ;;  %6225 = vmatprep.subr.msk.bf16.mxu0 %vm104_vm0, %v2218_v4  ;;  %6226 = vmatprep.subr.msk.bf16.mxu1 %vm104_vm0, %v2219_v5 }
 0x11d   :  { %6054 = vmatpush3.bf16.msra.mxu0 %v3349_v10  ;;  %6060 = vmatpush3.bf16.msra.mxu1 %v3417_v11 }
 0x120   :  { %6056 = vmatmul.mubr.msk.bf16.vlgmr.msra.gmra.mrb[116].mxu0 %vm100_vm1, %v6290_v14  ;;  %6062 = vmatmul.mubr.msk.bf16.vlgmr.msra.gmra.mrb[116].mxu1 %vm100_vm1, %v6291_v15  ;;  %v6306_v14 = vld [vmem:[%s7458_s1 + $0x188] sm:$0xff]   ;;  %v6307_v15 = vld [vmem:[%s7458_s1 + $0x198] sm:$0xff]  }
 0x121   :  { %v970_v18 = vpop.f32.mrb[36].mxu0  ;;  %v1016_v19 = vpop.f32.mrb[36].mxu1  ;;  %6067 = vmatprep.mubr.msk.bf16.mxu0 %vm100_vm1, %v6292_v16  ;;  %6073 = vmatprep.mubr.msk.bf16.mxu1 %vm100_vm1, %v6293_v17  ;;  %v6308_v16 = vld [vmem:[%s7458_s1 + $0x1a0] sm:$0xff]   ;;  %v6309_v17 = vld [vmem:[%s7458_s1 + $0x1b0] sm:$0xff]  }
 0x122   :  { %v2220_v20 = vpack.c.bf16 %v970_v18, %v970_v18  ;;  %v2221_v21 = vpack.c.bf16 %v1016_v19, %v1016_v19  ;;  %v5817_v22 = vpop.f32.mrb[37].mxu0  ;;  %v5823_v23 = vpop.f32.mrb[37].mxu1 }
 0x123   :  { %v973_v24 = vpop.f32.mrb[38].mxu0  ;;  %v1019_v25 = vpop.f32.mrb[38].mxu1 }
 0x124   :  { %v3485_v26 = vsel %vm104_vm0, %v2220_v20, 0  ;;  %v3553_v27 = vsel %vm104_vm0, %v2221_v21, 0  ;;  %v5818_v28 = vpop.f32.mrb[39].mxu0  ;;  %v5824_v29 = vpop.f32.mrb[39].mxu1  ;;  %6227 = vmatprep.subr.msk.bf16.mxu0 %vm104_vm0, %v2220_v20  ;;  %6228 = vmatprep.subr.msk.bf16.mxu1 %vm104_vm0, %v2221_v21 }
 0x125   :  { %6066 = vmatpush3.bf16.msra.mxu0 %v3485_v26  ;;  %6072 = vmatpush3.bf16.msra.mxu1 %v3553_v27 }
 0x128   :  { %6068 = vmatmul.mubr.msk.bf16.vlgmr.msra.gmra.mrb[120].mxu0 %vm100_vm1, %v6294_v30  ;;  %6074 = vmatmul.mubr.msk.bf16.vlgmr.msra.gmra.mrb[120].mxu1 %vm100_vm1, %v6295_v31  ;;  %v6310_v30 = vld [vmem:[%s7458_s1 + $0x1a8] sm:$0xff]   ;;  %v6311_v31 = vld [vmem:[%s7458_s1 + $0x1b8] sm:$0xff]  }
 0x129   :  { %v1062_v34 = vpop.f32.mrb[40].mxu0  ;;  %v1108_v35 = vpop.f32.mrb[40].mxu1  ;;  %6079 = vmatprep.mubr.msk.bf16.mxu0 %vm100_vm1, %v6296_v32  ;;  %6085 = vmatprep.mubr.msk.bf16.mxu1 %vm100_vm1, %v6297_v33  ;;  %v6312_v32 = vld [vmem:[%s7458_s1 + $0x1c0] sm:$0xff]   ;;  %v6313_v33 = vld [vmem:[%s7458_s1 + $0x1d0] sm:$0xff]  }
 0x12a   :  { %v2222_v36 = vpack.c.bf16 %v1062_v34, %v1062_v34  ;;  %v2223_v37 = vpack.c.bf16 %v1108_v35, %v1108_v35  ;;  %v5829_v38 = vpop.f32.mrb[41].mxu0  ;;  %v5835_v39 = vpop.f32.mrb[41].mxu1 }
 0x12b   :  { %v1065_v40 = vpop.f32.mrb[42].mxu0  ;;  %v1111_v41 = vpop.f32.mrb[42].mxu1 }
 0x12c   :  { %v3621_v42 = vsel %vm104_vm0, %v2222_v36, 0  ;;  %v3689_v43 = vsel %vm104_vm0, %v2223_v37, 0  ;;  %v5830_v44 = vpop.f32.mrb[43].mxu0  ;;  %v5836_v45 = vpop.f32.mrb[43].mxu1  ;;  %6229 = vmatprep.subr.msk.bf16.mxu0 %vm104_vm0, %v2222_v36  ;;  %6230 = vmatprep.subr.msk.bf16.mxu1 %vm104_vm0, %v2223_v37 }
 0x12d   :  { %6078 = vmatpush3.bf16.msra.mxu0 %v3621_v42  ;;  %6084 = vmatpush3.bf16.msra.mxu1 %v3689_v43 }
 0x130   :  { %6080 = vmatmul.mubr.msk.bf16.vlgmr.msra.gmra.mrb[124].mxu0 %vm100_vm1, %v6298_v46  ;;  %6086 = vmatmul.mubr.msk.bf16.vlgmr.msra.gmra.mrb[124].mxu1 %vm100_vm1, %v6299_v47  ;;  %v6314_v46 = vld [vmem:[%s7458_s1 + $0x1c8] sm:$0xff]   ;;  %v6315_v47 = vld [vmem:[%s7458_s1 + $0x1d8] sm:$0xff]  }
 0x131   :  { %v1154_v50 = vpop.f32.mrb[44].mxu0  ;;  %v1200_v51 = vpop.f32.mrb[44].mxu1  ;;  %6091 = vmatprep.mubr.msk.bf16.mxu0 %vm100_vm1, %v6300_v48  ;;  %6097 = vmatprep.mubr.msk.bf16.mxu1 %vm100_vm1, %v6301_v49  ;;  %v6316_v48 = vld [vmem:[%s7458_s1 + $0x1e0] sm:$0xff]   ;;  %v6317_v49 = vld [vmem:[%s7458_s1 + $0x1f0] sm:$0xff]  }
 0x132   :  { %v2224_v52 = vpack.c.bf16 %v1154_v50, %v1154_v50  ;;  %v2225_v53 = vpack.c.bf16 %v1200_v51, %v1200_v51  ;;  %v5841_v54 = vpop.f32.mrb[45].mxu0  ;;  %v5847_v55 = vpop.f32.mrb[45].mxu1 }
 0x133   :  { %v1157_v56 = vpop.f32.mrb[46].mxu0  ;;  %v1203_v57 = vpop.f32.mrb[46].mxu1 }
 0x134   :  { %v3757_v58 = vsel %vm104_vm0, %v2224_v52, 0  ;;  %v3825_v59 = vsel %vm104_vm0, %v2225_v53, 0  ;;  %v5842_v60 = vpop.f32.mrb[47].mxu0  ;;  %v5848_v61 = vpop.f32.mrb[47].mxu1  ;;  %6231 = vmatprep.subr.msk.bf16.mxu0 %vm104_vm0, %v2224_v52  ;;  %6232 = vmatprep.subr.msk.bf16.mxu1 %vm104_vm0, %v2225_v53 }
 0x135   :  { %6090 = vmatpush3.bf16.msra.mxu0 %v3757_v58  ;;  %6096 = vmatpush3.bf16.msra.mxu1 %v3825_v59 }
 0x138   :  { %6092 = vmatmul.mubr.msk.bf16.vlgmr.msra.gmra.mrb[128].mxu0 %vm100_vm1, %v6302_v62  ;;  %6098 = vmatmul.mubr.msk.bf16.vlgmr.msra.gmra.mrb[128].mxu1 %vm100_vm1, %v6303_v63  ;;  %v6318_v62 = vld [vmem:[%s7458_s1 + $0x1e8] sm:$0xff]   ;;  %v6319_v63 = vld [vmem:[%s7458_s1 + $0x1f8] sm:$0xff]  }
 0x139   :  { %v1246_v2 = vpop.f32.mrb[48].mxu0  ;;  %v1292_v3 = vpop.f32.mrb[48].mxu1  ;;  %6103 = vmatprep.mubr.msk.bf16.mxu0 %vm100_vm1, %v6304_v0  ;;  %6109 = vmatprep.mubr.msk.bf16.mxu1 %vm100_vm1, %v6305_v1  ;;  %v6320_v0 = vld [vmem:[%s7458_s1 + $0x200] sm:$0xff]   ;;  %v6321_v1 = vld [vmem:[%s7458_s1 + $0x210] sm:$0xff]  }
 0x13a   :  { %v2226_v4 = vpack.c.bf16 %v1246_v2, %v1246_v2  ;;  %v2227_v5 = vpack.c.bf16 %v1292_v3, %v1292_v3  ;;  %v5853_v6 = vpop.f32.mrb[49].mxu0  ;;  %v5859_v7 = vpop.f32.mrb[49].mxu1 }
 0x13b   :  { %v1249_v8 = vpop.f32.mrb[50].mxu0  ;;  %v1295_v9 = vpop.f32.mrb[50].mxu1 }
 0x13c   :  { %v3893_v10 = vsel %vm104_vm0, %v2226_v4, 0  ;;  %v3961_v11 = vsel %vm104_vm0, %v2227_v5, 0  ;;  %v5854_v12 = vpop.f32.mrb[51].mxu0  ;;  %v5860_v13 = vpop.f32.mrb[51].mxu1  ;;  %6233 = vmatprep.subr.msk.bf16.mxu0 %vm104_vm0, %v2226_v4  ;;  %6234 = vmatprep.subr.msk.bf16.mxu1 %vm104_vm0, %v2227_v5 }
 0x13d   :  { %6102 = vmatpush3.bf16.msra.mxu0 %v3893_v10  ;;  %6108 = vmatpush3.bf16.msra.mxu1 %v3961_v11 }
 0x140   :  { %6104 = vmatmul.mubr.msk.bf16.vlgmr.msra.gmra.mrb[132].mxu0 %vm100_vm1, %v6306_v14  ;;  %6110 = vmatmul.mubr.msk.bf16.vlgmr.msra.gmra.mrb[132].mxu1 %vm100_vm1, %v6307_v15  ;;  %v6322_v14 = vld [vmem:[%s7458_s1 + $0x208] sm:$0xff]   ;;  %v6323_v15 = vld [vmem:[%s7458_s1 + $0x218] sm:$0xff]  }
 0x141   :  { %v1338_v18 = vpop.f32.mrb[52].mxu0  ;;  %v1384_v19 = vpop.f32.mrb[52].mxu1  ;;  %6115 = vmatprep.mubr.msk.bf16.mxu0 %vm100_vm1, %v6308_v16  ;;  %6121 = vmatprep.mubr.msk.bf16.mxu1 %vm100_vm1, %v6309_v17  ;;  %v6324_v16 = vld [vmem:[%s7458_s1 + $0x220] sm:$0xff]   ;;  %v6325_v17 = vld [vmem:[%s7458_s1 + $0x230] sm:$0xff]  }
 0x142   :  { %v2228_v20 = vpack.c.bf16 %v1338_v18, %v1338_v18  ;;  %v2229_v21 = vpack.c.bf16 %v1384_v19, %v1384_v19  ;;  %v5865_v22 = vpop.f32.mrb[53].mxu0  ;;  %v5871_v23 = vpop.f32.mrb[53].mxu1 }
 0x143   :  { %v1341_v24 = vpop.f32.mrb[54].mxu0  ;;  %v1387_v25 = vpop.f32.mrb[54].mxu1 }
 0x144   :  { %v4029_v26 = vsel %vm104_vm0, %v2228_v20, 0  ;;  %v4097_v27 = vsel %vm104_vm0, %v2229_v21, 0  ;;  %v5866_v28 = vpop.f32.mrb[55].mxu0  ;;  %v5872_v29 = vpop.f32.mrb[55].mxu1  ;;  %6235 = vmatprep.subr.msk.bf16.mxu0 %vm104_vm0, %v2228_v20  ;;  %6236 = vmatprep.subr.msk.bf16.mxu1 %vm104_vm0, %v2229_v21 }
 0x145   :  { %6114 = vmatpush3.bf16.msra.mxu0 %v4029_v26  ;;  %6120 = vmatpush3.bf16.msra.mxu1 %v4097_v27 }
 0x148   :  { %6116 = vmatmul.mubr.msk.bf16.vlgmr.msra.gmra.mrb[136].mxu0 %vm100_vm1, %v6310_v30  ;;  %6122 = vmatmul.mubr.msk.bf16.vlgmr.msra.gmra.mrb[136].mxu1 %vm100_vm1, %v6311_v31  ;;  %v6326_v30 = vld [vmem:[%s7458_s1 + $0x228] sm:$0xff]   ;;  %v6327_v31 = vld [vmem:[%s7458_s1 + $0x238] sm:$0xff]  }
 0x149   :  { %v1430_v34 = vpop.f32.mrb[56].mxu0  ;;  %v1476_v35 = vpop.f32.mrb[56].mxu1  ;;  %6127 = vmatprep.mubr.msk.bf16.mxu0 %vm100_vm1, %v6312_v32  ;;  %6133 = vmatprep.mubr.msk.bf16.mxu1 %vm100_vm1, %v6313_v33  ;;  %v6328_v32 = vld [vmem:[%s7458_s1 + $0x240] sm:$0xff]   ;;  %v6329_v33 = vld [vmem:[%s7458_s1 + $0x250] sm:$0xff]  }
 0x14a   :  { %v2230_v36 = vpack.c.bf16 %v1430_v34, %v1430_v34  ;;  %v2231_v37 = vpack.c.bf16 %v1476_v35, %v1476_v35  ;;  %v5877_v38 = vpop.f32.mrb[57].mxu0  ;;  %v5883_v39 = vpop.f32.mrb[57].mxu1 }
 0x14b   :  { %v1433_v40 = vpop.f32.mrb[58].mxu0  ;;  %v1479_v41 = vpop.f32.mrb[58].mxu1 }
 0x14c   :  { %v4165_v42 = vsel %vm104_vm0, %v2230_v36, 0  ;;  %v4233_v43 = vsel %vm104_vm0, %v2231_v37, 0  ;;  %v5878_v44 = vpop.f32.mrb[59].mxu0  ;;  %v5884_v45 = vpop.f32.mrb[59].mxu1  ;;  %6237 = vmatprep.subr.msk.bf16.mxu0 %vm104_vm0, %v2230_v36  ;;  %6238 = vmatprep.subr.msk.bf16.mxu1 %vm104_vm0, %v2231_v37 }
 0x14d   :  { %6126 = vmatpush3.bf16.msra.mxu0 %v4165_v42  ;;  %6132 = vmatpush3.bf16.msra.mxu1 %v4233_v43 }
 0x150   :  { %6128 = vmatmul.mubr.msk.bf16.vlgmr.msra.gmra.mrb[140].mxu0 %vm100_vm1, %v6314_v46  ;;  %6134 = vmatmul.mubr.msk.bf16.vlgmr.msra.gmra.mrb[140].mxu1 %vm100_vm1, %v6315_v47  ;;  %v6330_v46 = vld [vmem:[%s7458_s1 + $0x248] sm:$0xff]   ;;  %v6331_v47 = vld [vmem:[%s7458_s1 + $0x258] sm:$0xff]  }
 0x151   :  { %v1522_v50 = vpop.f32.mrb[60].mxu0  ;;  %v1568_v51 = vpop.f32.mrb[60].mxu1  ;;  %6139 = vmatprep.mubr.msk.bf16.mxu0 %vm100_vm1, %v6316_v48  ;;  %6145 = vmatprep.mubr.msk.bf16.mxu1 %vm100_vm1, %v6317_v49  ;;  %v6332_v48 = vld [vmem:[%s7458_s1 + $0x260] sm:$0xff]   ;;  %v6333_v49 = vld [vmem:[%s7458_s1 + $0x270] sm:$0xff]  }
 0x152   :  { %v2232_v52 = vpack.c.bf16 %v1522_v50, %v1522_v50  ;;  %v2233_v53 = vpack.c.bf16 %v1568_v51, %v1568_v51  ;;  %v5889_v54 = vpop.f32.mrb[61].mxu0  ;;  %v5895_v55 = vpop.f32.mrb[61].mxu1 }
 0x153   :  { %v1525_v56 = vpop.f32.mrb[62].mxu0  ;;  %v1571_v57 = vpop.f32.mrb[62].mxu1 }
 0x154   :  { %v4301_v58 = vsel %vm104_vm0, %v2232_v52, 0  ;;  %v4369_v59 = vsel %vm104_vm0, %v2233_v53, 0  ;;  %v5890_v60 = vpop.f32.mrb[63].mxu0  ;;  %v5896_v61 = vpop.f32.mrb[63].mxu1  ;;  %6239 = vmatprep.subr.msk.bf16.mxu0 %vm104_vm0, %v2232_v52  ;;  %6240 = vmatprep.subr.msk.bf16.mxu1 %vm104_vm0, %v2233_v53 }
 0x155   :  { %6138 = vmatpush3.bf16.msra.mxu0 %v4301_v58  ;;  %6144 = vmatpush3.bf16.msra.mxu1 %v4369_v59 }
 0x158   :  { %6140 = vmatmul.mubr.msk.bf16.vlgmr.msra.gmra.mrb[144].mxu0 %vm100_vm1, %v6318_v62  ;;  %6146 = vmatmul.mubr.msk.bf16.vlgmr.msra.gmra.mrb[144].mxu1 %vm100_vm1, %v6319_v63  ;;  %v6334_v62 = vld [vmem:[%s7458_s1 + $0x268] sm:$0xff]   ;;  %v6335_v63 = vld [vmem:[%s7458_s1 + $0x278] sm:$0xff]  }
 0x159   :  { %v1614_v2 = vpop.f32.mrb[64].mxu0  ;;  %v1660_v3 = vpop.f32.mrb[64].mxu1  ;;  %6151 = vmatprep.mubr.msk.bf16.mxu0 %vm100_vm1, %v6320_v0  ;;  %6157 = vmatprep.mubr.msk.bf16.mxu1 %vm100_vm1, %v6321_v1  ;;  %v6336_v0 = vld [vmem:[%s7458_s1 + $0x280] sm:$0xff]   ;;  %v6337_v1 = vld [vmem:[%s7458_s1 + $0x290] sm:$0xff]  }
 0x15a   :  { %v2234_v4 = vpack.c.bf16 %v1614_v2, %v1614_v2  ;;  %v2235_v5 = vpack.c.bf16 %v1660_v3, %v1660_v3  ;;  %v5901_v6 = vpop.f32.mrb[65].mxu0  ;;  %v5907_v7 = vpop.f32.mrb[65].mxu1 }
 0x15b   :  { %v1617_v8 = vpop.f32.mrb[66].mxu0  ;;  %v1663_v9 = vpop.f32.mrb[66].mxu1 }
 0x15c   :  { %v4437_v10 = vsel %vm104_vm0, %v2234_v4, 0  ;;  %v4505_v11 = vsel %vm104_vm0, %v2235_v5, 0  ;;  %v5902_v12 = vpop.f32.mrb[67].mxu0  ;;  %v5908_v13 = vpop.f32.mrb[67].mxu1  ;;  %6241 = vmatprep.subr.msk.bf16.mxu0 %vm104_vm0, %v2234_v4  ;;  %6242 = vmatprep.subr.msk.bf16.mxu1 %vm104_vm0, %v2235_v5 }
 0x15d   :  { %6150 = vmatpush3.bf16.msra.mxu0 %v4437_v10  ;;  %6156 = vmatpush3.bf16.msra.mxu1 %v4505_v11 }
 0x160   :  { %6152 = vmatmul.mubr.msk.bf16.vlgmr.msra.gmra.mrb[148].mxu0 %vm100_vm1, %v6322_v14  ;;  %6158 = vmatmul.mubr.msk.bf16.vlgmr.msra.gmra.mrb[148].mxu1 %vm100_vm1, %v6323_v15  ;;  %v6338_v14 = vld [vmem:[%s7458_s1 + $0x288] sm:$0xff]   ;;  %v6339_v15 = vld [vmem:[%s7458_s1 + $0x298] sm:$0xff]   ;;  %s6366_s1 = smov [#allocation2]  }
 0x161   :  { %v1706_v18 = vpop.f32.mrb[68].mxu0  ;;  %v1752_v19 = vpop.f32.mrb[68].mxu1  ;;  %6163 = vmatprep.mubr.msk.bf16.mxu0 %vm100_vm1, %v6324_v16  ;;  %6169 = vmatprep.mubr.msk.bf16.mxu1 %vm100_vm1, %v6325_v17  ;;  %s5274_s12 = sshll.u32 %s6366_s1, 4  ;;  %s5275_s12 = int_to_ptr.vmem [resolvable:$true] %s5274_s12 }
 0x162   :  { %v2236_v20 = vpack.c.bf16 %v1706_v18, %v1706_v18  ;;  %v2237_v21 = vpack.c.bf16 %v1752_v19, %v1752_v19  ;;  %v5913_v22 = vpop.f32.mrb[69].mxu0  ;;  %v5919_v23 = vpop.f32.mrb[69].mxu1  ;;  %s6340_s13 = scalar_lea.vmem %s5275_s12, 21504  ;;  %p6345_p1 = scmp.lt.s32.totalorder %s5275_s12, %s5275_s12 }
 0x163   :  { %v1709_v24 = vpop.f32.mrb[70].mxu0  ;;  %v1755_v25 = vpop.f32.mrb[70].mxu1  ;;  %p6341_p0 = scmp.ne.s32.totalorder %s5275_s12, %s6340_s13  ;;  %p6346_p2 = scmp.lt.s32.totalorder %s6340_s13, %s6340_s13 }
 0x164   :  { %v4573_v26 = vsel %vm104_vm0, %v2236_v20, 0  ;;  %v4641_v27 = vsel %vm104_vm0, %v2237_v21, 0  ;;  %v5914_v28 = vpop.f32.mrb[71].mxu0  ;;  %v5920_v29 = vpop.f32.mrb[71].mxu1  ;;  %6243 = vmatprep.subr.msk.bf16.mxu0 %vm104_vm0, %v2236_v20  ;;  %6244 = vmatprep.subr.msk.bf16.mxu1 %vm104_vm0, %v2237_v21 }
 0x165   :  { %6162 = vmatpush3.bf16.msra.mxu0 %v4573_v26  ;;  %6168 = vmatpush3.bf16.msra.mxu1 %v4641_v27  ;;  %p6347_p3 = por %p6346_p2, %p6345_p1 }
 0x167   :  { %p6348_p4 = pnand %p6347_p3, %p6341_p0 }
 0x168   :  { %6164 = vmatmul.mubr.msk.bf16.vlgmr.msra.gmra.mrb[152].mxu0 %vm100_vm1, %v6326_v30  ;;  %6170 = vmatmul.mubr.msk.bf16.vlgmr.msra.gmra.mrb[152].mxu1 %vm100_vm1, %v6327_v31 }
 0x169   :  { %v1798_v34 = vpop.f32.mrb[72].mxu0  ;;  %v1844_v35 = vpop.f32.mrb[72].mxu1  ;;  %6175 = vmatprep.mubr.msk.bf16.mxu0 %vm100_vm1, %v6328_v32  ;;  %6181 = vmatprep.mubr.msk.bf16.mxu1 %vm100_vm1, %v6329_v33 }
 0x16a   :  { %v2238_v36 = vpack.c.bf16 %v1798_v34, %v1798_v34  ;;  %v2239_v37 = vpack.c.bf16 %v1844_v35, %v1844_v35  ;;  %v5925_v38 = vpop.f32.mrb[73].mxu0  ;;  %v5931_v39 = vpop.f32.mrb[73].mxu1 }
 0x16b   :  { %v1801_v40 = vpop.f32.mrb[74].mxu0  ;;  %v1847_v41 = vpop.f32.mrb[74].mxu1 }
 0x16c   :  { %v4709_v42 = vsel %vm104_vm0, %v2238_v36, 0  ;;  %v4777_v43 = vsel %vm104_vm0, %v2239_v37, 0  ;;  %v5926_v44 = vpop.f32.mrb[75].mxu0  ;;  %v5932_v45 = vpop.f32.mrb[75].mxu1  ;;  %6245 = vmatprep.subr.msk.bf16.mxu0 %vm104_vm0, %v2238_v36  ;;  %6246 = vmatprep.subr.msk.bf16.mxu1 %vm104_vm0, %v2239_v37 }
 0x16d   :  { %6174 = vmatpush3.bf16.msra.mxu0 %v4709_v42  ;;  %6180 = vmatpush3.bf16.msra.mxu1 %v4777_v43 }
 0x170   :  { %6176 = vmatmul.mubr.msk.bf16.vlgmr.msra.gmra.mrb[156].mxu0 %vm100_vm1, %v6330_v46  ;;  %6182 = vmatmul.mubr.msk.bf16.vlgmr.msra.gmra.mrb[156].mxu1 %vm100_vm1, %v6331_v47 }
 0x171   :  { %v1890_v50 = vpop.f32.mrb[76].mxu0  ;;  %v1936_v51 = vpop.f32.mrb[76].mxu1  ;;  %6187 = vmatprep.mubr.msk.bf16.mxu0 %vm100_vm1, %v6332_v48  ;;  %6193 = vmatprep.mubr.msk.bf16.mxu1 %vm100_vm1, %v6333_v49 }
 0x172   :  { %v2240_v52 = vpack.c.bf16 %v1890_v50, %v1890_v50  ;;  %v2241_v53 = vpack.c.bf16 %v1936_v51, %v1936_v51  ;;  %v5937_v54 = vpop.f32.mrb[77].mxu0  ;;  %v5943_v55 = vpop.f32.mrb[77].mxu1 }
 0x173   :  { %v1893_v56 = vpop.f32.mrb[78].mxu0  ;;  %v1939_v57 = vpop.f32.mrb[78].mxu1 }
 0x174   :  { %v4845_v58 = vsel %vm104_vm0, %v2240_v52, 0  ;;  %v4913_v59 = vsel %vm104_vm0, %v2241_v53, 0  ;;  %v5938_v60 = vpop.f32.mrb[79].mxu0  ;;  %v5944_v61 = vpop.f32.mrb[79].mxu1  ;;  %6247 = vmatprep.subr.msk.bf16.mxu0 %vm104_vm0, %v2240_v52  ;;  %6248 = vmatprep.subr.msk.bf16.mxu1 %vm104_vm0, %v2241_v53 }
 0x175   :  { %6186 = vmatpush3.bf16.msra.mxu0 %v4845_v58  ;;  %6192 = vmatpush3.bf16.msra.mxu1 %v4913_v59 }
 0x178   :  { %6188 = vmatmul.mubr.msk.bf16.vlgmr.msra.gmra.mrb[160].mxu0 %vm100_vm1, %v6334_v62  ;;  %6194 = vmatmul.mubr.msk.bf16.vlgmr.msra.gmra.mrb[160].mxu1 %vm100_vm1, %v6335_v63 }
 0x179   :  { %v1982_v2 = vpop.f32.mrb[80].mxu0  ;;  %v2028_v3 = vpop.f32.mrb[80].mxu1  ;;  %6199 = vmatprep.mubr.msk.bf16.mxu0 %vm100_vm1, %v6336_v0  ;;  %6205 = vmatprep.mubr.msk.bf16.mxu1 %vm100_vm1, %v6337_v1 }
 0x17a   :  { %v2242_v4 = vpack.c.bf16 %v1982_v2, %v1982_v2  ;;  %v2243_v5 = vpack.c.bf16 %v2028_v3, %v2028_v3  ;;  %v5949_v6 = vpop.f32.mrb[81].mxu0  ;;  %v5955_v7 = vpop.f32.mrb[81].mxu1 }
 0x17b   :  { %v1985_v8 = vpop.f32.mrb[82].mxu0  ;;  %v2031_v9 = vpop.f32.mrb[82].mxu1 }
 0x17c   :  { %v4981_v10 = vsel %vm104_vm0, %v2242_v4, 0  ;;  %v5049_v11 = vsel %vm104_vm0, %v2243_v5, 0  ;;  %v5950_v12 = vpop.f32.mrb[83].mxu0  ;;  %v5956_v13 = vpop.f32.mrb[83].mxu1  ;;  %6249 = vmatprep.subr.msk.bf16.mxu0 %vm104_vm0, %v2242_v4  ;;  %6250 = vmatprep.subr.msk.bf16.mxu1 %vm104_vm0, %v2243_v5 }
 0x17d   :  { %6198 = vmatpush3.bf16.msra.mxu0 %v4981_v10  ;;  %6204 = vmatpush3.bf16.msra.mxu1 %v5049_v11 }
 0x180   :  { %6200 = vmatmul.mubr.msk.bf16.vlgmr.msra.gmra.mrb[164].mxu0 %vm100_vm1, %v6338_v14  ;;  %6206 = vmatmul.mubr.msk.bf16.vlgmr.msra.gmra.mrb[164].mxu1 %vm100_vm1, %v6339_v15 }
 0x1b3   :  { %v5961_v16 = vpop.f32.mrb[84].mxu0  ;;  %v5967_v17 = vpop.f32.mrb[84].mxu1 }
 0x1b4   :  { %5103 = vst.msk [vmem:[#allocation2 + $0x10] sm:$0xff] %vm5100_vm3, %v5961_v16  ;;  %5107 = vst.msk [vmem:[#allocation2 + $0x30] sm:$0xff] %vm5100_vm3, %v5967_v17  ;;  %v2297_v18 = vpop.f32.mrb[85].mxu0  ;;  %v2365_v19 = vpop.f32.mrb[85].mxu1 }
 0x1b5   :  { %5101 = vst.msk [vmem:[#allocation2] sm:$0xff] %vm5100_vm3, %v2297_v18  ;;  %5105 = vst.msk [vmem:[#allocation2 + $0x20] sm:$0xff] %vm5100_vm3, %v2365_v19  ;;  %v5962_v20 = vpop.f32.mrb[86].mxu0  ;;  %v5968_v21 = vpop.f32.mrb[86].mxu1 }
 0x1b6   :  { %5104 = vst.msk [vmem:[#allocation2 + $0x18] sm:$0xff] %vm5100_vm3, %v5962_v20  ;;  %5108 = vst.msk [vmem:[#allocation2 + $0x38] sm:$0xff] %vm5100_vm3, %v5968_v21  ;;  %v2300_v22 = vpop.f32.mrb[87].mxu0  ;;  %v2368_v23 = vpop.f32.mrb[87].mxu1 }
 0x1b7   :  { %5102 = vst.msk [vmem:[#allocation2 + $0x8] sm:$0xff] %vm5100_vm3, %v2300_v22  ;;  %5106 = vst.msk [vmem:[#allocation2 + $0x28] sm:$0xff] %vm5100_vm3, %v2368_v23 }
 0x1bb   :  { %v5973_v24 = vpop.f32.mrb[88].mxu0  ;;  %v5979_v25 = vpop.f32.mrb[88].mxu1 }
 0x1bc   :  { %5111 = vst.msk [vmem:[#allocation2 + $0x50] sm:$0xff] %vm5100_vm3, %v5973_v24  ;;  %5115 = vst.msk [vmem:[#allocation2 + $0x70] sm:$0xff] %vm5100_vm3, %v5979_v25  ;;  %v2433_v26 = vpop.f32.mrb[89].mxu0  ;;  %v2501_v27 = vpop.f32.mrb[89].mxu1 }
 0x1bd   :  { %5109 = vst.msk [vmem:[#allocation2 + $0x40] sm:$0xff] %vm5100_vm3, %v2433_v26  ;;  %5113 = vst.msk [vmem:[#allocation2 + $0x60] sm:$0xff] %vm5100_vm3, %v2501_v27  ;;  %v5974_v28 = vpop.f32.mrb[90].mxu0  ;;  %v5980_v29 = vpop.f32.mrb[90].mxu1 }
 0x1be   :  { %5112 = vst.msk [vmem:[#allocation2 + $0x58] sm:$0xff] %vm5100_vm3, %v5974_v28  ;;  %5116 = vst.msk [vmem:[#allocation2 + $0x78] sm:$0xff] %vm5100_vm3, %v5980_v29  ;;  %v2436_v30 = vpop.f32.mrb[91].mxu0  ;;  %v2504_v31 = vpop.f32.mrb[91].mxu1 }
 0x1bf   :  { %5110 = vst.msk [vmem:[#allocation2 + $0x48] sm:$0xff] %vm5100_vm3, %v2436_v30  ;;  %5114 = vst.msk [vmem:[#allocation2 + $0x68] sm:$0xff] %vm5100_vm3, %v2504_v31 }
 0x1c3   :  { %v5985_v32 = vpop.f32.mrb[92].mxu0  ;;  %v5991_v33 = vpop.f32.mrb[92].mxu1 }
 0x1c4   :  { %5119 = vst.msk [vmem:[#allocation2 + $0x90] sm:$0xff] %vm5100_vm3, %v5985_v32  ;;  %5123 = vst.msk [vmem:[#allocation2 + $0xb0] sm:$0xff] %vm5100_vm3, %v5991_v33  ;;  %v2569_v34 = vpop.f32.mrb[93].mxu0  ;;  %v2637_v35 = vpop.f32.mrb[93].mxu1 }
 0x1c5   :  { %5117 = vst.msk [vmem:[#allocation2 + $0x80] sm:$0xff] %vm5100_vm3, %v2569_v34  ;;  %5121 = vst.msk [vmem:[#allocation2 + $0xa0] sm:$0xff] %vm5100_vm3, %v2637_v35  ;;  %v5986_v36 = vpop.f32.mrb[94].mxu0  ;;  %v5992_v37 = vpop.f32.mrb[94].mxu1 }
 0x1c6   :  { %5120 = vst.msk [vmem:[#allocation2 + $0x98] sm:$0xff] %vm5100_vm3, %v5986_v36  ;;  %5124 = vst.msk [vmem:[#allocation2 + $0xb8] sm:$0xff] %vm5100_vm3, %v5992_v37  ;;  %v2572_v38 = vpop.f32.mrb[95].mxu0  ;;  %v2640_v39 = vpop.f32.mrb[95].mxu1 }
 0x1c7   :  { %5118 = vst.msk [vmem:[#allocation2 + $0x88] sm:$0xff] %vm5100_vm3, %v2572_v38  ;;  %5122 = vst.msk [vmem:[#allocation2 + $0xa8] sm:$0xff] %vm5100_vm3, %v2640_v39 }
 0x1cb   :  { %v5997_v40 = vpop.f32.mrb[96].mxu0  ;;  %v6003_v41 = vpop.f32.mrb[96].mxu1 }
 0x1cc   :  { %5127 = vst.msk [vmem:[#allocation2 + $0xd0] sm:$0xff] %vm5100_vm3, %v5997_v40  ;;  %5131 = vst.msk [vmem:[#allocation2 + $0xf0] sm:$0xff] %vm5100_vm3, %v6003_v41  ;;  %v2705_v42 = vpop.f32.mrb[97].mxu0  ;;  %v2773_v43 = vpop.f32.mrb[97].mxu1 }
 0x1cd   :  { %5125 = vst.msk [vmem:[#allocation2 + $0xc0] sm:$0xff] %vm5100_vm3, %v2705_v42  ;;  %5129 = vst.msk [vmem:[#allocation2 + $0xe0] sm:$0xff] %vm5100_vm3, %v2773_v43  ;;  %v5998_v44 = vpop.f32.mrb[98].mxu0  ;;  %v6004_v45 = vpop.f32.mrb[98].mxu1 }
 0x1ce   :  { %5128 = vst.msk [vmem:[#allocation2 + $0xd8] sm:$0xff] %vm5100_vm3, %v5998_v44  ;;  %5132 = vst.msk [vmem:[#allocation2 + $0xf8] sm:$0xff] %vm5100_vm3, %v6004_v45  ;;  %v2708_v46 = vpop.f32.mrb[99].mxu0  ;;  %v2776_v47 = vpop.f32.mrb[99].mxu1 }
 0x1cf   :  { %5126 = vst.msk [vmem:[#allocation2 + $0xc8] sm:$0xff] %vm5100_vm3, %v2708_v46  ;;  %5130 = vst.msk [vmem:[#allocation2 + $0xe8] sm:$0xff] %vm5100_vm3, %v2776_v47 }
 0x1d3   :  { %v6009_v48 = vpop.f32.mrb[100].mxu0  ;;  %v6015_v49 = vpop.f32.mrb[100].mxu1 }
 0x1d4   :  { %5135 = vst.msk [vmem:[#allocation2 + $0x110] sm:$0xff] %vm5100_vm3, %v6009_v48  ;;  %5139 = vst.msk [vmem:[#allocation2 + $0x130] sm:$0xff] %vm5100_vm3, %v6015_v49  ;;  %v2841_v50 = vpop.f32.mrb[101].mxu0  ;;  %v2909_v51 = vpop.f32.mrb[101].mxu1 }
 0x1d5   :  { %5133 = vst.msk [vmem:[#allocation2 + $0x100] sm:$0xff] %vm5100_vm3, %v2841_v50  ;;  %5137 = vst.msk [vmem:[#allocation2 + $0x120] sm:$0xff] %vm5100_vm3, %v2909_v51  ;;  %v6010_v52 = vpop.f32.mrb[102].mxu0  ;;  %v6016_v53 = vpop.f32.mrb[102].mxu1 }
 0x1d6   :  { %5136 = vst.msk [vmem:[#allocation2 + $0x118] sm:$0xff] %vm5100_vm3, %v6010_v52  ;;  %5140 = vst.msk [vmem:[#allocation2 + $0x138] sm:$0xff] %vm5100_vm3, %v6016_v53  ;;  %v2844_v54 = vpop.f32.mrb[103].mxu0  ;;  %v2912_v55 = vpop.f32.mrb[103].mxu1 }
 0x1d7   :  { %5134 = vst.msk [vmem:[#allocation2 + $0x108] sm:$0xff] %vm5100_vm3, %v2844_v54  ;;  %5138 = vst.msk [vmem:[#allocation2 + $0x128] sm:$0xff] %vm5100_vm3, %v2912_v55 }
 0x1db   :  { %v6021_v56 = vpop.f32.mrb[104].mxu0  ;;  %v6027_v57 = vpop.f32.mrb[104].mxu1 }
 0x1dc   :  { %5143 = vst.msk [vmem:[#allocation2 + $0x150] sm:$0xff] %vm5100_vm3, %v6021_v56  ;;  %5147 = vst.msk [vmem:[#allocation2 + $0x170] sm:$0xff] %vm5100_vm3, %v6027_v57  ;;  %v2977_v58 = vpop.f32.mrb[105].mxu0  ;;  %v3045_v59 = vpop.f32.mrb[105].mxu1 }
 0x1dd   :  { %5141 = vst.msk [vmem:[#allocation2 + $0x140] sm:$0xff] %vm5100_vm3, %v2977_v58  ;;  %5145 = vst.msk [vmem:[#allocation2 + $0x160] sm:$0xff] %vm5100_vm3, %v3045_v59  ;;  %v6022_v60 = vpop.f32.mrb[106].mxu0  ;;  %v6028_v61 = vpop.f32.mrb[106].mxu1 }
 0x1de   :  { %5144 = vst.msk [vmem:[#allocation2 + $0x158] sm:$0xff] %vm5100_vm3, %v6022_v60  ;;  %5148 = vst.msk [vmem:[#allocation2 + $0x178] sm:$0xff] %vm5100_vm3, %v6028_v61  ;;  %v2980_v62 = vpop.f32.mrb[107].mxu0  ;;  %v3048_v63 = vpop.f32.mrb[107].mxu1 }
 0x1df   :  { %5142 = vst.msk [vmem:[#allocation2 + $0x148] sm:$0xff] %vm5100_vm3, %v2980_v62  ;;  %5146 = vst.msk [vmem:[#allocation2 + $0x168] sm:$0xff] %vm5100_vm3, %v3048_v63 }
 0x1e3   :  { %v6033_v0 = vpop.f32.mrb[108].mxu0  ;;  %v6039_v1 = vpop.f32.mrb[108].mxu1 }
 0x1e4   :  { %5151 = vst.msk [vmem:[#allocation2 + $0x190] sm:$0xff] %vm5100_vm3, %v6033_v0  ;;  %5155 = vst.msk [vmem:[#allocation2 + $0x1b0] sm:$0xff] %vm5100_vm3, %v6039_v1  ;;  %v3113_v2 = vpop.f32.mrb[109].mxu0  ;;  %v3181_v3 = vpop.f32.mrb[109].mxu1 }
 0x1e5   :  { %5149 = vst.msk [vmem:[#allocation2 + $0x180] sm:$0xff] %vm5100_vm3, %v3113_v2  ;;  %5153 = vst.msk [vmem:[#allocation2 + $0x1a0] sm:$0xff] %vm5100_vm3, %v3181_v3  ;;  %v6034_v4 = vpop.f32.mrb[110].mxu0  ;;  %v6040_v5 = vpop.f32.mrb[110].mxu1 }
 0x1e6   :  { %5152 = vst.msk [vmem:[#allocation2 + $0x198] sm:$0xff] %vm5100_vm3, %v6034_v4  ;;  %5156 = vst.msk [vmem:[#allocation2 + $0x1b8] sm:$0xff] %vm5100_vm3, %v6040_v5  ;;  %v3116_v6 = vpop.f32.mrb[111].mxu0  ;;  %v3184_v7 = vpop.f32.mrb[111].mxu1 }
 0x1e7   :  { %5150 = vst.msk [vmem:[#allocation2 + $0x188] sm:$0xff] %vm5100_vm3, %v3116_v6  ;;  %5154 = vst.msk [vmem:[#allocation2 + $0x1a8] sm:$0xff] %vm5100_vm3, %v3184_v7 }
 0x1eb   :  { %v6045_v8 = vpop.f32.mrb[112].mxu0  ;;  %v6051_v9 = vpop.f32.mrb[112].mxu1 }
 0x1ec   :  { %5159 = vst.msk [vmem:[#allocation2 + $0x1d0] sm:$0xff] %vm5100_vm3, %v6045_v8  ;;  %5163 = vst.msk [vmem:[#allocation2 + $0x1f0] sm:$0xff] %vm5100_vm3, %v6051_v9  ;;  %v3249_v10 = vpop.f32.mrb[113].mxu0  ;;  %v3317_v11 = vpop.f32.mrb[113].mxu1 }
 0x1ed   :  { %5157 = vst.msk [vmem:[#allocation2 + $0x1c0] sm:$0xff] %vm5100_vm3, %v3249_v10  ;;  %5161 = vst.msk [vmem:[#allocation2 + $0x1e0] sm:$0xff] %vm5100_vm3, %v3317_v11  ;;  %v6046_v12 = vpop.f32.mrb[114].mxu0  ;;  %v6052_v13 = vpop.f32.mrb[114].mxu1 }
 0x1ee   :  { %5160 = vst.msk [vmem:[#allocation2 + $0x1d8] sm:$0xff] %vm5100_vm3, %v6046_v12  ;;  %5164 = vst.msk [vmem:[#allocation2 + $0x1f8] sm:$0xff] %vm5100_vm3, %v6052_v13  ;;  %v3252_v14 = vpop.f32.mrb[115].mxu0  ;;  %v3320_v15 = vpop.f32.mrb[115].mxu1 }
 0x1ef   :  { %5158 = vst.msk [vmem:[#allocation2 + $0x1c8] sm:$0xff] %vm5100_vm3, %v3252_v14  ;;  %5162 = vst.msk [vmem:[#allocation2 + $0x1e8] sm:$0xff] %vm5100_vm3, %v3320_v15 }
 0x1f3   :  { %v6057_v16 = vpop.f32.mrb[116].mxu0  ;;  %v6063_v17 = vpop.f32.mrb[116].mxu1 }
 0x1f4   :  { %5167 = vst.msk [vmem:[#allocation2 + $0x210] sm:$0xff] %vm5100_vm3, %v6057_v16  ;;  %5171 = vst.msk [vmem:[#allocation2 + $0x230] sm:$0xff] %vm5100_vm3, %v6063_v17  ;;  %v3385_v18 = vpop.f32.mrb[117].mxu0  ;;  %v3453_v19 = vpop.f32.mrb[117].mxu1 }
 0x1f5   :  { %5165 = vst.msk [vmem:[#allocation2 + $0x200] sm:$0xff] %vm5100_vm3, %v3385_v18  ;;  %5169 = vst.msk [vmem:[#allocation2 + $0x220] sm:$0xff] %vm5100_vm3, %v3453_v19  ;;  %v6058_v20 = vpop.f32.mrb[118].mxu0  ;;  %v6064_v21 = vpop.f32.mrb[118].mxu1 }
 0x1f6   :  { %5168 = vst.msk [vmem:[#allocation2 + $0x218] sm:$0xff] %vm5100_vm3, %v6058_v20  ;;  %5172 = vst.msk [vmem:[#allocation2 + $0x238] sm:$0xff] %vm5100_vm3, %v6064_v21  ;;  %v3388_v22 = vpop.f32.mrb[119].mxu0  ;;  %v3456_v23 = vpop.f32.mrb[119].mxu1 }
 0x1f7   :  { %5166 = vst.msk [vmem:[#allocation2 + $0x208] sm:$0xff] %vm5100_vm3, %v3388_v22  ;;  %5170 = vst.msk [vmem:[#allocation2 + $0x228] sm:$0xff] %vm5100_vm3, %v3456_v23 }
 0x1fb   :  { %v6069_v24 = vpop.f32.mrb[120].mxu0  ;;  %v6075_v25 = vpop.f32.mrb[120].mxu1 }
 0x1fc   :  { %5175 = vst.msk [vmem:[#allocation2 + $0x250] sm:$0xff] %vm5100_vm3, %v6069_v24  ;;  %5179 = vst.msk [vmem:[#allocation2 + $0x270] sm:$0xff] %vm5100_vm3, %v6075_v25  ;;  %v3521_v26 = vpop.f32.mrb[121].mxu0  ;;  %v3589_v27 = vpop.f32.mrb[121].mxu1 }
 0x1fd   :  { %5173 = vst.msk [vmem:[#allocation2 + $0x240] sm:$0xff] %vm5100_vm3, %v3521_v26  ;;  %5177 = vst.msk [vmem:[#allocation2 + $0x260] sm:$0xff] %vm5100_vm3, %v3589_v27  ;;  %v6070_v28 = vpop.f32.mrb[122].mxu0  ;;  %v6076_v29 = vpop.f32.mrb[122].mxu1 }
 0x1fe   :  { %5176 = vst.msk [vmem:[#allocation2 + $0x258] sm:$0xff] %vm5100_vm3, %v6070_v28  ;;  %5180 = vst.msk [vmem:[#allocation2 + $0x278] sm:$0xff] %vm5100_vm3, %v6076_v29  ;;  %v3524_v30 = vpop.f32.mrb[123].mxu0  ;;  %v3592_v31 = vpop.f32.mrb[123].mxu1 }
 0x1ff   :  { %5174 = vst.msk [vmem:[#allocation2 + $0x248] sm:$0xff] %vm5100_vm3, %v3524_v30  ;;  %5178 = vst.msk [vmem:[#allocation2 + $0x268] sm:$0xff] %vm5100_vm3, %v3592_v31 }
 0x203   :  { %v6081_v32 = vpop.f32.mrb[124].mxu0  ;;  %v6087_v33 = vpop.f32.mrb[124].mxu1 }
 0x204   :  { %5183 = vst.msk [vmem:[#allocation2 + $0x290] sm:$0xff] %vm5100_vm3, %v6081_v32  ;;  %5187 = vst.msk [vmem:[#allocation2 + $0x2b0] sm:$0xff] %vm5100_vm3, %v6087_v33  ;;  %v3657_v34 = vpop.f32.mrb[125].mxu0  ;;  %v3725_v35 = vpop.f32.mrb[125].mxu1 }
 0x205   :  { %5181 = vst.msk [vmem:[#allocation2 + $0x280] sm:$0xff] %vm5100_vm3, %v3657_v34  ;;  %5185 = vst.msk [vmem:[#allocation2 + $0x2a0] sm:$0xff] %vm5100_vm3, %v3725_v35  ;;  %v6082_v36 = vpop.f32.mrb[126].mxu0  ;;  %v6088_v37 = vpop.f32.mrb[126].mxu1 }
 0x206   :  { %5184 = vst.msk [vmem:[#allocation2 + $0x298] sm:$0xff] %vm5100_vm3, %v6082_v36  ;;  %5188 = vst.msk [vmem:[#allocation2 + $0x2b8] sm:$0xff] %vm5100_vm3, %v6088_v37  ;;  %v3660_v38 = vpop.f32.mrb[127].mxu0  ;;  %v3728_v39 = vpop.f32.mrb[127].mxu1 }
 0x207   :  { %5182 = vst.msk [vmem:[#allocation2 + $0x288] sm:$0xff] %vm5100_vm3, %v3660_v38  ;;  %5186 = vst.msk [vmem:[#allocation2 + $0x2a8] sm:$0xff] %vm5100_vm3, %v3728_v39 }
 0x20b   :  { %v6093_v40 = vpop.f32.mrb[128].mxu0  ;;  %v6099_v41 = vpop.f32.mrb[128].mxu1 }
 0x20c   :  { %5191 = vst.msk [vmem:[#allocation2 + $0x2d0] sm:$0xff] %vm5100_vm3, %v6093_v40  ;;  %5195 = vst.msk [vmem:[#allocation2 + $0x2f0] sm:$0xff] %vm5100_vm3, %v6099_v41  ;;  %v3793_v42 = vpop.f32.mrb[129].mxu0  ;;  %v3861_v43 = vpop.f32.mrb[129].mxu1 }
 0x20d   :  { %5189 = vst.msk [vmem:[#allocation2 + $0x2c0] sm:$0xff] %vm5100_vm3, %v3793_v42  ;;  %5193 = vst.msk [vmem:[#allocation2 + $0x2e0] sm:$0xff] %vm5100_vm3, %v3861_v43  ;;  %v6094_v44 = vpop.f32.mrb[130].mxu0  ;;  %v6100_v45 = vpop.f32.mrb[130].mxu1 }
 0x20e   :  { %5192 = vst.msk [vmem:[#allocation2 + $0x2d8] sm:$0xff] %vm5100_vm3, %v6094_v44  ;;  %5196 = vst.msk [vmem:[#allocation2 + $0x2f8] sm:$0xff] %vm5100_vm3, %v6100_v45  ;;  %v3796_v46 = vpop.f32.mrb[131].mxu0  ;;  %v3864_v47 = vpop.f32.mrb[131].mxu1 }
 0x20f   :  { %5190 = vst.msk [vmem:[#allocation2 + $0x2c8] sm:$0xff] %vm5100_vm3, %v3796_v46  ;;  %5194 = vst.msk [vmem:[#allocation2 + $0x2e8] sm:$0xff] %vm5100_vm3, %v3864_v47 }
 0x213   :  { %v6105_v48 = vpop.f32.mrb[132].mxu0  ;;  %v6111_v49 = vpop.f32.mrb[132].mxu1 }
 0x214   :  { %5199 = vst.msk [vmem:[#allocation2 + $0x310] sm:$0xff] %vm5100_vm3, %v6105_v48  ;;  %5203 = vst.msk [vmem:[#allocation2 + $0x330] sm:$0xff] %vm5100_vm3, %v6111_v49  ;;  %v3929_v50 = vpop.f32.mrb[133].mxu0  ;;  %v3997_v51 = vpop.f32.mrb[133].mxu1 }
 0x215   :  { %5197 = vst.msk [vmem:[#allocation2 + $0x300] sm:$0xff] %vm5100_vm3, %v3929_v50  ;;  %5201 = vst.msk [vmem:[#allocation2 + $0x320] sm:$0xff] %vm5100_vm3, %v3997_v51  ;;  %v6106_v52 = vpop.f32.mrb[134].mxu0  ;;  %v6112_v53 = vpop.f32.mrb[134].mxu1 }
 0x216   :  { %5200 = vst.msk [vmem:[#allocation2 + $0x318] sm:$0xff] %vm5100_vm3, %v6106_v52  ;;  %5204 = vst.msk [vmem:[#allocation2 + $0x338] sm:$0xff] %vm5100_vm3, %v6112_v53  ;;  %v3932_v54 = vpop.f32.mrb[135].mxu0  ;;  %v4000_v55 = vpop.f32.mrb[135].mxu1 }
 0x217   :  { %5198 = vst.msk [vmem:[#allocation2 + $0x308] sm:$0xff] %vm5100_vm3, %v3932_v54  ;;  %5202 = vst.msk [vmem:[#allocation2 + $0x328] sm:$0xff] %vm5100_vm3, %v4000_v55 }
 0x21b   :  { %v6117_v56 = vpop.f32.mrb[136].mxu0  ;;  %v6123_v57 = vpop.f32.mrb[136].mxu1 }
 0x21c   :  { %5207 = vst.msk [vmem:[#allocation2 + $0x350] sm:$0xff] %vm5100_vm3, %v6117_v56  ;;  %5211 = vst.msk [vmem:[#allocation2 + $0x370] sm:$0xff] %vm5100_vm3, %v6123_v57  ;;  %v4065_v58 = vpop.f32.mrb[137].mxu0  ;;  %v4133_v59 = vpop.f32.mrb[137].mxu1 }
 0x21d   :  { %5205 = vst.msk [vmem:[#allocation2 + $0x340] sm:$0xff] %vm5100_vm3, %v4065_v58  ;;  %5209 = vst.msk [vmem:[#allocation2 + $0x360] sm:$0xff] %vm5100_vm3, %v4133_v59  ;;  %v6118_v60 = vpop.f32.mrb[138].mxu0  ;;  %v6124_v61 = vpop.f32.mrb[138].mxu1 }
 0x21e   :  { %5208 = vst.msk [vmem:[#allocation2 + $0x358] sm:$0xff] %vm5100_vm3, %v6118_v60  ;;  %5212 = vst.msk [vmem:[#allocation2 + $0x378] sm:$0xff] %vm5100_vm3, %v6124_v61  ;;  %v4068_v62 = vpop.f32.mrb[139].mxu0  ;;  %v4136_v63 = vpop.f32.mrb[139].mxu1 }
 0x21f   :  { %5206 = vst.msk [vmem:[#allocation2 + $0x348] sm:$0xff] %vm5100_vm3, %v4068_v62  ;;  %5210 = vst.msk [vmem:[#allocation2 + $0x368] sm:$0xff] %vm5100_vm3, %v4136_v63 }
 0x223   :  { %v6129_v0 = vpop.f32.mrb[140].mxu0  ;;  %v6135_v1 = vpop.f32.mrb[140].mxu1 }
 0x224   :  { %5215 = vst.msk [vmem:[#allocation2 + $0x390] sm:$0xff] %vm5100_vm3, %v6129_v0  ;;  %5219 = vst.msk [vmem:[#allocation2 + $0x3b0] sm:$0xff] %vm5100_vm3, %v6135_v1  ;;  %v4201_v2 = vpop.f32.mrb[141].mxu0  ;;  %v4269_v3 = vpop.f32.mrb[141].mxu1 }
 0x225   :  { %5213 = vst.msk [vmem:[#allocation2 + $0x380] sm:$0xff] %vm5100_vm3, %v4201_v2  ;;  %5217 = vst.msk [vmem:[#allocation2 + $0x3a0] sm:$0xff] %vm5100_vm3, %v4269_v3  ;;  %v6130_v4 = vpop.f32.mrb[142].mxu0  ;;  %v6136_v5 = vpop.f32.mrb[142].mxu1 }
 0x226   :  { %5216 = vst.msk [vmem:[#allocation2 + $0x398] sm:$0xff] %vm5100_vm3, %v6130_v4  ;;  %5220 = vst.msk [vmem:[#allocation2 + $0x3b8] sm:$0xff] %vm5100_vm3, %v6136_v5  ;;  %v4204_v6 = vpop.f32.mrb[143].mxu0  ;;  %v4272_v7 = vpop.f32.mrb[143].mxu1 }
 0x227   :  { %5214 = vst.msk [vmem:[#allocation2 + $0x388] sm:$0xff] %vm5100_vm3, %v4204_v6  ;;  %5218 = vst.msk [vmem:[#allocation2 + $0x3a8] sm:$0xff] %vm5100_vm3, %v4272_v7 }
 0x22b   :  { %v6141_v8 = vpop.f32.mrb[144].mxu0  ;;  %v6147_v9 = vpop.f32.mrb[144].mxu1 }
 0x22c   :  { %5223 = vst.msk [vmem:[#allocation2 + $0x3d0] sm:$0xff] %vm5100_vm3, %v6141_v8  ;;  %5227 = vst.msk [vmem:[#allocation2 + $0x3f0] sm:$0xff] %vm5100_vm3, %v6147_v9  ;;  %v4337_v10 = vpop.f32.mrb[145].mxu0  ;;  %v4405_v11 = vpop.f32.mrb[145].mxu1 }
 0x22d   :  { %5221 = vst.msk [vmem:[#allocation2 + $0x3c0] sm:$0xff] %vm5100_vm3, %v4337_v10  ;;  %5225 = vst.msk [vmem:[#allocation2 + $0x3e0] sm:$0xff] %vm5100_vm3, %v4405_v11  ;;  %v6142_v12 = vpop.f32.mrb[146].mxu0  ;;  %v6148_v13 = vpop.f32.mrb[146].mxu1 }
 0x22e   :  { %5224 = vst.msk [vmem:[#allocation2 + $0x3d8] sm:$0xff] %vm5100_vm3, %v6142_v12  ;;  %5228 = vst.msk [vmem:[#allocation2 + $0x3f8] sm:$0xff] %vm5100_vm3, %v6148_v13  ;;  %v4340_v14 = vpop.f32.mrb[147].mxu0  ;;  %v4408_v15 = vpop.f32.mrb[147].mxu1 }
 0x22f   :  { %5222 = vst.msk [vmem:[#allocation2 + $0x3c8] sm:$0xff] %vm5100_vm3, %v4340_v14  ;;  %5226 = vst.msk [vmem:[#allocation2 + $0x3e8] sm:$0xff] %vm5100_vm3, %v4408_v15 }
 0x233   :  { %v6153_v16 = vpop.f32.mrb[148].mxu0  ;;  %v6159_v17 = vpop.f32.mrb[148].mxu1 }
 0x234   :  { %5231 = vst.msk [vmem:[#allocation2 + $0x410] sm:$0xff] %vm5100_vm3, %v6153_v16  ;;  %5235 = vst.msk [vmem:[#allocation2 + $0x430] sm:$0xff] %vm5100_vm3, %v6159_v17  ;;  %v4473_v18 = vpop.f32.mrb[149].mxu0  ;;  %v4541_v19 = vpop.f32.mrb[149].mxu1 }
 0x235   :  { %5229 = vst.msk [vmem:[#allocation2 + $0x400] sm:$0xff] %vm5100_vm3, %v4473_v18  ;;  %5233 = vst.msk [vmem:[#allocation2 + $0x420] sm:$0xff] %vm5100_vm3, %v4541_v19  ;;  %v6154_v20 = vpop.f32.mrb[150].mxu0  ;;  %v6160_v21 = vpop.f32.mrb[150].mxu1 }
 0x236   :  { %5232 = vst.msk [vmem:[#allocation2 + $0x418] sm:$0xff] %vm5100_vm3, %v6154_v20  ;;  %5236 = vst.msk [vmem:[#allocation2 + $0x438] sm:$0xff] %vm5100_vm3, %v6160_v21  ;;  %v4476_v22 = vpop.f32.mrb[151].mxu0  ;;  %v4544_v23 = vpop.f32.mrb[151].mxu1 }
 0x237   :  { %5230 = vst.msk [vmem:[#allocation2 + $0x408] sm:$0xff] %vm5100_vm3, %v4476_v22  ;;  %5234 = vst.msk [vmem:[#allocation2 + $0x428] sm:$0xff] %vm5100_vm3, %v4544_v23 }
 0x23b   :  { %v6165_v24 = vpop.f32.mrb[152].mxu0  ;;  %v6171_v25 = vpop.f32.mrb[152].mxu1 }
 0x23c   :  { %5239 = vst.msk [vmem:[#allocation2 + $0x450] sm:$0xff] %vm5100_vm3, %v6165_v24  ;;  %5243 = vst.msk [vmem:[#allocation2 + $0x470] sm:$0xff] %vm5100_vm3, %v6171_v25  ;;  %v4609_v26 = vpop.f32.mrb[153].mxu0  ;;  %v4677_v27 = vpop.f32.mrb[153].mxu1 }
 0x23d   :  { %5237 = vst.msk [vmem:[#allocation2 + $0x440] sm:$0xff] %vm5100_vm3, %v4609_v26  ;;  %5241 = vst.msk [vmem:[#allocation2 + $0x460] sm:$0xff] %vm5100_vm3, %v4677_v27  ;;  %v6166_v28 = vpop.f32.mrb[154].mxu0  ;;  %v6172_v29 = vpop.f32.mrb[154].mxu1 }
 0x23e   :  { %5240 = vst.msk [vmem:[#allocation2 + $0x458] sm:$0xff] %vm5100_vm3, %v6166_v28  ;;  %5244 = vst.msk [vmem:[#allocation2 + $0x478] sm:$0xff] %vm5100_vm3, %v6172_v29  ;;  %v4612_v30 = vpop.f32.mrb[155].mxu0  ;;  %v4680_v31 = vpop.f32.mrb[155].mxu1 }
 0x23f   :  { %5238 = vst.msk [vmem:[#allocation2 + $0x448] sm:$0xff] %vm5100_vm3, %v4612_v30  ;;  %5242 = vst.msk [vmem:[#allocation2 + $0x468] sm:$0xff] %vm5100_vm3, %v4680_v31 }
 0x243   :  { %v6177_v32 = vpop.f32.mrb[156].mxu0  ;;  %v6183_v33 = vpop.f32.mrb[156].mxu1 }
 0x244   :  { %5247 = vst.msk [vmem:[#allocation2 + $0x490] sm:$0xff] %vm5100_vm3, %v6177_v32  ;;  %5251 = vst.msk [vmem:[#allocation2 + $0x4b0] sm:$0xff] %vm5100_vm3, %v6183_v33  ;;  %v4745_v34 = vpop.f32.mrb[157].mxu0  ;;  %v4813_v35 = vpop.f32.mrb[157].mxu1 }
 0x245   :  { %5245 = vst.msk [vmem:[#allocation2 + $0x480] sm:$0xff] %vm5100_vm3, %v4745_v34  ;;  %5249 = vst.msk [vmem:[#allocation2 + $0x4a0] sm:$0xff] %vm5100_vm3, %v4813_v35  ;;  %v6178_v36 = vpop.f32.mrb[158].mxu0  ;;  %v6184_v37 = vpop.f32.mrb[158].mxu1 }
 0x246   :  { %5248 = vst.msk [vmem:[#allocation2 + $0x498] sm:$0xff] %vm5100_vm3, %v6178_v36  ;;  %5252 = vst.msk [vmem:[#allocation2 + $0x4b8] sm:$0xff] %vm5100_vm3, %v6184_v37  ;;  %v4748_v38 = vpop.f32.mrb[159].mxu0  ;;  %v4816_v39 = vpop.f32.mrb[159].mxu1 }
 0x247   :  { %5246 = vst.msk [vmem:[#allocation2 + $0x488] sm:$0xff] %vm5100_vm3, %v4748_v38  ;;  %5250 = vst.msk [vmem:[#allocation2 + $0x4a8] sm:$0xff] %vm5100_vm3, %v4816_v39 }
 0x24b   :  { %v6189_v40 = vpop.f32.mrb[160].mxu0  ;;  %v6195_v41 = vpop.f32.mrb[160].mxu1 }
 0x24c   :  { %5255 = vst.msk [vmem:[#allocation2 + $0x4d0] sm:$0xff] %vm5100_vm3, %v6189_v40  ;;  %5259 = vst.msk [vmem:[#allocation2 + $0x4f0] sm:$0xff] %vm5100_vm3, %v6195_v41  ;;  %v4881_v42 = vpop.f32.mrb[161].mxu0  ;;  %v4949_v43 = vpop.f32.mrb[161].mxu1 }
 0x24d   :  { %5253 = vst.msk [vmem:[#allocation2 + $0x4c0] sm:$0xff] %vm5100_vm3, %v4881_v42  ;;  %5257 = vst.msk [vmem:[#allocation2 + $0x4e0] sm:$0xff] %vm5100_vm3, %v4949_v43  ;;  %v6190_v44 = vpop.f32.mrb[162].mxu0  ;;  %v6196_v45 = vpop.f32.mrb[162].mxu1 }
 0x24e   :  { %5256 = vst.msk [vmem:[#allocation2 + $0x4d8] sm:$0xff] %vm5100_vm3, %v6190_v44  ;;  %5260 = vst.msk [vmem:[#allocation2 + $0x4f8] sm:$0xff] %vm5100_vm3, %v6196_v45  ;;  %v4884_v46 = vpop.f32.mrb[163].mxu0  ;;  %v4952_v47 = vpop.f32.mrb[163].mxu1 }
 0x24f   :  { %5254 = vst.msk [vmem:[#allocation2 + $0x4c8] sm:$0xff] %vm5100_vm3, %v4884_v46  ;;  %5258 = vst.msk [vmem:[#allocation2 + $0x4e8] sm:$0xff] %vm5100_vm3, %v4952_v47 }
 0x253   :  { %v6201_v48 = vpop.f32.mrb[164].mxu0  ;;  %v6207_v49 = vpop.f32.mrb[164].mxu1 }
 0x254   :  { %5263 = vst.msk [vmem:[#allocation2 + $0x510] sm:$0xff] %vm5100_vm3, %v6201_v48  ;;  %5267 = vst.msk [vmem:[#allocation2 + $0x530] sm:$0xff] %vm5100_vm3, %v6207_v49  ;;  %v5017_v50 = vpop.f32.mrb[165].mxu0  ;;  %v5085_v51 = vpop.f32.mrb[165].mxu1 }
 0x255   :  { %5261 = vst.msk [vmem:[#allocation2 + $0x500] sm:$0xff] %vm5100_vm3, %v5017_v50  ;;  %5265 = vst.msk [vmem:[#allocation2 + $0x520] sm:$0xff] %vm5100_vm3, %v5085_v51  ;;  %v6202_v52 = vpop.f32.mrb[166].mxu0  ;;  %v6208_v53 = vpop.f32.mrb[166].mxu1 }
 0x256   :  { %5264 = vst.msk [vmem:[#allocation2 + $0x518] sm:$0xff] %vm5100_vm3, %v6202_v52  ;;  %5268 = vst.msk [vmem:[#allocation2 + $0x538] sm:$0xff] %vm5100_vm3, %v6208_v53  ;;  %v5020_v54 = vpop.f32.mrb[167].mxu0  ;;  %v5088_v55 = vpop.f32.mrb[167].mxu1 }
 0x257   :  { %5262 = vst.msk [vmem:[#allocation2 + $0x508] sm:$0xff] %vm5100_vm3, %v5020_v54  ;;  %5266 = vst.msk [vmem:[#allocation2 + $0x528] sm:$0xff] %vm5100_vm3, %v5088_v55 }
 0x258   :  { %6351 = shalt.err (!%p6348_p4)
}
 0x259   :  { %s6352_s15 = scalar_lea.hbm %s7460_s3, 21504 }
 0x25a   :  { %p6353_p5 = scmp.ne.s32.totalorder %s7460_s3, %s6352_s15  ;;  %p6356_p6 = scmp.lt.u32.totalorder %s6352_s15, %s7460_s3 }
 0x25c   :  { %p6358_p7 = pnand %p6356_p6, %p6353_p5 }
 0x25e   :  { %6361 = shalt.err (!%p6358_p7)
}
 0x25f   :  { %s6367_s20 = smov 128   ;;  %s6368_s0 = smov 8  }
 0x260   :  { %5280 = dma.vmem_to_hbm [thread:$0]  %s5275_s12, 21504, %s7460_s3, [#allocation3], %s6367_s20, %s6367_s20, %s6368_s0  }
 0x261   :  { %6362 = dma.done.wait [#allocation3], 21504  }
 0x262   :  { %6363 = vsyncadd [#allocation3], 4294945792 }
 0x263   :  { %5284 = vsyncpa [#allocation3], 1 }

</bundles_post_ra>
